<compile_context>
chip_gen: v6e
topology: v6e:2x2x1
jax: 0.10.0
libtpu: 0.0.40
codegen_flags: <defaults>
</compile_context>

<pallas_src>
import functools

import jax
import jax.numpy as jnp
from jax.experimental import pallas as pl
from jax.experimental.pallas import tpu as pltpu

# Set to jnp.bfloat16 on v6e/v7x for native-rate MXU matmuls (accumulation stays
# f32 via preferred_element_type). f32 default keeps parity with the PyTorch ref.
COMPUTE_DTYPE = jnp.float32


# ---------------------------------------------------------------------------
# Fused encoder-stack Pallas kernel
# ---------------------------------------------------------------------------
def encoder_stack_kernel(x_ref, mk_ref, pos_ref,
                         wqkv_ref, wo_ref, w1_ref, w2_ref, vd_ref, vf_ref,
                         out_ref, *, num_heads, num_layers):
    """Post-LN transformer encoder stack + masked mean pool for one block of
    sequences.  x_ref: (NB, S, D); mk_ref: (NB, 1, S); out_ref: (1, NB, D)."""
    nb, S, D = x_ref.shape
    hd = D // num_heads
    R = nb * S
    scale = 1.0 / float(hd) ** 0.5

    mk = mk_ref[...]                                    # (nb, 1, S); 1.0 = valid
    key_bias = (1.0 - mk) * (-1e9)

    # positional embedding added in-kernel; work on a (rows, D) slab.
    x = (x_ref[...] + pos_ref[...]).reshape(R, D)

    for l in range(num_layers):                         # unrolled (static L)
        wqkv = wqkv_ref[l].astype(COMPUTE_DTYPE)        # (D, 3D)
        wo = wo_ref[l].astype(COMPUTE_DTYPE)            # (D, D)
        w1 = w1_ref[l].astype(COMPUTE_DTYPE)            # (D, F)
        w2 = w2_ref[l].astype(COMPUTE_DTYPE)            # (F, D)
        vd = vd_ref[l]                                  # (9, D): bq bk bv bo g1 bb1 b2 g2 bb2
        b1 = vf_ref[l]                                  # (1, F)

        # fused QKV projection
        qkv = jnp.dot(x.astype(COMPUTE_DTYPE), wqkv,
                      preferred_element_type=jnp.float32)            # (R, 3D)
        q = (qkv[:, 0 * D:1 * D] + vd[0:1]).reshape(nb, S, D)
        k = (qkv[:, 1 * D:2 * D] + vd[1:2]).reshape(nb, S, D)
        v = (qkv[:, 2 * D:3 * D] + vd[2:3]).reshape(nb, S, D)

        # multi-head attention, batched over the nb sequences in the block.
        # Each head's output is folded through the matching row-slice of W_o,
        # so no lane-concatenate of head outputs is needed.
        attn = jnp.zeros((R, D), jnp.float32)
        for h in range(num_heads):
            sl = slice(h * hd, (h + 1) * hd)
            qh, kh, vh = q[:, :, sl], k[:, :, sl], v[:, :, sl]
            sc = jnp.einsum('bqd,bkd->bqk', qh.astype(COMPUTE_DTYPE),
                            kh.astype(COMPUTE_DTYPE),
                            preferred_element_type=jnp.float32) * scale
            sc = sc + key_bias                                        # mask keys
            sc = sc - jnp.max(sc, axis=-1, keepdims=True)
            p = jnp.exp(sc)
            p = p * pl.reciprocal(jnp.sum(p, axis=-1, keepdims=True), approx=True)
            oh = jnp.einsum('bqk,bkd->bqd', p.astype(COMPUTE_DTYPE),
                            vh.astype(COMPUTE_DTYPE),
                            preferred_element_type=jnp.float32)       # (nb, S, hd)
            attn = attn + jnp.dot(oh.reshape(R, hd).astype(COMPUTE_DTYPE),
                                  wo[sl, :], preferred_element_type=jnp.float32)
        attn = attn + vd[3:4]                                         # + b_o

        # residual + LayerNorm 1 (f32)
        y = x + attn
        mu = jnp.mean(y, axis=-1, keepdims=True)
        var = jnp.mean((y - mu) ** 2, axis=-1, keepdims=True)
        y = (y - mu) * jax.lax.rsqrt(var + 1e-5) * vd[4:5] + vd[5:6]

        # feed-forward
        h1 = jnp.dot(y.astype(COMPUTE_DTYPE), w1,
                     preferred_element_type=jnp.float32) + b1
        h1 = jnp.maximum(h1, 0.0)
        h2 = jnp.dot(h1.astype(COMPUTE_DTYPE), w2,
                     preferred_element_type=jnp.float32) + vd[6:7]

        # residual + LayerNorm 2 (f32)
        z = y + h2
        mu2 = jnp.mean(z, axis=-1, keepdims=True)
        var2 = jnp.mean((z - mu2) ** 2, axis=-1, keepdims=True)
        x = (z - mu2) * jax.lax.rsqrt(var2 + 1e-5) * vd[7:8] + vd[8:9]

    # masked mean pooling over the sequence axis (sum done as mask @ x on MXU)
    xs = x.reshape(nb, S, D)
    s = jnp.einsum('bks,bsd->bkd', mk, xs,
                   preferred_element_type=jnp.float32).reshape(nb, D)
    cnt = jnp.maximum(jnp.sum(mk, axis=-1), 1.0)                      # (nb, 1)
    out_ref[0] = s * pl.reciprocal(cnt, approx=True)


# ---------------------------------------------------------------------------
# Pallas wrapper
# ---------------------------------------------------------------------------
def _pick_block_rows(n, max_rows=8):
    """Largest divisor of n that keeps >=2 grid steps (v7x dual TensorCore),
    capped at max_rows sequences per block; whole slab when n == 1."""
    if n < 2:
        return n
    best = 1
    for nb in range(1, min(n // 2, max_rows) + 1):
        if n % nb == 0:
            best = nb
    return best


def _rep_spec(shape):
    return pl.BlockSpec(shape, lambda b, _n=len(shape): (0,) * _n)


def encoder_tf(x, mask, p, num_heads):
    """Fused encoder stack.  x: (N, S, D) float32, mask: (N, S) -> (N, D)."""
    N, S, D = x.shape
    L = p["wqkv"].shape[0]
    F = p["w1"].shape[2]
    nb = _pick_block_rows(N)
    g = N // nb
    mask_k = mask.reshape(N, 1, S).astype(jnp.float32)
    pos = p["pos"][:S]

    kern = functools.partial(encoder_stack_kernel,
                             num_heads=num_heads, num_layers=L)
    out = pl.pallas_call(
        kern,
        out_shape=jax.ShapeDtypeStruct((g, nb, D), jnp.float32),
        grid=(g,),
        in_specs=[
            pl.BlockSpec((nb, S, D), lambda b: (b, 0, 0)),   # activations
            pl.BlockSpec((nb, 1, S), lambda b: (b, 0, 0)),   # key mask
            _rep_spec((S, D)),                               # positional emb
            _rep_spec((L, D, 3 * D)),                        # fused Wqkv
            _rep_spec((L, D, D)),                            # Wo
            _rep_spec((L, D, F)),                            # FFN W1
            _rep_spec((L, F, D)),                            # FFN W2
            _rep_spec((L, 9, D)),                            # packed D-sized vecs
            _rep_spec((L, 1, F)),                            # FFN bias 1
        ],
        out_specs=pl.BlockSpec((1, nb, D), lambda b: (b, 0, 0)),
        compiler_params=pltpu.CompilerParams(dimension_semantics=("parallel",)),
    )(x, mask_k, pos, p["wqkv"], p["wo"], p["w1"], p["w2"], p["vd"], p["vf"])
    return out.reshape(N, D)


# ---------------------------------------------------------------------------
# SpatialEncoder forward (window folded into batch)
# ---------------------------------------------------------------------------
def spatial_encoder_forward(params, loc_batch, mask_day, mask_traj, num_heads):
    B, W, T = loc_batch.shape
    D = params["embed"].shape[1]
    # 'nn' branch: embedding-table lookup; window folded into the batch axis so
    # the day encoder runs once over the whole (B*W, T, D) slab.
    loc_embed = jnp.take(params["embed"], loc_batch.reshape(B * W, T), axis=0)
    loc_day = encoder_tf(loc_embed, mask_traj.reshape(B * W, T),
                         params["day"], num_heads)               # (B*W, D)
    loc_day_all = loc_day.reshape(B, W, D)
    loc_week = encoder_tf(loc_day_all, mask_day, params["week"], num_heads)
    return loc_week, loc_day_all


# ---------------------------------------------------------------------------
# Deterministic parameter init (stacked / packed layout)
# ---------------------------------------------------------------------------
def init_encoder_params(key, D, F, num_layers, max_len):
    k_pos, k_qkv, k_o, k_1, k_2 = jax.random.split(key, 5)
    pos = 0.02 * jax.random.normal(k_pos, (max_len, D), jnp.float32)
    wqkv = 0.02 * jax.random.normal(k_qkv, (num_layers, D, 3 * D), jnp.float32)
    wo = 0.02 * jax.random.normal(k_o, (num_layers, D, D), jnp.float32)
    w1 = 0.02 * jax.random.normal(k_1, (num_layers, D, F), jnp.float32)
    w2 = 0.02 * jax.random.normal(k_2, (num_layers, F, D), jnp.float32)
    # packed D-sized vectors: [bq, bk, bv, bo, ln1_g, ln1_b, ffn_b2, ln2_g, ln2_b]
    vd = jnp.zeros((num_layers, 9, D), jnp.float32)
    vd = vd.at[:, 4, :].set(1.0)   # LN1 gamma
    vd = vd.at[:, 7, :].set(1.0)   # LN2 gamma
    vf = jnp.zeros((num_layers, 1, F), jnp.float32)   # FFN bias 1
    return dict(pos=pos, wqkv=wqkv, wo=wo, w1=w1, w2=w2, vd=vd, vf=vf)


if __name__ == "__main__":
    # small, SpatialEncoder-consistent shapes
    B, win_len, traj_len = 2, 2, 8
    lid_size = 16
    vocab = lid_size + 3                  # params.lid_size + 3
    dim_embed_loc = 32                    # params.dim_embed_loc
    head_num_loc = 4                      # params.head_num_loc
    dim_enc_loc = 64                      # params.dim_enc_loc (FFN hidden)
    num_enc_loc = 2                       # params.num_enc_loc
    max_len = traj_len + 2                # params.traj_len + 2

    key = jax.random.PRNGKey(0)
    k_embed, k_day, k_week, k_loc, k_mt = jax.random.split(key, 5)

    params = dict(
        embed=0.02 * jax.random.normal(k_embed, (vocab, dim_embed_loc), jnp.float32),
        day=init_encoder_params(k_day, dim_embed_loc, dim_enc_loc, num_enc_loc, max_len),
        week=init_encoder_params(k_week, dim_embed_loc, dim_enc_loc, num_enc_loc, max_len),
    )
    # TODO(synk): 'gnn' branch (modules.gnnEmbedder) not implemented; only the
    # 'nn' embedding-table branch is reproduced.
    # TODO(synk): modules.EncoderTF internals are not provided; assumed post-LN
    # transformer encoder with learned positional embeddings and masked mean
    # pooling (same assumption as the previous version).

    loc_batch = jax.random.randint(k_loc, (B, win_len, traj_len), 0, vocab, jnp.int32)
    mask_traj = (jax.random.uniform(k_mt, (B, win_len, traj_len)) > 0.2).astype(jnp.float32)
    mask_traj = mask_traj.at[:, :, 0].set(1.0)    # at least one valid token per day
    mask_day = jnp.ones((B, win_len), jnp.float32)

    fwd = jax.jit(functools.partial(spatial_encoder_forward, num_heads=head_num_loc))
    loc_week, loc_day_all = fwd(params, loc_batch, mask_day, mask_traj)
    jax.block_until_ready((loc_week, loc_day_all))

    assert loc_week.shape == (B, dim_embed_loc)
    assert loc_day_all.shape == (B, win_len, dim_embed_loc)
    assert jnp.all(jnp.isfinite(loc_week)) and jnp.all(jnp.isfinite(loc_day_all))
    print("KERNEL_OK")
</pallas_src>

<mosaic_0001>
module attributes {stable_mosaic.version = 11 : i64} {
  func.func @encoder_stack_kernel(%arg0: i32, %arg1: memref<1x2x32xf32, #tpu.memory_space<vmem>>, %arg2: memref<1x1x2xf32, #tpu.memory_space<vmem>>, %arg3: memref<2x32xf32, #tpu.memory_space<vmem>>, %arg4: memref<2x32x96xf32, #tpu.memory_space<vmem>>, %arg5: memref<2x32x32xf32, #tpu.memory_space<vmem>>, %arg6: memref<2x32x64xf32, #tpu.memory_space<vmem>>, %arg7: memref<2x64x32xf32, #tpu.memory_space<vmem>>, %arg8: memref<2x9x32xf32, #tpu.memory_space<vmem>>, %arg9: memref<2x1x64xf32, #tpu.memory_space<vmem>>, %arg10: memref<1x1x32xf32, #tpu.memory_space<vmem>>) attributes {dimension_semantics = [#tpu.dimension_semantics<parallel>], iteration_bounds = array<i64: 2>, scalar_prefetch = 0 : i64, scratch_operands = 0 : i64, tpu.core_type = #tpu.core_type<tc>, window_params = [{transform_indices = @transform_0, window_bounds = array<i64: 1, 2, 32>}, {transform_indices = @transform_1, window_bounds = array<i64: 1, 1, 2>}, {pipeline_mode = #tpu.pipeline_mode<synchronous>, transform_indices = @transform_2, window_bounds = array<i64: 2, 32>}, {pipeline_mode = #tpu.pipeline_mode<synchronous>, transform_indices = @transform_3, window_bounds = array<i64: 2, 32, 96>}, {pipeline_mode = #tpu.pipeline_mode<synchronous>, transform_indices = @transform_4, window_bounds = array<i64: 2, 32, 32>}, {pipeline_mode = #tpu.pipeline_mode<synchronous>, transform_indices = @transform_5, window_bounds = array<i64: 2, 32, 64>}, {pipeline_mode = #tpu.pipeline_mode<synchronous>, transform_indices = @transform_6, window_bounds = array<i64: 2, 64, 32>}, {pipeline_mode = #tpu.pipeline_mode<synchronous>, transform_indices = @transform_7, window_bounds = array<i64: 2, 9, 32>}, {pipeline_mode = #tpu.pipeline_mode<synchronous>, transform_indices = @transform_8, window_bounds = array<i64: 2, 1, 64>}, {transform_indices = @transform_9, window_bounds = array<i64: 1, 1, 32>}]} {
    %c0 = arith.constant 0 : index
    %c0_0 = arith.constant 0 : index
    %c0_1 = arith.constant 0 : index
    %0 = vector.load %arg2[%c0, %c0_0, %c0_1] : memref<1x1x2xf32, #tpu.memory_space<vmem>>, vector<1x1x2xf32>
    %cst = arith.constant 1.000000e+00 : f32
    %1 = vector.broadcast %cst : f32 to vector<1x1x2xf32>
    %2 = arith.subf %1, %0 : vector<1x1x2xf32>
    %cst_2 = arith.constant -1.000000e+09 : f32
    %3 = vector.broadcast %cst_2 : f32 to vector<1x1x2xf32>
    %4 = arith.mulf %2, %3 : vector<1x1x2xf32>
    %c0_3 = arith.constant 0 : index
    %c0_4 = arith.constant 0 : index
    %c0_5 = arith.constant 0 : index
    %5 = vector.load %arg1[%c0_3, %c0_4, %c0_5] : memref<1x2x32xf32, #tpu.memory_space<vmem>>, vector<1x2x32xf32>
    %c0_6 = arith.constant 0 : index
    %c0_7 = arith.constant 0 : index
    %6 = vector.load %arg3[%c0_6, %c0_7] : memref<2x32xf32, #tpu.memory_space<vmem>>, vector<2x32xf32>
    %7 = vector.shape_cast %6 : vector<2x32xf32> to vector<1x2x32xf32>
    %8 = arith.addf %5, %7 : vector<1x2x32xf32>
    %9 = vector.shape_cast %8 : vector<1x2x32xf32> to vector<2x32xf32>
    %c0_8 = arith.constant 0 : index
    %c0_9 = arith.constant 0 : index
    %c0_10 = arith.constant 0 : index
    %10 = vector.load %arg4[%c0_8, %c0_9, %c0_10] : memref<2x32x96xf32, #tpu.memory_space<vmem>>, vector<1x32x96xf32>
    %11 = vector.shape_cast %10 : vector<1x32x96xf32> to vector<32x96xf32>
    %c0_11 = arith.constant 0 : index
    %c0_12 = arith.constant 0 : index
    %c0_13 = arith.constant 0 : index
    %12 = vector.load %arg5[%c0_11, %c0_12, %c0_13] : memref<2x32x32xf32, #tpu.memory_space<vmem>>, vector<1x32x32xf32>
    %13 = vector.shape_cast %12 : vector<1x32x32xf32> to vector<32x32xf32>
    %c0_14 = arith.constant 0 : index
    %c0_15 = arith.constant 0 : index
    %c0_16 = arith.constant 0 : index
    %14 = vector.load %arg6[%c0_14, %c0_15, %c0_16] : memref<2x32x64xf32, #tpu.memory_space<vmem>>, vector<1x32x64xf32>
    %15 = vector.shape_cast %14 : vector<1x32x64xf32> to vector<32x64xf32>
    %c0_17 = arith.constant 0 : index
    %c0_18 = arith.constant 0 : index
    %c0_19 = arith.constant 0 : index
    %16 = vector.load %arg7[%c0_17, %c0_18, %c0_19] : memref<2x64x32xf32, #tpu.memory_space<vmem>>, vector<1x64x32xf32>
    %17 = vector.shape_cast %16 : vector<1x64x32xf32> to vector<64x32xf32>
    %c0_20 = arith.constant 0 : index
    %c0_21 = arith.constant 0 : index
    %c0_22 = arith.constant 0 : index
    %18 = vector.load %arg8[%c0_20, %c0_21, %c0_22] : memref<2x9x32xf32, #tpu.memory_space<vmem>>, vector<1x9x32xf32>
    %19 = vector.shape_cast %18 : vector<1x9x32xf32> to vector<9x32xf32>
    %c0_23 = arith.constant 0 : index
    %c0_24 = arith.constant 0 : index
    %c0_25 = arith.constant 0 : index
    %20 = vector.load %arg9[%c0_23, %c0_24, %c0_25] : memref<2x1x64xf32, #tpu.memory_space<vmem>>, vector<1x1x64xf32>
    %21 = vector.shape_cast %20 : vector<1x1x64xf32> to vector<1x64xf32>
    %cst_26 = arith.constant dense<0.000000e+00> : vector<2x96xf32>
    %22 = tpu.matmul %9, %11, %cst_26 {dimension_numbers = #tpu.dot_dimension_numbers<[1], [0], [0], [1], [0, 0, 1, 1], [], []>} : vector<2x32xf32>, vector<32x96xf32>, vector<2x96xf32> -> vector<2x96xf32>
    %23 = vector.extract_strided_slice %22 {offsets = [0, 0], sizes = [2, 32], strides = [1, 1]} : vector<2x96xf32> to vector<2x32xf32>
    %24 = vector.extract_strided_slice %19 {offsets = [0, 0], sizes = [1, 32], strides = [1, 1]} : vector<9x32xf32> to vector<1x32xf32>
    %25 = vector.broadcast %24 : vector<1x32xf32> to vector<2x32xf32>
    %26 = arith.addf %23, %25 : vector<2x32xf32>
    %27 = vector.shape_cast %26 : vector<2x32xf32> to vector<1x2x32xf32>
    %28 = vector.extract_strided_slice %22 {offsets = [0, 32], sizes = [2, 32], strides = [1, 1]} : vector<2x96xf32> to vector<2x32xf32>
    %29 = vector.extract_strided_slice %19 {offsets = [1, 0], sizes = [1, 32], strides = [1, 1]} : vector<9x32xf32> to vector<1x32xf32>
    %30 = vector.broadcast %29 : vector<1x32xf32> to vector<2x32xf32>
    %31 = arith.addf %28, %30 : vector<2x32xf32>
    %32 = vector.shape_cast %31 : vector<2x32xf32> to vector<1x2x32xf32>
    %33 = vector.extract_strided_slice %22 {offsets = [0, 64], sizes = [2, 32], strides = [1, 1]} : vector<2x96xf32> to vector<2x32xf32>
    %34 = vector.extract_strided_slice %19 {offsets = [2, 0], sizes = [1, 32], strides = [1, 1]} : vector<9x32xf32> to vector<1x32xf32>
    %35 = vector.broadcast %34 : vector<1x32xf32> to vector<2x32xf32>
    %36 = arith.addf %33, %35 : vector<2x32xf32>
    %37 = vector.shape_cast %36 : vector<2x32xf32> to vector<1x2x32xf32>
    %cst_27 = arith.constant 0.000000e+00 : f32
    %38 = vector.broadcast %cst_27 : f32 to vector<2x32xf32>
    %39 = vector.extract_strided_slice %27 {offsets = [0, 0, 0], sizes = [1, 2, 8], strides = [1, 1, 1]} : vector<1x2x32xf32> to vector<1x2x8xf32>
    %40 = vector.extract_strided_slice %32 {offsets = [0, 0, 0], sizes = [1, 2, 8], strides = [1, 1, 1]} : vector<1x2x32xf32> to vector<1x2x8xf32>
    %41 = vector.extract_strided_slice %37 {offsets = [0, 0, 0], sizes = [1, 2, 8], strides = [1, 1, 1]} : vector<1x2x32xf32> to vector<1x2x8xf32>
    "tpu.trace_start"() <{level = 10 : i32, message = "bqd,bkd->bqk"}> : () -> ()
    %cst_28 = arith.constant dense<0.000000e+00> : vector<1x2x2xf32>
    %42 = tpu.matmul %39, %40, %cst_28 {dimension_numbers = #tpu.dot_dimension_numbers<[2], [2], [1], [1], [0, 0, 0, 1, 1, 1], [0], [0]>} : vector<1x2x8xf32>, vector<1x2x8xf32>, vector<1x2x2xf32> -> vector<1x2x2xf32>
    "tpu.trace_stop"() : () -> ()
    %cst_29 = arith.constant 0.353553385 : f32
    %43 = vector.broadcast %cst_29 : f32 to vector<1x2x2xf32>
    %44 = arith.mulf %42, %43 : vector<1x2x2xf32>
    %45 = vector.broadcast %4 : vector<1x1x2xf32> to vector<1x2x2xf32>
    %46 = arith.addf %44, %45 : vector<1x2x2xf32>
    %cst_30 = arith.constant dense<0xFF800000> : vector<1x2xf32>
    %47 = vector.multi_reduction <maximumf>, %46, %cst_30 [2] : vector<1x2x2xf32> to vector<1x2xf32>
    %48 = vector.shape_cast %47 : vector<1x2xf32> to vector<1x2x1xf32>
    %49 = vector.broadcast %48 : vector<1x2x1xf32> to vector<1x2x2xf32>
    %50 = arith.subf %46, %49 : vector<1x2x2xf32>
    %51 = math.exp %50 : vector<1x2x2xf32>
    %cst_31 = arith.constant dense<0.000000e+00> : vector<1x2xf32>
    %52 = vector.multi_reduction <add>, %51, %cst_31 [2] : vector<1x2x2xf32> to vector<1x2xf32>
    %53 = vector.shape_cast %52 : vector<1x2xf32> to vector<1x2x1xf32>
    %54 = tpu.reciprocal %53 {approx = true} : vector<1x2x1xf32> -> vector<1x2x1xf32>
    %55 = vector.broadcast %54 : vector<1x2x1xf32> to vector<1x2x2xf32>
    %56 = arith.mulf %51, %55 : vector<1x2x2xf32>
    "tpu.trace_start"() <{level = 10 : i32, message = "bqk,bkd->bqd"}> : () -> ()
    %cst_32 = arith.constant dense<0.000000e+00> : vector<1x2x8xf32>
    %57 = tpu.matmul %56, %41, %cst_32 {dimension_numbers = #tpu.dot_dimension_numbers<[2], [1], [1], [2], [0, 0, 0, 1, 1, 2], [0], [0]>} : vector<1x2x2xf32>, vector<1x2x8xf32>, vector<1x2x8xf32> -> vector<1x2x8xf32>
    "tpu.trace_stop"() : () -> ()
    %58 = vector.shape_cast %57 : vector<1x2x8xf32> to vector<2x8xf32>
    %59 = vector.extract_strided_slice %13 {offsets = [0, 0], sizes = [8, 32], strides = [1, 1]} : vector<32x32xf32> to vector<8x32xf32>
    %cst_33 = arith.constant dense<0.000000e+00> : vector<2x32xf32>
    %60 = tpu.matmul %58, %59, %cst_33 {dimension_numbers = #tpu.dot_dimension_numbers<[1], [0], [0], [1], [0, 0, 1, 1], [], []>} : vector<2x8xf32>, vector<8x32xf32>, vector<2x32xf32> -> vector<2x32xf32>
    %61 = arith.addf %38, %60 : vector<2x32xf32>
    %62 = vector.extract_strided_slice %27 {offsets = [0, 0, 8], sizes = [1, 2, 8], strides = [1, 1, 1]} : vector<1x2x32xf32> to vector<1x2x8xf32>
    %63 = vector.extract_strided_slice %32 {offsets = [0, 0, 8], sizes = [1, 2, 8], strides = [1, 1, 1]} : vector<1x2x32xf32> to vector<1x2x8xf32>
    %64 = vector.extract_strided_slice %37 {offsets = [0, 0, 8], sizes = [1, 2, 8], strides = [1, 1, 1]} : vector<1x2x32xf32> to vector<1x2x8xf32>
    "tpu.trace_start"() <{level = 10 : i32, message = "bqd,bkd->bqk"}> : () -> ()
    %cst_34 = arith.constant dense<0.000000e+00> : vector<1x2x2xf32>
    %65 = tpu.matmul %62, %63, %cst_34 {dimension_numbers = #tpu.dot_dimension_numbers<[2], [2], [1], [1], [0, 0, 0, 1, 1, 1], [0], [0]>} : vector<1x2x8xf32>, vector<1x2x8xf32>, vector<1x2x2xf32> -> vector<1x2x2xf32>
    "tpu.trace_stop"() : () -> ()
    %cst_35 = arith.constant 0.353553385 : f32
    %66 = vector.broadcast %cst_35 : f32 to vector<1x2x2xf32>
    %67 = arith.mulf %65, %66 : vector<1x2x2xf32>
    %68 = vector.broadcast %4 : vector<1x1x2xf32> to vector<1x2x2xf32>
    %69 = arith.addf %67, %68 : vector<1x2x2xf32>
    %cst_36 = arith.constant dense<0xFF800000> : vector<1x2xf32>
    %70 = vector.multi_reduction <maximumf>, %69, %cst_36 [2] : vector<1x2x2xf32> to vector<1x2xf32>
    %71 = vector.shape_cast %70 : vector<1x2xf32> to vector<1x2x1xf32>
    %72 = vector.broadcast %71 : vector<1x2x1xf32> to vector<1x2x2xf32>
    %73 = arith.subf %69, %72 : vector<1x2x2xf32>
    %74 = math.exp %73 : vector<1x2x2xf32>
    %cst_37 = arith.constant dense<0.000000e+00> : vector<1x2xf32>
    %75 = vector.multi_reduction <add>, %74, %cst_37 [2] : vector<1x2x2xf32> to vector<1x2xf32>
    %76 = vector.shape_cast %75 : vector<1x2xf32> to vector<1x2x1xf32>
    %77 = tpu.reciprocal %76 {approx = true} : vector<1x2x1xf32> -> vector<1x2x1xf32>
    %78 = vector.broadcast %77 : vector<1x2x1xf32> to vector<1x2x2xf32>
    %79 = arith.mulf %74, %78 : vector<1x2x2xf32>
    "tpu.trace_start"() <{level = 10 : i32, message = "bqk,bkd->bqd"}> : () -> ()
    %cst_38 = arith.constant dense<0.000000e+00> : vector<1x2x8xf32>
    %80 = tpu.matmul %79, %64, %cst_38 {dimension_numbers = #tpu.dot_dimension_numbers<[2], [1], [1], [2], [0, 0, 0, 1, 1, 2], [0], [0]>} : vector<1x2x2xf32>, vector<1x2x8xf32>, vector<1x2x8xf32> -> vector<1x2x8xf32>
    "tpu.trace_stop"() : () -> ()
    %81 = vector.shape_cast %80 : vector<1x2x8xf32> to vector<2x8xf32>
    %82 = vector.extract_strided_slice %13 {offsets = [8, 0], sizes = [8, 32], strides = [1, 1]} : vector<32x32xf32> to vector<8x32xf32>
    %cst_39 = arith.constant dense<0.000000e+00> : vector<2x32xf32>
    %83 = tpu.matmul %81, %82, %cst_39 {dimension_numbers = #tpu.dot_dimension_numbers<[1], [0], [0], [1], [0, 0, 1, 1], [], []>} : vector<2x8xf32>, vector<8x32xf32>, vector<2x32xf32> -> vector<2x32xf32>
    %84 = arith.addf %61, %83 : vector<2x32xf32>
    %85 = vector.extract_strided_slice %27 {offsets = [0, 0, 16], sizes = [1, 2, 8], strides = [1, 1, 1]} : vector<1x2x32xf32> to vector<1x2x8xf32>
    %86 = vector.extract_strided_slice %32 {offsets = [0, 0, 16], sizes = [1, 2, 8], strides = [1, 1, 1]} : vector<1x2x32xf32> to vector<1x2x8xf32>
    %87 = vector.extract_strided_slice %37 {offsets = [0, 0, 16], sizes = [1, 2, 8], strides = [1, 1, 1]} : vector<1x2x32xf32> to vector<1x2x8xf32>
    "tpu.trace_start"() <{level = 10 : i32, message = "bqd,bkd->bqk"}> : () -> ()
    %cst_40 = arith.constant dense<0.000000e+00> : vector<1x2x2xf32>
    %88 = tpu.matmul %85, %86, %cst_40 {dimension_numbers = #tpu.dot_dimension_numbers<[2], [2], [1], [1], [0, 0, 0, 1, 1, 1], [0], [0]>} : vector<1x2x8xf32>, vector<1x2x8xf32>, vector<1x2x2xf32> -> vector<1x2x2xf32>
    "tpu.trace_stop"() : () -> ()
    %cst_41 = arith.constant 0.353553385 : f32
    %89 = vector.broadcast %cst_41 : f32 to vector<1x2x2xf32>
    %90 = arith.mulf %88, %89 : vector<1x2x2xf32>
    %91 = vector.broadcast %4 : vector<1x1x2xf32> to vector<1x2x2xf32>
    %92 = arith.addf %90, %91 : vector<1x2x2xf32>
    %cst_42 = arith.constant dense<0xFF800000> : vector<1x2xf32>
    %93 = vector.multi_reduction <maximumf>, %92, %cst_42 [2] : vector<1x2x2xf32> to vector<1x2xf32>
    %94 = vector.shape_cast %93 : vector<1x2xf32> to vector<1x2x1xf32>
    %95 = vector.broadcast %94 : vector<1x2x1xf32> to vector<1x2x2xf32>
    %96 = arith.subf %92, %95 : vector<1x2x2xf32>
    %97 = math.exp %96 : vector<1x2x2xf32>
    %cst_43 = arith.constant dense<0.000000e+00> : vector<1x2xf32>
    %98 = vector.multi_reduction <add>, %97, %cst_43 [2] : vector<1x2x2xf32> to vector<1x2xf32>
    %99 = vector.shape_cast %98 : vector<1x2xf32> to vector<1x2x1xf32>
    %100 = tpu.reciprocal %99 {approx = true} : vector<1x2x1xf32> -> vector<1x2x1xf32>
    %101 = vector.broadcast %100 : vector<1x2x1xf32> to vector<1x2x2xf32>
    %102 = arith.mulf %97, %101 : vector<1x2x2xf32>
    "tpu.trace_start"() <{level = 10 : i32, message = "bqk,bkd->bqd"}> : () -> ()
    %cst_44 = arith.constant dense<0.000000e+00> : vector<1x2x8xf32>
    %103 = tpu.matmul %102, %87, %cst_44 {dimension_numbers = #tpu.dot_dimension_numbers<[2], [1], [1], [2], [0, 0, 0, 1, 1, 2], [0], [0]>} : vector<1x2x2xf32>, vector<1x2x8xf32>, vector<1x2x8xf32> -> vector<1x2x8xf32>
    "tpu.trace_stop"() : () -> ()
    %104 = vector.shape_cast %103 : vector<1x2x8xf32> to vector<2x8xf32>
    %105 = vector.extract_strided_slice %13 {offsets = [16, 0], sizes = [8, 32], strides = [1, 1]} : vector<32x32xf32> to vector<8x32xf32>
    %cst_45 = arith.constant dense<0.000000e+00> : vector<2x32xf32>
    %106 = tpu.matmul %104, %105, %cst_45 {dimension_numbers = #tpu.dot_dimension_numbers<[1], [0], [0], [1], [0, 0, 1, 1], [], []>} : vector<2x8xf32>, vector<8x32xf32>, vector<2x32xf32> -> vector<2x32xf32>
    %107 = arith.addf %84, %106 : vector<2x32xf32>
    %108 = vector.extract_strided_slice %27 {offsets = [0, 0, 24], sizes = [1, 2, 8], strides = [1, 1, 1]} : vector<1x2x32xf32> to vector<1x2x8xf32>
    %109 = vector.extract_strided_slice %32 {offsets = [0, 0, 24], sizes = [1, 2, 8], strides = [1, 1, 1]} : vector<1x2x32xf32> to vector<1x2x8xf32>
    %110 = vector.extract_strided_slice %37 {offsets = [0, 0, 24], sizes = [1, 2, 8], strides = [1, 1, 1]} : vector<1x2x32xf32> to vector<1x2x8xf32>
    "tpu.trace_start"() <{level = 10 : i32, message = "bqd,bkd->bqk"}> : () -> ()
    %cst_46 = arith.constant dense<0.000000e+00> : vector<1x2x2xf32>
    %111 = tpu.matmul %108, %109, %cst_46 {dimension_numbers = #tpu.dot_dimension_numbers<[2], [2], [1], [1], [0, 0, 0, 1, 1, 1], [0], [0]>} : vector<1x2x8xf32>, vector<1x2x8xf32>, vector<1x2x2xf32> -> vector<1x2x2xf32>
    "tpu.trace_stop"() : () -> ()
    %cst_47 = arith.constant 0.353553385 : f32
    %112 = vector.broadcast %cst_47 : f32 to vector<1x2x2xf32>
    %113 = arith.mulf %111, %112 : vector<1x2x2xf32>
    %114 = vector.broadcast %4 : vector<1x1x2xf32> to vector<1x2x2xf32>
    %115 = arith.addf %113, %114 : vector<1x2x2xf32>
    %cst_48 = arith.constant dense<0xFF800000> : vector<1x2xf32>
    %116 = vector.multi_reduction <maximumf>, %115, %cst_48 [2] : vector<1x2x2xf32> to vector<1x2xf32>
    %117 = vector.shape_cast %116 : vector<1x2xf32> to vector<1x2x1xf32>
    %118 = vector.broadcast %117 : vector<1x2x1xf32> to vector<1x2x2xf32>
    %119 = arith.subf %115, %118 : vector<1x2x2xf32>
    %120 = math.exp %119 : vector<1x2x2xf32>
    %cst_49 = arith.constant dense<0.000000e+00> : vector<1x2xf32>
    %121 = vector.multi_reduction <add>, %120, %cst_49 [2] : vector<1x2x2xf32> to vector<1x2xf32>
    %122 = vector.shape_cast %121 : vector<1x2xf32> to vector<1x2x1xf32>
    %123 = tpu.reciprocal %122 {approx = true} : vector<1x2x1xf32> -> vector<1x2x1xf32>
    %124 = vector.broadcast %123 : vector<1x2x1xf32> to vector<1x2x2xf32>
    %125 = arith.mulf %120, %124 : vector<1x2x2xf32>
    "tpu.trace_start"() <{level = 10 : i32, message = "bqk,bkd->bqd"}> : () -> ()
    %cst_50 = arith.constant dense<0.000000e+00> : vector<1x2x8xf32>
    %126 = tpu.matmul %125, %110, %cst_50 {dimension_numbers = #tpu.dot_dimension_numbers<[2], [1], [1], [2], [0, 0, 0, 1, 1, 2], [0], [0]>} : vector<1x2x2xf32>, vector<1x2x8xf32>, vector<1x2x8xf32> -> vector<1x2x8xf32>
    "tpu.trace_stop"() : () -> ()
    %127 = vector.shape_cast %126 : vector<1x2x8xf32> to vector<2x8xf32>
    %128 = vector.extract_strided_slice %13 {offsets = [24, 0], sizes = [8, 32], strides = [1, 1]} : vector<32x32xf32> to vector<8x32xf32>
    %cst_51 = arith.constant dense<0.000000e+00> : vector<2x32xf32>
    %129 = tpu.matmul %127, %128, %cst_51 {dimension_numbers = #tpu.dot_dimension_numbers<[1], [0], [0], [1], [0, 0, 1, 1], [], []>} : vector<2x8xf32>, vector<8x32xf32>, vector<2x32xf32> -> vector<2x32xf32>
    %130 = arith.addf %107, %129 : vector<2x32xf32>
    %131 = vector.extract_strided_slice %19 {offsets = [3, 0], sizes = [1, 32], strides = [1, 1]} : vector<9x32xf32> to vector<1x32xf32>
    %132 = vector.broadcast %131 : vector<1x32xf32> to vector<2x32xf32>
    %133 = arith.addf %130, %132 : vector<2x32xf32>
    %134 = arith.addf %9, %133 : vector<2x32xf32>
    %cst_52 = arith.constant dense<0.000000e+00> : vector<2xf32>
    %135 = vector.multi_reduction <add>, %134, %cst_52 [1] : vector<2x32xf32> to vector<2xf32>
    %136 = vector.shape_cast %135 : vector<2xf32> to vector<2x1xf32>
    %cst_53 = arith.constant 3.200000e+01 : f32
    %137 = vector.broadcast %cst_53 : f32 to vector<2x1xf32>
    %138 = arith.divf %136, %137 : vector<2x1xf32>
    %139 = vector.broadcast %138 : vector<2x1xf32> to vector<2x32xf32>
    %140 = arith.subf %134, %139 : vector<2x32xf32>
    %141 = arith.mulf %140, %140 : vector<2x32xf32>
    %cst_54 = arith.constant dense<0.000000e+00> : vector<2xf32>
    %142 = vector.multi_reduction <add>, %141, %cst_54 [1] : vector<2x32xf32> to vector<2xf32>
    %143 = vector.shape_cast %142 : vector<2xf32> to vector<2x1xf32>
    %cst_55 = arith.constant 3.200000e+01 : f32
    %144 = vector.broadcast %cst_55 : f32 to vector<2x1xf32>
    %145 = arith.divf %143, %144 : vector<2x1xf32>
    %146 = vector.broadcast %138 : vector<2x1xf32> to vector<2x32xf32>
    %147 = arith.subf %134, %146 : vector<2x32xf32>
    %cst_56 = arith.constant 9.99999974E-6 : f32
    %148 = vector.broadcast %cst_56 : f32 to vector<2x1xf32>
    %149 = arith.addf %145, %148 : vector<2x1xf32>
    %150 = math.rsqrt %149 : vector<2x1xf32>
    %151 = vector.broadcast %150 : vector<2x1xf32> to vector<2x32xf32>
    %152 = arith.mulf %147, %151 : vector<2x32xf32>
    %153 = vector.extract_strided_slice %19 {offsets = [4, 0], sizes = [1, 32], strides = [1, 1]} : vector<9x32xf32> to vector<1x32xf32>
    %154 = vector.broadcast %153 : vector<1x32xf32> to vector<2x32xf32>
    %155 = arith.mulf %152, %154 : vector<2x32xf32>
    %156 = vector.extract_strided_slice %19 {offsets = [5, 0], sizes = [1, 32], strides = [1, 1]} : vector<9x32xf32> to vector<1x32xf32>
    %157 = vector.broadcast %156 : vector<1x32xf32> to vector<2x32xf32>
    %158 = arith.addf %155, %157 : vector<2x32xf32>
    %cst_57 = arith.constant dense<0.000000e+00> : vector<2x64xf32>
    %159 = tpu.matmul %158, %15, %cst_57 {dimension_numbers = #tpu.dot_dimension_numbers<[1], [0], [0], [1], [0, 0, 1, 1], [], []>} : vector<2x32xf32>, vector<32x64xf32>, vector<2x64xf32> -> vector<2x64xf32>
    %160 = vector.broadcast %21 : vector<1x64xf32> to vector<2x64xf32>
    %161 = arith.addf %159, %160 : vector<2x64xf32>
    %cst_58 = arith.constant 0.000000e+00 : f32
    %162 = vector.broadcast %cst_58 : f32 to vector<2x64xf32>
    %163 = arith.maximumf %161, %162 : vector<2x64xf32>
    %cst_59 = arith.constant dense<0.000000e+00> : vector<2x32xf32>
    %164 = tpu.matmul %163, %17, %cst_59 {dimension_numbers = #tpu.dot_dimension_numbers<[1], [0], [0], [1], [0, 0, 1, 1], [], []>} : vector<2x64xf32>, vector<64x32xf32>, vector<2x32xf32> -> vector<2x32xf32>
    %165 = vector.extract_strided_slice %19 {offsets = [6, 0], sizes = [1, 32], strides = [1, 1]} : vector<9x32xf32> to vector<1x32xf32>
    %166 = vector.broadcast %165 : vector<1x32xf32> to vector<2x32xf32>
    %167 = arith.addf %164, %166 : vector<2x32xf32>
    %168 = arith.addf %158, %167 : vector<2x32xf32>
    %cst_60 = arith.constant dense<0.000000e+00> : vector<2xf32>
    %169 = vector.multi_reduction <add>, %168, %cst_60 [1] : vector<2x32xf32> to vector<2xf32>
    %170 = vector.shape_cast %169 : vector<2xf32> to vector<2x1xf32>
    %cst_61 = arith.constant 3.200000e+01 : f32
    %171 = vector.broadcast %cst_61 : f32 to vector<2x1xf32>
    %172 = arith.divf %170, %171 : vector<2x1xf32>
    %173 = vector.broadcast %172 : vector<2x1xf32> to vector<2x32xf32>
    %174 = arith.subf %168, %173 : vector<2x32xf32>
    %175 = arith.mulf %174, %174 : vector<2x32xf32>
    %cst_62 = arith.constant dense<0.000000e+00> : vector<2xf32>
    %176 = vector.multi_reduction <add>, %175, %cst_62 [1] : vector<2x32xf32> to vector<2xf32>
    %177 = vector.shape_cast %176 : vector<2xf32> to vector<2x1xf32>
    %cst_63 = arith.constant 3.200000e+01 : f32
    %178 = vector.broadcast %cst_63 : f32 to vector<2x1xf32>
    %179 = arith.divf %177, %178 : vector<2x1xf32>
    %180 = vector.broadcast %172 : vector<2x1xf32> to vector<2x32xf32>
    %181 = arith.subf %168, %180 : vector<2x32xf32>
    %cst_64 = arith.constant 9.99999974E-6 : f32
    %182 = vector.broadcast %cst_64 : f32 to vector<2x1xf32>
    %183 = arith.addf %179, %182 : vector<2x1xf32>
    %184 = math.rsqrt %183 : vector<2x1xf32>
    %185 = vector.broadcast %184 : vector<2x1xf32> to vector<2x32xf32>
    %186 = arith.mulf %181, %185 : vector<2x32xf32>
    %187 = vector.extract_strided_slice %19 {offsets = [7, 0], sizes = [1, 32], strides = [1, 1]} : vector<9x32xf32> to vector<1x32xf32>
    %188 = vector.broadcast %187 : vector<1x32xf32> to vector<2x32xf32>
    %189 = arith.mulf %186, %188 : vector<2x32xf32>
    %190 = vector.extract_strided_slice %19 {offsets = [8, 0], sizes = [1, 32], strides = [1, 1]} : vector<9x32xf32> to vector<1x32xf32>
    %191 = vector.broadcast %190 : vector<1x32xf32> to vector<2x32xf32>
    %192 = arith.addf %189, %191 : vector<2x32xf32>
    %c1 = arith.constant 1 : index
    %c0_65 = arith.constant 0 : index
    %c0_66 = arith.constant 0 : index
    %193 = vector.load %arg4[%c1, %c0_65, %c0_66] : memref<2x32x96xf32, #tpu.memory_space<vmem>>, vector<1x32x96xf32>
    %194 = vector.shape_cast %193 : vector<1x32x96xf32> to vector<32x96xf32>
    %c1_67 = arith.constant 1 : index
    %c0_68 = arith.constant 0 : index
    %c0_69 = arith.constant 0 : index
    %195 = vector.load %arg5[%c1_67, %c0_68, %c0_69] : memref<2x32x32xf32, #tpu.memory_space<vmem>>, vector<1x32x32xf32>
    %196 = vector.shape_cast %195 : vector<1x32x32xf32> to vector<32x32xf32>
    %c1_70 = arith.constant 1 : index
    %c0_71 = arith.constant 0 : index
    %c0_72 = arith.constant 0 : index
    %197 = vector.load %arg6[%c1_70, %c0_71, %c0_72] : memref<2x32x64xf32, #tpu.memory_space<vmem>>, vector<1x32x64xf32>
    %198 = vector.shape_cast %197 : vector<1x32x64xf32> to vector<32x64xf32>
    %c1_73 = arith.constant 1 : index
    %c0_74 = arith.constant 0 : index
    %c0_75 = arith.constant 0 : index
    %199 = vector.load %arg7[%c1_73, %c0_74, %c0_75] : memref<2x64x32xf32, #tpu.memory_space<vmem>>, vector<1x64x32xf32>
    %200 = vector.shape_cast %199 : vector<1x64x32xf32> to vector<64x32xf32>
    %c1_76 = arith.constant 1 : index
    %c0_77 = arith.constant 0 : index
    %c0_78 = arith.constant 0 : index
    %201 = vector.load %arg8[%c1_76, %c0_77, %c0_78] : memref<2x9x32xf32, #tpu.memory_space<vmem>>, vector<1x9x32xf32>
    %202 = vector.shape_cast %201 : vector<1x9x32xf32> to vector<9x32xf32>
    %c1_79 = arith.constant 1 : index
    %c0_80 = arith.constant 0 : index
    %c0_81 = arith.constant 0 : index
    %203 = vector.load %arg9[%c1_79, %c0_80, %c0_81] : memref<2x1x64xf32, #tpu.memory_space<vmem>>, vector<1x1x64xf32>
    %204 = vector.shape_cast %203 : vector<1x1x64xf32> to vector<1x64xf32>
    %cst_82 = arith.constant dense<0.000000e+00> : vector<2x96xf32>
    %205 = tpu.matmul %192, %194, %cst_82 {dimension_numbers = #tpu.dot_dimension_numbers<[1], [0], [0], [1], [0, 0, 1, 1], [], []>} : vector<2x32xf32>, vector<32x96xf32>, vector<2x96xf32> -> vector<2x96xf32>
    %206 = vector.extract_strided_slice %205 {offsets = [0, 0], sizes = [2, 32], strides = [1, 1]} : vector<2x96xf32> to vector<2x32xf32>
    %207 = vector.extract_strided_slice %202 {offsets = [0, 0], sizes = [1, 32], strides = [1, 1]} : vector<9x32xf32> to vector<1x32xf32>
    %208 = vector.broadcast %207 : vector<1x32xf32> to vector<2x32xf32>
    %209 = arith.addf %206, %208 : vector<2x32xf32>
    %210 = vector.shape_cast %209 : vector<2x32xf32> to vector<1x2x32xf32>
    %211 = vector.extract_strided_slice %205 {offsets = [0, 32], sizes = [2, 32], strides = [1, 1]} : vector<2x96xf32> to vector<2x32xf32>
    %212 = vector.extract_strided_slice %202 {offsets = [1, 0], sizes = [1, 32], strides = [1, 1]} : vector<9x32xf32> to vector<1x32xf32>
    %213 = vector.broadcast %212 : vector<1x32xf32> to vector<2x32xf32>
    %214 = arith.addf %211, %213 : vector<2x32xf32>
    %215 = vector.shape_cast %214 : vector<2x32xf32> to vector<1x2x32xf32>
    %216 = vector.extract_strided_slice %205 {offsets = [0, 64], sizes = [2, 32], strides = [1, 1]} : vector<2x96xf32> to vector<2x32xf32>
    %217 = vector.extract_strided_slice %202 {offsets = [2, 0], sizes = [1, 32], strides = [1, 1]} : vector<9x32xf32> to vector<1x32xf32>
    %218 = vector.broadcast %217 : vector<1x32xf32> to vector<2x32xf32>
    %219 = arith.addf %216, %218 : vector<2x32xf32>
    %220 = vector.shape_cast %219 : vector<2x32xf32> to vector<1x2x32xf32>
    %cst_83 = arith.constant 0.000000e+00 : f32
    %221 = vector.broadcast %cst_83 : f32 to vector<2x32xf32>
    %222 = vector.extract_strided_slice %210 {offsets = [0, 0, 0], sizes = [1, 2, 8], strides = [1, 1, 1]} : vector<1x2x32xf32> to vector<1x2x8xf32>
    %223 = vector.extract_strided_slice %215 {offsets = [0, 0, 0], sizes = [1, 2, 8], strides = [1, 1, 1]} : vector<1x2x32xf32> to vector<1x2x8xf32>
    %224 = vector.extract_strided_slice %220 {offsets = [0, 0, 0], sizes = [1, 2, 8], strides = [1, 1, 1]} : vector<1x2x32xf32> to vector<1x2x8xf32>
    "tpu.trace_start"() <{level = 10 : i32, message = "bqd,bkd->bqk"}> : () -> ()
    %cst_84 = arith.constant dense<0.000000e+00> : vector<1x2x2xf32>
    %225 = tpu.matmul %222, %223, %cst_84 {dimension_numbers = #tpu.dot_dimension_numbers<[2], [2], [1], [1], [0, 0, 0, 1, 1, 1], [0], [0]>} : vector<1x2x8xf32>, vector<1x2x8xf32>, vector<1x2x2xf32> -> vector<1x2x2xf32>
    "tpu.trace_stop"() : () -> ()
    %cst_85 = arith.constant 0.353553385 : f32
    %226 = vector.broadcast %cst_85 : f32 to vector<1x2x2xf32>
    %227 = arith.mulf %225, %226 : vector<1x2x2xf32>
    %228 = vector.broadcast %4 : vector<1x1x2xf32> to vector<1x2x2xf32>
    %229 = arith.addf %227, %228 : vector<1x2x2xf32>
    %cst_86 = arith.constant dense<0xFF800000> : vector<1x2xf32>
    %230 = vector.multi_reduction <maximumf>, %229, %cst_86 [2] : vector<1x2x2xf32> to vector<1x2xf32>
    %231 = vector.shape_cast %230 : vector<1x2xf32> to vector<1x2x1xf32>
    %232 = vector.broadcast %231 : vector<1x2x1xf32> to vector<1x2x2xf32>
    %233 = arith.subf %229, %232 : vector<1x2x2xf32>
    %234 = math.exp %233 : vector<1x2x2xf32>
    %cst_87 = arith.constant dense<0.000000e+00> : vector<1x2xf32>
    %235 = vector.multi_reduction <add>, %234, %cst_87 [2] : vector<1x2x2xf32> to vector<1x2xf32>
    %236 = vector.shape_cast %235 : vector<1x2xf32> to vector<1x2x1xf32>
    %237 = tpu.reciprocal %236 {approx = true} : vector<1x2x1xf32> -> vector<1x2x1xf32>
    %238 = vector.broadcast %237 : vector<1x2x1xf32> to vector<1x2x2xf32>
    %239 = arith.mulf %234, %238 : vector<1x2x2xf32>
    "tpu.trace_start"() <{level = 10 : i32, message = "bqk,bkd->bqd"}> : () -> ()
    %cst_88 = arith.constant dense<0.000000e+00> : vector<1x2x8xf32>
    %240 = tpu.matmul %239, %224, %cst_88 {dimension_numbers = #tpu.dot_dimension_numbers<[2], [1], [1], [2], [0, 0, 0, 1, 1, 2], [0], [0]>} : vector<1x2x2xf32>, vector<1x2x8xf32>, vector<1x2x8xf32> -> vector<1x2x8xf32>
    "tpu.trace_stop"() : () -> ()
    %241 = vector.shape_cast %240 : vector<1x2x8xf32> to vector<2x8xf32>
    %242 = vector.extract_strided_slice %196 {offsets = [0, 0], sizes = [8, 32], strides = [1, 1]} : vector<32x32xf32> to vector<8x32xf32>
    %cst_89 = arith.constant dense<0.000000e+00> : vector<2x32xf32>
    %243 = tpu.matmul %241, %242, %cst_89 {dimension_numbers = #tpu.dot_dimension_numbers<[1], [0], [0], [1], [0, 0, 1, 1], [], []>} : vector<2x8xf32>, vector<8x32xf32>, vector<2x32xf32> -> vector<2x32xf32>
    %244 = arith.addf %221, %243 : vector<2x32xf32>
    %245 = vector.extract_strided_slice %210 {offsets = [0, 0, 8], sizes = [1, 2, 8], strides = [1, 1, 1]} : vector<1x2x32xf32> to vector<1x2x8xf32>
    %246 = vector.extract_strided_slice %215 {offsets = [0, 0, 8], sizes = [1, 2, 8], strides = [1, 1, 1]} : vector<1x2x32xf32> to vector<1x2x8xf32>
    %247 = vector.extract_strided_slice %220 {offsets = [0, 0, 8], sizes = [1, 2, 8], strides = [1, 1, 1]} : vector<1x2x32xf32> to vector<1x2x8xf32>
    "tpu.trace_start"() <{level = 10 : i32, message = "bqd,bkd->bqk"}> : () -> ()
    %cst_90 = arith.constant dense<0.000000e+00> : vector<1x2x2xf32>
    %248 = tpu.matmul %245, %246, %cst_90 {dimension_numbers = #tpu.dot_dimension_numbers<[2], [2], [1], [1], [0, 0, 0, 1, 1, 1], [0], [0]>} : vector<1x2x8xf32>, vector<1x2x8xf32>, vector<1x2x2xf32> -> vector<1x2x2xf32>
    "tpu.trace_stop"() : () -> ()
    %cst_91 = arith.constant 0.353553385 : f32
    %249 = vector.broadcast %cst_91 : f32 to vector<1x2x2xf32>
    %250 = arith.mulf %248, %249 : vector<1x2x2xf32>
    %251 = vector.broadcast %4 : vector<1x1x2xf32> to vector<1x2x2xf32>
    %252 = arith.addf %250, %251 : vector<1x2x2xf32>
    %cst_92 = arith.constant dense<0xFF800000> : vector<1x2xf32>
    %253 = vector.multi_reduction <maximumf>, %252, %cst_92 [2] : vector<1x2x2xf32> to vector<1x2xf32>
    %254 = vector.shape_cast %253 : vector<1x2xf32> to vector<1x2x1xf32>
    %255 = vector.broadcast %254 : vector<1x2x1xf32> to vector<1x2x2xf32>
    %256 = arith.subf %252, %255 : vector<1x2x2xf32>
    %257 = math.exp %256 : vector<1x2x2xf32>
    %cst_93 = arith.constant dense<0.000000e+00> : vector<1x2xf32>
    %258 = vector.multi_reduction <add>, %257, %cst_93 [2] : vector<1x2x2xf32> to vector<1x2xf32>
    %259 = vector.shape_cast %258 : vector<1x2xf32> to vector<1x2x1xf32>
    %260 = tpu.reciprocal %259 {approx = true} : vector<1x2x1xf32> -> vector<1x2x1xf32>
    %261 = vector.broadcast %260 : vector<1x2x1xf32> to vector<1x2x2xf32>
    %262 = arith.mulf %257, %261 : vector<1x2x2xf32>
    "tpu.trace_start"() <{level = 10 : i32, message = "bqk,bkd->bqd"}> : () -> ()
    %cst_94 = arith.constant dense<0.000000e+00> : vector<1x2x8xf32>
    %263 = tpu.matmul %262, %247, %cst_94 {dimension_numbers = #tpu.dot_dimension_numbers<[2], [1], [1], [2], [0, 0, 0, 1, 1, 2], [0], [0]>} : vector<1x2x2xf32>, vector<1x2x8xf32>, vector<1x2x8xf32> -> vector<1x2x8xf32>
    "tpu.trace_stop"() : () -> ()
    %264 = vector.shape_cast %263 : vector<1x2x8xf32> to vector<2x8xf32>
    %265 = vector.extract_strided_slice %196 {offsets = [8, 0], sizes = [8, 32], strides = [1, 1]} : vector<32x32xf32> to vector<8x32xf32>
    %cst_95 = arith.constant dense<0.000000e+00> : vector<2x32xf32>
    %266 = tpu.matmul %264, %265, %cst_95 {dimension_numbers = #tpu.dot_dimension_numbers<[1], [0], [0], [1], [0, 0, 1, 1], [], []>} : vector<2x8xf32>, vector<8x32xf32>, vector<2x32xf32> -> vector<2x32xf32>
    %267 = arith.addf %244, %266 : vector<2x32xf32>
    %268 = vector.extract_strided_slice %210 {offsets = [0, 0, 16], sizes = [1, 2, 8], strides = [1, 1, 1]} : vector<1x2x32xf32> to vector<1x2x8xf32>
    %269 = vector.extract_strided_slice %215 {offsets = [0, 0, 16], sizes = [1, 2, 8], strides = [1, 1, 1]} : vector<1x2x32xf32> to vector<1x2x8xf32>
    %270 = vector.extract_strided_slice %220 {offsets = [0, 0, 16], sizes = [1, 2, 8], strides = [1, 1, 1]} : vector<1x2x32xf32> to vector<1x2x8xf32>
    "tpu.trace_start"() <{level = 10 : i32, message = "bqd,bkd->bqk"}> : () -> ()
    %cst_96 = arith.constant dense<0.000000e+00> : vector<1x2x2xf32>
    %271 = tpu.matmul %268, %269, %cst_96 {dimension_numbers = #tpu.dot_dimension_numbers<[2], [2], [1], [1], [0, 0, 0, 1, 1, 1], [0], [0]>} : vector<1x2x8xf32>, vector<1x2x8xf32>, vector<1x2x2xf32> -> vector<1x2x2xf32>
    "tpu.trace_stop"() : () -> ()
    %cst_97 = arith.constant 0.353553385 : f32
    %272 = vector.broadcast %cst_97 : f32 to vector<1x2x2xf32>
    %273 = arith.mulf %271, %272 : vector<1x2x2xf32>
    %274 = vector.broadcast %4 : vector<1x1x2xf32> to vector<1x2x2xf32>
    %275 = arith.addf %273, %274 : vector<1x2x2xf32>
    %cst_98 = arith.constant dense<0xFF800000> : vector<1x2xf32>
    %276 = vector.multi_reduction <maximumf>, %275, %cst_98 [2] : vector<1x2x2xf32> to vector<1x2xf32>
    %277 = vector.shape_cast %276 : vector<1x2xf32> to vector<1x2x1xf32>
    %278 = vector.broadcast %277 : vector<1x2x1xf32> to vector<1x2x2xf32>
    %279 = arith.subf %275, %278 : vector<1x2x2xf32>
    %280 = math.exp %279 : vector<1x2x2xf32>
    %cst_99 = arith.constant dense<0.000000e+00> : vector<1x2xf32>
    %281 = vector.multi_reduction <add>, %280, %cst_99 [2] : vector<1x2x2xf32> to vector<1x2xf32>
    %282 = vector.shape_cast %281 : vector<1x2xf32> to vector<1x2x1xf32>
    %283 = tpu.reciprocal %282 {approx = true} : vector<1x2x1xf32> -> vector<1x2x1xf32>
    %284 = vector.broadcast %283 : vector<1x2x1xf32> to vector<1x2x2xf32>
    %285 = arith.mulf %280, %284 : vector<1x2x2xf32>
    "tpu.trace_start"() <{level = 10 : i32, message = "bqk,bkd->bqd"}> : () -> ()
    %cst_100 = arith.constant dense<0.000000e+00> : vector<1x2x8xf32>
    %286 = tpu.matmul %285, %270, %cst_100 {dimension_numbers = #tpu.dot_dimension_numbers<[2], [1], [1], [2], [0, 0, 0, 1, 1, 2], [0], [0]>} : vector<1x2x2xf32>, vector<1x2x8xf32>, vector<1x2x8xf32> -> vector<1x2x8xf32>
    "tpu.trace_stop"() : () -> ()
    %287 = vector.shape_cast %286 : vector<1x2x8xf32> to vector<2x8xf32>
    %288 = vector.extract_strided_slice %196 {offsets = [16, 0], sizes = [8, 32], strides = [1, 1]} : vector<32x32xf32> to vector<8x32xf32>
    %cst_101 = arith.constant dense<0.000000e+00> : vector<2x32xf32>
    %289 = tpu.matmul %287, %288, %cst_101 {dimension_numbers = #tpu.dot_dimension_numbers<[1], [0], [0], [1], [0, 0, 1, 1], [], []>} : vector<2x8xf32>, vector<8x32xf32>, vector<2x32xf32> -> vector<2x32xf32>
    %290 = arith.addf %267, %289 : vector<2x32xf32>
    %291 = vector.extract_strided_slice %210 {offsets = [0, 0, 24], sizes = [1, 2, 8], strides = [1, 1, 1]} : vector<1x2x32xf32> to vector<1x2x8xf32>
    %292 = vector.extract_strided_slice %215 {offsets = [0, 0, 24], sizes = [1, 2, 8], strides = [1, 1, 1]} : vector<1x2x32xf32> to vector<1x2x8xf32>
    %293 = vector.extract_strided_slice %220 {offsets = [0, 0, 24], sizes = [1, 2, 8], strides = [1, 1, 1]} : vector<1x2x32xf32> to vector<1x2x8xf32>
    "tpu.trace_start"() <{level = 10 : i32, message = "bqd,bkd->bqk"}> : () -> ()
    %cst_102 = arith.constant dense<0.000000e+00> : vector<1x2x2xf32>
    %294 = tpu.matmul %291, %292, %cst_102 {dimension_numbers = #tpu.dot_dimension_numbers<[2], [2], [1], [1], [0, 0, 0, 1, 1, 1], [0], [0]>} : vector<1x2x8xf32>, vector<1x2x8xf32>, vector<1x2x2xf32> -> vector<1x2x2xf32>
    "tpu.trace_stop"() : () -> ()
    %cst_103 = arith.constant 0.353553385 : f32
    %295 = vector.broadcast %cst_103 : f32 to vector<1x2x2xf32>
    %296 = arith.mulf %294, %295 : vector<1x2x2xf32>
    %297 = vector.broadcast %4 : vector<1x1x2xf32> to vector<1x2x2xf32>
    %298 = arith.addf %296, %297 : vector<1x2x2xf32>
    %cst_104 = arith.constant dense<0xFF800000> : vector<1x2xf32>
    %299 = vector.multi_reduction <maximumf>, %298, %cst_104 [2] : vector<1x2x2xf32> to vector<1x2xf32>
    %300 = vector.shape_cast %299 : vector<1x2xf32> to vector<1x2x1xf32>
    %301 = vector.broadcast %300 : vector<1x2x1xf32> to vector<1x2x2xf32>
    %302 = arith.subf %298, %301 : vector<1x2x2xf32>
    %303 = math.exp %302 : vector<1x2x2xf32>
    %cst_105 = arith.constant dense<0.000000e+00> : vector<1x2xf32>
    %304 = vector.multi_reduction <add>, %303, %cst_105 [2] : vector<1x2x2xf32> to vector<1x2xf32>
    %305 = vector.shape_cast %304 : vector<1x2xf32> to vector<1x2x1xf32>
    %306 = tpu.reciprocal %305 {approx = true} : vector<1x2x1xf32> -> vector<1x2x1xf32>
    %307 = vector.broadcast %306 : vector<1x2x1xf32> to vector<1x2x2xf32>
    %308 = arith.mulf %303, %307 : vector<1x2x2xf32>
    "tpu.trace_start"() <{level = 10 : i32, message = "bqk,bkd->bqd"}> : () -> ()
    %cst_106 = arith.constant dense<0.000000e+00> : vector<1x2x8xf32>
    %309 = tpu.matmul %308, %293, %cst_106 {dimension_numbers = #tpu.dot_dimension_numbers<[2], [1], [1], [2], [0, 0, 0, 1, 1, 2], [0], [0]>} : vector<1x2x2xf32>, vector<1x2x8xf32>, vector<1x2x8xf32> -> vector<1x2x8xf32>
    "tpu.trace_stop"() : () -> ()
    %310 = vector.shape_cast %309 : vector<1x2x8xf32> to vector<2x8xf32>
    %311 = vector.extract_strided_slice %196 {offsets = [24, 0], sizes = [8, 32], strides = [1, 1]} : vector<32x32xf32> to vector<8x32xf32>
    %cst_107 = arith.constant dense<0.000000e+00> : vector<2x32xf32>
    %312 = tpu.matmul %310, %311, %cst_107 {dimension_numbers = #tpu.dot_dimension_numbers<[1], [0], [0], [1], [0, 0, 1, 1], [], []>} : vector<2x8xf32>, vector<8x32xf32>, vector<2x32xf32> -> vector<2x32xf32>
    %313 = arith.addf %290, %312 : vector<2x32xf32>
    %314 = vector.extract_strided_slice %202 {offsets = [3, 0], sizes = [1, 32], strides = [1, 1]} : vector<9x32xf32> to vector<1x32xf32>
    %315 = vector.broadcast %314 : vector<1x32xf32> to vector<2x32xf32>
    %316 = arith.addf %313, %315 : vector<2x32xf32>
    %317 = arith.addf %192, %316 : vector<2x32xf32>
    %cst_108 = arith.constant dense<0.000000e+00> : vector<2xf32>
    %318 = vector.multi_reduction <add>, %317, %cst_108 [1] : vector<2x32xf32> to vector<2xf32>
    %319 = vector.shape_cast %318 : vector<2xf32> to vector<2x1xf32>
    %cst_109 = arith.constant 3.200000e+01 : f32
    %320 = vector.broadcast %cst_109 : f32 to vector<2x1xf32>
    %321 = arith.divf %319, %320 : vector<2x1xf32>
    %322 = vector.broadcast %321 : vector<2x1xf32> to vector<2x32xf32>
    %323 = arith.subf %317, %322 : vector<2x32xf32>
    %324 = arith.mulf %323, %323 : vector<2x32xf32>
    %cst_110 = arith.constant dense<0.000000e+00> : vector<2xf32>
    %325 = vector.multi_reduction <add>, %324, %cst_110 [1] : vector<2x32xf32> to vector<2xf32>
    %326 = vector.shape_cast %325 : vector<2xf32> to vector<2x1xf32>
    %cst_111 = arith.constant 3.200000e+01 : f32
    %327 = vector.broadcast %cst_111 : f32 to vector<2x1xf32>
    %328 = arith.divf %326, %327 : vector<2x1xf32>
    %329 = vector.broadcast %321 : vector<2x1xf32> to vector<2x32xf32>
    %330 = arith.subf %317, %329 : vector<2x32xf32>
    %cst_112 = arith.constant 9.99999974E-6 : f32
    %331 = vector.broadcast %cst_112 : f32 to vector<2x1xf32>
    %332 = arith.addf %328, %331 : vector<2x1xf32>
    %333 = math.rsqrt %332 : vector<2x1xf32>
    %334 = vector.broadcast %333 : vector<2x1xf32> to vector<2x32xf32>
    %335 = arith.mulf %330, %334 : vector<2x32xf32>
    %336 = vector.extract_strided_slice %202 {offsets = [4, 0], sizes = [1, 32], strides = [1, 1]} : vector<9x32xf32> to vector<1x32xf32>
    %337 = vector.broadcast %336 : vector<1x32xf32> to vector<2x32xf32>
    %338 = arith.mulf %335, %337 : vector<2x32xf32>
    %339 = vector.extract_strided_slice %202 {offsets = [5, 0], sizes = [1, 32], strides = [1, 1]} : vector<9x32xf32> to vector<1x32xf32>
    %340 = vector.broadcast %339 : vector<1x32xf32> to vector<2x32xf32>
    %341 = arith.addf %338, %340 : vector<2x32xf32>
    %cst_113 = arith.constant dense<0.000000e+00> : vector<2x64xf32>
    %342 = tpu.matmul %341, %198, %cst_113 {dimension_numbers = #tpu.dot_dimension_numbers<[1], [0], [0], [1], [0, 0, 1, 1], [], []>} : vector<2x32xf32>, vector<32x64xf32>, vector<2x64xf32> -> vector<2x64xf32>
    %343 = vector.broadcast %204 : vector<1x64xf32> to vector<2x64xf32>
    %344 = arith.addf %342, %343 : vector<2x64xf32>
    %cst_114 = arith.constant 0.000000e+00 : f32
    %345 = vector.broadcast %cst_114 : f32 to vector<2x64xf32>
    %346 = arith.maximumf %344, %345 : vector<2x64xf32>
    %cst_115 = arith.constant dense<0.000000e+00> : vector<2x32xf32>
    %347 = tpu.matmul %346, %200, %cst_115 {dimension_numbers = #tpu.dot_dimension_numbers<[1], [0], [0], [1], [0, 0, 1, 1], [], []>} : vector<2x64xf32>, vector<64x32xf32>, vector<2x32xf32> -> vector<2x32xf32>
    %348 = vector.extract_strided_slice %202 {offsets = [6, 0], sizes = [1, 32], strides = [1, 1]} : vector<9x32xf32> to vector<1x32xf32>
    %349 = vector.broadcast %348 : vector<1x32xf32> to vector<2x32xf32>
    %350 = arith.addf %347, %349 : vector<2x32xf32>
    %351 = arith.addf %341, %350 : vector<2x32xf32>
    %cst_116 = arith.constant dense<0.000000e+00> : vector<2xf32>
    %352 = vector.multi_reduction <add>, %351, %cst_116 [1] : vector<2x32xf32> to vector<2xf32>
    %353 = vector.shape_cast %352 : vector<2xf32> to vector<2x1xf32>
    %cst_117 = arith.constant 3.200000e+01 : f32
    %354 = vector.broadcast %cst_117 : f32 to vector<2x1xf32>
    %355 = arith.divf %353, %354 : vector<2x1xf32>
    %356 = vector.broadcast %355 : vector<2x1xf32> to vector<2x32xf32>
    %357 = arith.subf %351, %356 : vector<2x32xf32>
    %358 = arith.mulf %357, %357 : vector<2x32xf32>
    %cst_118 = arith.constant dense<0.000000e+00> : vector<2xf32>
    %359 = vector.multi_reduction <add>, %358, %cst_118 [1] : vector<2x32xf32> to vector<2xf32>
    %360 = vector.shape_cast %359 : vector<2xf32> to vector<2x1xf32>
    %cst_119 = arith.constant 3.200000e+01 : f32
    %361 = vector.broadcast %cst_119 : f32 to vector<2x1xf32>
    %362 = arith.divf %360, %361 : vector<2x1xf32>
    %363 = vector.broadcast %355 : vector<2x1xf32> to vector<2x32xf32>
    %364 = arith.subf %351, %363 : vector<2x32xf32>
    %cst_120 = arith.constant 9.99999974E-6 : f32
    %365 = vector.broadcast %cst_120 : f32 to vector<2x1xf32>
    %366 = arith.addf %362, %365 : vector<2x1xf32>
    %367 = math.rsqrt %366 : vector<2x1xf32>
    %368 = vector.broadcast %367 : vector<2x1xf32> to vector<2x32xf32>
    %369 = arith.mulf %364, %368 : vector<2x32xf32>
    %370 = vector.extract_strided_slice %202 {offsets = [7, 0], sizes = [1, 32], strides = [1, 1]} : vector<9x32xf32> to vector<1x32xf32>
    %371 = vector.broadcast %370 : vector<1x32xf32> to vector<2x32xf32>
    %372 = arith.mulf %369, %371 : vector<2x32xf32>
    %373 = vector.extract_strided_slice %202 {offsets = [8, 0], sizes = [1, 32], strides = [1, 1]} : vector<9x32xf32> to vector<1x32xf32>
    %374 = vector.broadcast %373 : vector<1x32xf32> to vector<2x32xf32>
    %375 = arith.addf %372, %374 : vector<2x32xf32>
    %376 = vector.shape_cast %375 : vector<2x32xf32> to vector<1x2x32xf32>
    "tpu.trace_start"() <{level = 10 : i32, message = "bks,bsd->bkd"}> : () -> ()
    %cst_121 = arith.constant dense<0.000000e+00> : vector<1x1x32xf32>
    %377 = tpu.matmul %0, %376, %cst_121 {dimension_numbers = #tpu.dot_dimension_numbers<[2], [1], [1], [2], [0, 0, 0, 1, 1, 2], [0], [0]>} : vector<1x1x2xf32>, vector<1x2x32xf32>, vector<1x1x32xf32> -> vector<1x1x32xf32>
    "tpu.trace_stop"() : () -> ()
    %378 = vector.shape_cast %377 : vector<1x1x32xf32> to vector<1x32xf32>
    %cst_122 = arith.constant dense<0.000000e+00> : vector<1x1xf32>
    %379 = vector.multi_reduction <add>, %0, %cst_122 [2] : vector<1x1x2xf32> to vector<1x1xf32>
    %cst_123 = arith.constant 1.000000e+00 : f32
    %380 = vector.broadcast %cst_123 : f32 to vector<1x1xf32>
    %381 = arith.maximumf %379, %380 : vector<1x1xf32>
    %382 = tpu.reciprocal %381 {approx = true} : vector<1x1xf32> -> vector<1x1xf32>
    %383 = vector.broadcast %382 : vector<1x1xf32> to vector<1x32xf32>
    %384 = arith.mulf %378, %383 : vector<1x32xf32>
    %c0_124 = arith.constant 0 : index
    %c0_125 = arith.constant 0 : index
    %c0_126 = arith.constant 0 : index
    %385 = vector.load %arg10[%c0_124, %c0_125, %c0_126] : memref<1x1x32xf32, #tpu.memory_space<vmem>>, vector<1x1x32xf32>
    %386 = vector.shape_cast %385 : vector<1x1x32xf32> to vector<1x32xf32>
    %387 = vector.shape_cast %384 : vector<1x32xf32> to vector<1x1x32xf32>
    tpu.vector_store %arg10[%c0_124, %c0_125, %c0_126], %387 {strides = array<i32>} : memref<1x1x32xf32, #tpu.memory_space<vmem>>, vector<1x1x32xf32>,
    return
  }
  func.func @transform_0(%arg0: i32) -> (i32, i32, i32) {
    %c0_i32 = arith.constant 0 : i32
    %c0_i32_0 = arith.constant 0 : i32
    %c0_i32_1 = arith.constant 0 : i32
    return %arg0, %c0_i32, %c0_i32_0 : i32, i32, i32
  }
  func.func @transform_1(%arg0: i32) -> (i32, i32, i32) {
    %c0_i32 = arith.constant 0 : i32
    %c0_i32_0 = arith.constant 0 : i32
    %c0_i32_1 = arith.constant 0 : i32
    return %arg0, %c0_i32, %c0_i32_0 : i32, i32, i32
  }
  func.func @transform_2(%arg0: i32) -> (i32, i32) {
    %c0_i32 = arith.constant 0 : i32
    %c0_i32_0 = arith.constant 0 : i32
    %c0_i32_1 = arith.constant 0 : i32
    return %c0_i32, %c0_i32_0 : i32, i32
  }
  func.func @transform_3(%arg0: i32) -> (i32, i32, i32) {
    %c0_i32 = arith.constant 0 : i32
    %c0_i32_0 = arith.constant 0 : i32
    %c0_i32_1 = arith.constant 0 : i32
    %c0_i32_2 = arith.constant 0 : i32
    return %c0_i32, %c0_i32_0, %c0_i32_1 : i32, i32, i32
  }
  func.func @transform_4(%arg0: i32) -> (i32, i32, i32) {
    %c0_i32 = arith.constant 0 : i32
    %c0_i32_0 = arith.constant 0 : i32
    %c0_i32_1 = arith.constant 0 : i32
    %c0_i32_2 = arith.constant 0 : i32
    return %c0_i32, %c0_i32_0, %c0_i32_1 : i32, i32, i32
  }
  func.func @transform_5(%arg0: i32) -> (i32, i32, i32) {
    %c0_i32 = arith.constant 0 : i32
    %c0_i32_0 = arith.constant 0 : i32
    %c0_i32_1 = arith.constant 0 : i32
    %c0_i32_2 = arith.constant 0 : i32
    return %c0_i32, %c0_i32_0, %c0_i32_1 : i32, i32, i32
  }
  func.func @transform_6(%arg0: i32) -> (i32, i32, i32) {
    %c0_i32 = arith.constant 0 : i32
    %c0_i32_0 = arith.constant 0 : i32
    %c0_i32_1 = arith.constant 0 : i32
    %c0_i32_2 = arith.constant 0 : i32
    return %c0_i32, %c0_i32_0, %c0_i32_1 : i32, i32, i32
  }
  func.func @transform_7(%arg0: i32) -> (i32, i32, i32) {
    %c0_i32 = arith.constant 0 : i32
    %c0_i32_0 = arith.constant 0 : i32
    %c0_i32_1 = arith.constant 0 : i32
    %c0_i32_2 = arith.constant 0 : i32
    return %c0_i32, %c0_i32_0, %c0_i32_1 : i32, i32, i32
  }
  func.func @transform_8(%arg0: i32) -> (i32, i32, i32) {
    %c0_i32 = arith.constant 0 : i32
    %c0_i32_0 = arith.constant 0 : i32
    %c0_i32_1 = arith.constant 0 : i32
    %c0_i32_2 = arith.constant 0 : i32
    return %c0_i32, %c0_i32_0, %c0_i32_1 : i32, i32, i32
  }
  func.func @transform_9(%arg0: i32) -> (i32, i32, i32) {
    %c0_i32 = arith.constant 0 : i32
    %c0_i32_0 = arith.constant 0 : i32
    %c0_i32_1 = arith.constant 0 : i32
    return %arg0, %c0_i32, %c0_i32_0 : i32, i32, i32
  }
}

module attributes {stable_mosaic.version = 11 : i64} {
  func.func @encoder_stack_kernel(%arg0: i32, %arg1: memref<2x8x32xf32, #tpu.memory_space<vmem>>, %arg2: memref<2x1x8xf32, #tpu.memory_space<vmem>>, %arg3: memref<8x32xf32, #tpu.memory_space<vmem>>, %arg4: memref<2x32x96xf32, #tpu.memory_space<vmem>>, %arg5: memref<2x32x32xf32, #tpu.memory_space<vmem>>, %arg6: memref<2x32x64xf32, #tpu.memory_space<vmem>>, %arg7: memref<2x64x32xf32, #tpu.memory_space<vmem>>, %arg8: memref<2x9x32xf32, #tpu.memory_space<vmem>>, %arg9: memref<2x1x64xf32, #tpu.memory_space<vmem>>, %arg10: memref<1x2x32xf32, #tpu.memory_space<vmem>>) attributes {dimension_semantics = [#tpu.dimension_semantics<parallel>], iteration_bounds = array<i64: 2>, scalar_prefetch = 0 : i64, scratch_operands = 0 : i64, tpu.core_type = #tpu.core_type<tc>, window_params = [{transform_indices = @transform_0, window_bounds = array<i64: 2, 8, 32>}, {transform_indices = @transform_1, window_bounds = array<i64: 2, 1, 8>}, {pipeline_mode = #tpu.pipeline_mode<synchronous>, transform_indices = @transform_2, window_bounds = array<i64: 8, 32>}, {pipeline_mode = #tpu.pipeline_mode<synchronous>, transform_indices = @transform_3, window_bounds = array<i64: 2, 32, 96>}, {pipeline_mode = #tpu.pipeline_mode<synchronous>, transform_indices = @transform_4, window_bounds = array<i64: 2, 32, 32>}, {pipeline_mode = #tpu.pipeline_mode<synchronous>, transform_indices = @transform_5, window_bounds = array<i64: 2, 32, 64>}, {pipeline_mode = #tpu.pipeline_mode<synchronous>, transform_indices = @transform_6, window_bounds = array<i64: 2, 64, 32>}, {pipeline_mode = #tpu.pipeline_mode<synchronous>, transform_indices = @transform_7, window_bounds = array<i64: 2, 9, 32>}, {pipeline_mode = #tpu.pipeline_mode<synchronous>, transform_indices = @transform_8, window_bounds = array<i64: 2, 1, 64>}, {transform_indices = @transform_9, window_bounds = array<i64: 1, 2, 32>}]} {
    %c0 = arith.constant 0 : index
    %c0_0 = arith.constant 0 : index
    %c0_1 = arith.constant 0 : index
    %0 = vector.load %arg2[%c0, %c0_0, %c0_1] : memref<2x1x8xf32, #tpu.memory_space<vmem>>, vector<2x1x8xf32>
    %cst = arith.constant 1.000000e+00 : f32
    %1 = vector.broadcast %cst : f32 to vector<2x1x8xf32>
    %2 = arith.subf %1, %0 : vector<2x1x8xf32>
    %cst_2 = arith.constant -1.000000e+09 : f32
    %3 = vector.broadcast %cst_2 : f32 to vector<2x1x8xf32>
    %4 = arith.mulf %2, %3 : vector<2x1x8xf32>
    %c0_3 = arith.constant 0 : index
    %c0_4 = arith.constant 0 : index
    %c0_5 = arith.constant 0 : index
    %5 = vector.load %arg1[%c0_3, %c0_4, %c0_5] : memref<2x8x32xf32, #tpu.memory_space<vmem>>, vector<2x8x32xf32>
    %c0_6 = arith.constant 0 : index
    %c0_7 = arith.constant 0 : index
    %6 = vector.load %arg3[%c0_6, %c0_7] : memref<8x32xf32, #tpu.memory_space<vmem>>, vector<8x32xf32>
    %7 = vector.shape_cast %6 : vector<8x32xf32> to vector<1x8x32xf32>
    %8 = vector.broadcast %7 : vector<1x8x32xf32> to vector<2x8x32xf32>
    %9 = arith.addf %5, %8 : vector<2x8x32xf32>
    %10 = vector.shape_cast %9 : vector<2x8x32xf32> to vector<16x32xf32>
    %c0_8 = arith.constant 0 : index
    %c0_9 = arith.constant 0 : index
    %c0_10 = arith.constant 0 : index
    %11 = vector.load %arg4[%c0_8, %c0_9, %c0_10] : memref<2x32x96xf32, #tpu.memory_space<vmem>>, vector<1x32x96xf32>
    %12 = vector.shape_cast %11 : vector<1x32x96xf32> to vector<32x96xf32>
    %c0_11 = arith.constant 0 : index
    %c0_12 = arith.constant 0 : index
    %c0_13 = arith.constant 0 : index
    %13 = vector.load %arg5[%c0_11, %c0_12, %c0_13] : memref<2x32x32xf32, #tpu.memory_space<vmem>>, vector<1x32x32xf32>
    %14 = vector.shape_cast %13 : vector<1x32x32xf32> to vector<32x32xf32>
    %c0_14 = arith.constant 0 : index
    %c0_15 = arith.constant 0 : index
    %c0_16 = arith.constant 0 : index
    %15 = vector.load %arg6[%c0_14, %c0_15, %c0_16] : memref<2x32x64xf32, #tpu.memory_space<vmem>>, vector<1x32x64xf32>
    %16 = vector.shape_cast %15 : vector<1x32x64xf32> to vector<32x64xf32>
    %c0_17 = arith.constant 0 : index
    %c0_18 = arith.constant 0 : index
    %c0_19 = arith.constant 0 : index
    %17 = vector.load %arg7[%c0_17, %c0_18, %c0_19] : memref<2x64x32xf32, #tpu.memory_space<vmem>>, vector<1x64x32xf32>
    %18 = vector.shape_cast %17 : vector<1x64x32xf32> to vector<64x32xf32>
    %c0_20 = arith.constant 0 : index
    %c0_21 = arith.constant 0 : index
    %c0_22 = arith.constant 0 : index
    %19 = vector.load %arg8[%c0_20, %c0_21, %c0_22] : memref<2x9x32xf32, #tpu.memory_space<vmem>>, vector<1x9x32xf32>
    %20 = vector.shape_cast %19 : vector<1x9x32xf32> to vector<9x32xf32>
    %c0_23 = arith.constant 0 : index
    %c0_24 = arith.constant 0 : index
    %c0_25 = arith.constant 0 : index
    %21 = vector.load %arg9[%c0_23, %c0_24, %c0_25] : memref<2x1x64xf32, #tpu.memory_space<vmem>>, vector<1x1x64xf32>
    %22 = vector.shape_cast %21 : vector<1x1x64xf32> to vector<1x64xf32>
    %cst_26 = arith.constant dense<0.000000e+00> : vector<16x96xf32>
    %23 = tpu.matmul %10, %12, %cst_26 {dimension_numbers = #tpu.dot_dimension_numbers<[1], [0], [0], [1], [0, 0, 1, 1], [], []>} : vector<16x32xf32>, vector<32x96xf32>, vector<16x96xf32> -> vector<16x96xf32>
    %24 = vector.extract_strided_slice %23 {offsets = [0, 0], sizes = [16, 32], strides = [1, 1]} : vector<16x96xf32> to vector<16x32xf32>
    %25 = vector.extract_strided_slice %20 {offsets = [0, 0], sizes = [1, 32], strides = [1, 1]} : vector<9x32xf32> to vector<1x32xf32>
    %26 = vector.broadcast %25 : vector<1x32xf32> to vector<16x32xf32>
    %27 = arith.addf %24, %26 : vector<16x32xf32>
    %28 = vector.shape_cast %27 : vector<16x32xf32> to vector<2x8x32xf32>
    %29 = vector.extract_strided_slice %23 {offsets = [0, 32], sizes = [16, 32], strides = [1, 1]} : vector<16x96xf32> to vector<16x32xf32>
    %30 = vector.extract_strided_slice %20 {offsets = [1, 0], sizes = [1, 32], strides = [1, 1]} : vector<9x32xf32> to vector<1x32xf32>
    %31 = vector.broadcast %30 : vector<1x32xf32> to vector<16x32xf32>
    %32 = arith.addf %29, %31 : vector<16x32xf32>
    %33 = vector.shape_cast %32 : vector<16x32xf32> to vector<2x8x32xf32>
    %34 = vector.extract_strided_slice %23 {offsets = [0, 64], sizes = [16, 32], strides = [1, 1]} : vector<16x96xf32> to vector<16x32xf32>
    %35 = vector.extract_strided_slice %20 {offsets = [2, 0], sizes = [1, 32], strides = [1, 1]} : vector<9x32xf32> to vector<1x32xf32>
    %36 = vector.broadcast %35 : vector<1x32xf32> to vector<16x32xf32>
    %37 = arith.addf %34, %36 : vector<16x32xf32>
    %38 = vector.shape_cast %37 : vector<16x32xf32> to vector<2x8x32xf32>
    %cst_27 = arith.constant 0.000000e+00 : f32
    %39 = vector.broadcast %cst_27 : f32 to vector<16x32xf32>
    %40 = vector.extract_strided_slice %28 {offsets = [0, 0, 0], sizes = [2, 8, 8], strides = [1, 1, 1]} : vector<2x8x32xf32> to vector<2x8x8xf32>
    %41 = vector.extract_strided_slice %33 {offsets = [0, 0, 0], sizes = [2, 8, 8], strides = [1, 1, 1]} : vector<2x8x32xf32> to vector<2x8x8xf32>
    %42 = vector.extract_strided_slice %38 {offsets = [0, 0, 0], sizes = [2, 8, 8], strides = [1, 1, 1]} : vector<2x8x32xf32> to vector<2x8x8xf32>
    "tpu.trace_start"() <{level = 10 : i32, message = "bqd,bkd->bqk"}> : () -> ()
    %cst_28 = arith.constant dense<0.000000e+00> : vector<2x8x8xf32>
    %43 = tpu.matmul %40, %41, %cst_28 {dimension_numbers = #tpu.dot_dimension_numbers<[2], [2], [1], [1], [0, 0, 0, 1, 1, 1], [0], [0]>} : vector<2x8x8xf32>, vector<2x8x8xf32>, vector<2x8x8xf32> -> vector<2x8x8xf32>
    "tpu.trace_stop"() : () -> ()
    %cst_29 = arith.constant 0.353553385 : f32
    %44 = vector.broadcast %cst_29 : f32 to vector<2x8x8xf32>
    %45 = arith.mulf %43, %44 : vector<2x8x8xf32>
    %46 = vector.broadcast %4 : vector<2x1x8xf32> to vector<2x8x8xf32>
    %47 = arith.addf %45, %46 : vector<2x8x8xf32>
    %cst_30 = arith.constant dense<0xFF800000> : vector<2x8xf32>
    %48 = vector.multi_reduction <maximumf>, %47, %cst_30 [2] : vector<2x8x8xf32> to vector<2x8xf32>
    %49 = vector.shape_cast %48 : vector<2x8xf32> to vector<2x8x1xf32>
    %50 = vector.broadcast %49 : vector<2x8x1xf32> to vector<2x8x8xf32>
    %51 = arith.subf %47, %50 : vector<2x8x8xf32>
    %52 = math.exp %51 : vector<2x8x8xf32>
    %cst_31 = arith.constant dense<0.000000e+00> : vector<2x8xf32>
    %53 = vector.multi_reduction <add>, %52, %cst_31 [2] : vector<2x8x8xf32> to vector<2x8xf32>
    %54 = vector.shape_cast %53 : vector<2x8xf32> to vector<2x8x1xf32>
    %55 = tpu.reciprocal %54 {approx = true} : vector<2x8x1xf32> -> vector<2x8x1xf32>
    %56 = vector.broadcast %55 : vector<2x8x1xf32> to vector<2x8x8xf32>
    %57 = arith.mulf %52, %56 : vector<2x8x8xf32>
    "tpu.trace_start"() <{level = 10 : i32, message = "bqk,bkd->bqd"}> : () -> ()
    %cst_32 = arith.constant dense<0.000000e+00> : vector<2x8x8xf32>
    %58 = tpu.matmul %57, %42, %cst_32 {dimension_numbers = #tpu.dot_dimension_numbers<[2], [1], [1], [2], [0, 0, 0, 1, 1, 2], [0], [0]>} : vector<2x8x8xf32>, vector<2x8x8xf32>, vector<2x8x8xf32> -> vector<2x8x8xf32>
    "tpu.trace_stop"() : () -> ()
    %59 = vector.shape_cast %58 : vector<2x8x8xf32> to vector<16x8xf32>
    %60 = vector.extract_strided_slice %14 {offsets = [0, 0], sizes = [8, 32], strides = [1, 1]} : vector<32x32xf32> to vector<8x32xf32>
    %cst_33 = arith.constant dense<0.000000e+00> : vector<16x32xf32>
    %61 = tpu.matmul %59, %60, %cst_33 {dimension_numbers = #tpu.dot_dimension_numbers<[1], [0], [0], [1], [0, 0, 1, 1], [], []>} : vector<16x8xf32>, vector<8x32xf32>, vector<16x32xf32> -> vector<16x32xf32>
    %62 = arith.addf %39, %61 : vector<16x32xf32>
    %63 = vector.extract_strided_slice %28 {offsets = [0, 0, 8], sizes = [2, 8, 8], strides = [1, 1, 1]} : vector<2x8x32xf32> to vector<2x8x8xf32>
    %64 = vector.extract_strided_slice %33 {offsets = [0, 0, 8], sizes = [2, 8, 8], strides = [1, 1, 1]} : vector<2x8x32xf32> to vector<2x8x8xf32>
    %65 = vector.extract_strided_slice %38 {offsets = [0, 0, 8], sizes = [2, 8, 8], strides = [1, 1, 1]} : vector<2x8x32xf32> to vector<2x8x8xf32>
    "tpu.trace_start"() <{level = 10 : i32, message = "bqd,bkd->bqk"}> : () -> ()
    %cst_34 = arith.constant dense<0.000000e+00> : vector<2x8x8xf32>
    %66 = tpu.matmul %63, %64, %cst_34 {dimension_numbers = #tpu.dot_dimension_numbers<[2], [2], [1], [1], [0, 0, 0, 1, 1, 1], [0], [0]>} : vector<2x8x8xf32>, vector<2x8x8xf32>, vector<2x8x8xf32> -> vector<2x8x8xf32>
    "tpu.trace_stop"() : () -> ()
    %cst_35 = arith.constant 0.353553385 : f32
    %67 = vector.broadcast %cst_35 : f32 to vector<2x8x8xf32>
    %68 = arith.mulf %66, %67 : vector<2x8x8xf32>
    %69 = vector.broadcast %4 : vector<2x1x8xf32> to vector<2x8x8xf32>
    %70 = arith.addf %68, %69 : vector<2x8x8xf32>
    %cst_36 = arith.constant dense<0xFF800000> : vector<2x8xf32>
    %71 = vector.multi_reduction <maximumf>, %70, %cst_36 [2] : vector<2x8x8xf32> to vector<2x8xf32>
    %72 = vector.shape_cast %71 : vector<2x8xf32> to vector<2x8x1xf32>
    %73 = vector.broadcast %72 : vector<2x8x1xf32> to vector<2x8x8xf32>
    %74 = arith.subf %70, %73 : vector<2x8x8xf32>
    %75 = math.exp %74 : vector<2x8x8xf32>
    %cst_37 = arith.constant dense<0.000000e+00> : vector<2x8xf32>
    %76 = vector.multi_reduction <add>, %75, %cst_37 [2] : vector<2x8x8xf32> to vector<2x8xf32>
    %77 = vector.shape_cast %76 : vector<2x8xf32> to vector<2x8x1xf32>
    %78 = tpu.reciprocal %77 {approx = true} : vector<2x8x1xf32> -> vector<2x8x1xf32>
    %79 = vector.broadcast %78 : vector<2x8x1xf32> to vector<2x8x8xf32>
    %80 = arith.mulf %75, %79 : vector<2x8x8xf32>
    "tpu.trace_start"() <{level = 10 : i32, message = "bqk,bkd->bqd"}> : () -> ()
    %cst_38 = arith.constant dense<0.000000e+00> : vector<2x8x8xf32>
    %81 = tpu.matmul %80, %65, %cst_38 {dimension_numbers = #tpu.dot_dimension_numbers<[2], [1], [1], [2], [0, 0, 0, 1, 1, 2], [0], [0]>} : vector<2x8x8xf32>, vector<2x8x8xf32>, vector<2x8x8xf32> -> vector<2x8x8xf32>
    "tpu.trace_stop"() : () -> ()
    %82 = vector.shape_cast %81 : vector<2x8x8xf32> to vector<16x8xf32>
    %83 = vector.extract_strided_slice %14 {offsets = [8, 0], sizes = [8, 32], strides = [1, 1]} : vector<32x32xf32> to vector<8x32xf32>
    %cst_39 = arith.constant dense<0.000000e+00> : vector<16x32xf32>
    %84 = tpu.matmul %82, %83, %cst_39 {dimension_numbers = #tpu.dot_dimension_numbers<[1], [0], [0], [1], [0, 0, 1, 1], [], []>} : vector<16x8xf32>, vector<8x32xf32>, vector<16x32xf32> -> vector<16x32xf32>
    %85 = arith.addf %62, %84 : vector<16x32xf32>
    %86 = vector.extract_strided_slice %28 {offsets = [0, 0, 16], sizes = [2, 8, 8], strides = [1, 1, 1]} : vector<2x8x32xf32> to vector<2x8x8xf32>
    %87 = vector.extract_strided_slice %33 {offsets = [0, 0, 16], sizes = [2, 8, 8], strides = [1, 1, 1]} : vector<2x8x32xf32> to vector<2x8x8xf32>
    %88 = vector.extract_strided_slice %38 {offsets = [0, 0, 16], sizes = [2, 8, 8], strides = [1, 1, 1]} : vector<2x8x32xf32> to vector<2x8x8xf32>
    "tpu.trace_start"() <{level = 10 : i32, message = "bqd,bkd->bqk"}> : () -> ()
    %cst_40 = arith.constant dense<0.000000e+00> : vector<2x8x8xf32>
    %89 = tpu.matmul %86, %87, %cst_40 {dimension_numbers = #tpu.dot_dimension_numbers<[2], [2], [1], [1], [0, 0, 0, 1, 1, 1], [0], [0]>} : vector<2x8x8xf32>, vector<2x8x8xf32>, vector<2x8x8xf32> -> vector<2x8x8xf32>
    "tpu.trace_stop"() : () -> ()
    %cst_41 = arith.constant 0.353553385 : f32
    %90 = vector.broadcast %cst_41 : f32 to vector<2x8x8xf32>
    %91 = arith.mulf %89, %90 : vector<2x8x8xf32>
    %92 = vector.broadcast %4 : vector<2x1x8xf32> to vector<2x8x8xf32>
    %93 = arith.addf %91, %92 : vector<2x8x8xf32>
    %cst_42 = arith.constant dense<0xFF800000> : vector<2x8xf32>
    %94 = vector.multi_reduction <maximumf>, %93, %cst_42 [2] : vector<2x8x8xf32> to vector<2x8xf32>
    %95 = vector.shape_cast %94 : vector<2x8xf32> to vector<2x8x1xf32>
    %96 = vector.broadcast %95 : vector<2x8x1xf32> to vector<2x8x8xf32>
    %97 = arith.subf %93, %96 : vector<2x8x8xf32>
    %98 = math.exp %97 : vector<2x8x8xf32>
    %cst_43 = arith.constant dense<0.000000e+00> : vector<2x8xf32>
    %99 = vector.multi_reduction <add>, %98, %cst_43 [2] : vector<2x8x8xf32> to vector<2x8xf32>
    %100 = vector.shape_cast %99 : vector<2x8xf32> to vector<2x8x1xf32>
    %101 = tpu.reciprocal %100 {approx = true} : vector<2x8x1xf32> -> vector<2x8x1xf32>
    %102 = vector.broadcast %101 : vector<2x8x1xf32> to vector<2x8x8xf32>
    %103 = arith.mulf %98, %102 : vector<2x8x8xf32>
    "tpu.trace_start"() <{level = 10 : i32, message = "bqk,bkd->bqd"}> : () -> ()
    %cst_44 = arith.constant dense<0.000000e+00> : vector<2x8x8xf32>
    %104 = tpu.matmul %103, %88, %cst_44 {dimension_numbers = #tpu.dot_dimension_numbers<[2], [1], [1], [2], [0, 0, 0, 1, 1, 2], [0], [0]>} : vector<2x8x8xf32>, vector<2x8x8xf32>, vector<2x8x8xf32> -> vector<2x8x8xf32>
    "tpu.trace_stop"() : () -> ()
    %105 = vector.shape_cast %104 : vector<2x8x8xf32> to vector<16x8xf32>
    %106 = vector.extract_strided_slice %14 {offsets = [16, 0], sizes = [8, 32], strides = [1, 1]} : vector<32x32xf32> to vector<8x32xf32>
    %cst_45 = arith.constant dense<0.000000e+00> : vector<16x32xf32>
    %107 = tpu.matmul %105, %106, %cst_45 {dimension_numbers = #tpu.dot_dimension_numbers<[1], [0], [0], [1], [0, 0, 1, 1], [], []>} : vector<16x8xf32>, vector<8x32xf32>, vector<16x32xf32> -> vector<16x32xf32>
    %108 = arith.addf %85, %107 : vector<16x32xf32>
    %109 = vector.extract_strided_slice %28 {offsets = [0, 0, 24], sizes = [2, 8, 8], strides = [1, 1, 1]} : vector<2x8x32xf32> to vector<2x8x8xf32>
    %110 = vector.extract_strided_slice %33 {offsets = [0, 0, 24], sizes = [2, 8, 8], strides = [1, 1, 1]} : vector<2x8x32xf32> to vector<2x8x8xf32>
    %111 = vector.extract_strided_slice %38 {offsets = [0, 0, 24], sizes = [2, 8, 8], strides = [1, 1, 1]} : vector<2x8x32xf32> to vector<2x8x8xf32>
    "tpu.trace_start"() <{level = 10 : i32, message = "bqd,bkd->bqk"}> : () -> ()
    %cst_46 = arith.constant dense<0.000000e+00> : vector<2x8x8xf32>
    %112 = tpu.matmul %109, %110, %cst_46 {dimension_numbers = #tpu.dot_dimension_numbers<[2], [2], [1], [1], [0, 0, 0, 1, 1, 1], [0], [0]>} : vector<2x8x8xf32>, vector<2x8x8xf32>, vector<2x8x8xf32> -> vector<2x8x8xf32>
    "tpu.trace_stop"() : () -> ()
    %cst_47 = arith.constant 0.353553385 : f32
    %113 = vector.broadcast %cst_47 : f32 to vector<2x8x8xf32>
    %114 = arith.mulf %112, %113 : vector<2x8x8xf32>
    %115 = vector.broadcast %4 : vector<2x1x8xf32> to vector<2x8x8xf32>
    %116 = arith.addf %114, %115 : vector<2x8x8xf32>
    %cst_48 = arith.constant dense<0xFF800000> : vector<2x8xf32>
    %117 = vector.multi_reduction <maximumf>, %116, %cst_48 [2] : vector<2x8x8xf32> to vector<2x8xf32>
    %118 = vector.shape_cast %117 : vector<2x8xf32> to vector<2x8x1xf32>
    %119 = vector.broadcast %118 : vector<2x8x1xf32> to vector<2x8x8xf32>
    %120 = arith.subf %116, %119 : vector<2x8x8xf32>
    %121 = math.exp %120 : vector<2x8x8xf32>
    %cst_49 = arith.constant dense<0.000000e+00> : vector<2x8xf32>
    %122 = vector.multi_reduction <add>, %121, %cst_49 [2] : vector<2x8x8xf32> to vector<2x8xf32>
    %123 = vector.shape_cast %122 : vector<2x8xf32> to vector<2x8x1xf32>
    %124 = tpu.reciprocal %123 {approx = true} : vector<2x8x1xf32> -> vector<2x8x1xf32>
    %125 = vector.broadcast %124 : vector<2x8x1xf32> to vector<2x8x8xf32>
    %126 = arith.mulf %121, %125 : vector<2x8x8xf32>
    "tpu.trace_start"() <{level = 10 : i32, message = "bqk,bkd->bqd"}> : () -> ()
    %cst_50 = arith.constant dense<0.000000e+00> : vector<2x8x8xf32>
    %127 = tpu.matmul %126, %111, %cst_50 {dimension_numbers = #tpu.dot_dimension_numbers<[2], [1], [1], [2], [0, 0, 0, 1, 1, 2], [0], [0]>} : vector<2x8x8xf32>, vector<2x8x8xf32>, vector<2x8x8xf32> -> vector<2x8x8xf32>
    "tpu.trace_stop"() : () -> ()
    %128 = vector.shape_cast %127 : vector<2x8x8xf32> to vector<16x8xf32>
    %129 = vector.extract_strided_slice %14 {offsets = [24, 0], sizes = [8, 32], strides = [1, 1]} : vector<32x32xf32> to vector<8x32xf32>
    %cst_51 = arith.constant dense<0.000000e+00> : vector<16x32xf32>
    %130 = tpu.matmul %128, %129, %cst_51 {dimension_numbers = #tpu.dot_dimension_numbers<[1], [0], [0], [1], [0, 0, 1, 1], [], []>} : vector<16x8xf32>, vector<8x32xf32>, vector<16x32xf32> -> vector<16x32xf32>
    %131 = arith.addf %108, %130 : vector<16x32xf32>
    %132 = vector.extract_strided_slice %20 {offsets = [3, 0], sizes = [1, 32], strides = [1, 1]} : vector<9x32xf32> to vector<1x32xf32>
    %133 = vector.broadcast %132 : vector<1x32xf32> to vector<16x32xf32>
    %134 = arith.addf %131, %133 : vector<16x32xf32>
    %135 = arith.addf %10, %134 : vector<16x32xf32>
    %cst_52 = arith.constant dense<0.000000e+00> : vector<16xf32>
    %136 = vector.multi_reduction <add>, %135, %cst_52 [1] : vector<16x32xf32> to vector<16xf32>
    %137 = vector.shape_cast %136 : vector<16xf32> to vector<16x1xf32>
    %cst_53 = arith.constant 3.200000e+01 : f32
    %138 = vector.broadcast %cst_53 : f32 to vector<16x1xf32>
    %139 = arith.divf %137, %138 : vector<16x1xf32>
    %140 = vector.broadcast %139 : vector<16x1xf32> to vector<16x32xf32>
    %141 = arith.subf %135, %140 : vector<16x32xf32>
    %142 = arith.mulf %141, %141 : vector<16x32xf32>
    %cst_54 = arith.constant dense<0.000000e+00> : vector<16xf32>
    %143 = vector.multi_reduction <add>, %142, %cst_54 [1] : vector<16x32xf32> to vector<16xf32>
    %144 = vector.shape_cast %143 : vector<16xf32> to vector<16x1xf32>
    %cst_55 = arith.constant 3.200000e+01 : f32
    %145 = vector.broadcast %cst_55 : f32 to vector<16x1xf32>
    %146 = arith.divf %144, %145 : vector<16x1xf32>
    %147 = vector.broadcast %139 : vector<16x1xf32> to vector<16x32xf32>
    %148 = arith.subf %135, %147 : vector<16x32xf32>
    %cst_56 = arith.constant 9.99999974E-6 : f32
    %149 = vector.broadcast %cst_56 : f32 to vector<16x1xf32>
    %150 = arith.addf %146, %149 : vector<16x1xf32>
    %151 = math.rsqrt %150 : vector<16x1xf32>
    %152 = vector.broadcast %151 : vector<16x1xf32> to vector<16x32xf32>
    %153 = arith.mulf %148, %152 : vector<16x32xf32>
    %154 = vector.extract_strided_slice %20 {offsets = [4, 0], sizes = [1, 32], strides = [1, 1]} : vector<9x32xf32> to vector<1x32xf32>
    %155 = vector.broadcast %154 : vector<1x32xf32> to vector<16x32xf32>
    %156 = arith.mulf %153, %155 : vector<16x32xf32>
    %157 = vector.extract_strided_slice %20 {offsets = [5, 0], sizes = [1, 32], strides = [1, 1]} : vector<9x32xf32> to vector<1x32xf32>
    %158 = vector.broadcast %157 : vector<1x32xf32> to vector<16x32xf32>
    %159 = arith.addf %156, %158 : vector<16x32xf32>
    %cst_57 = arith.constant dense<0.000000e+00> : vector<16x64xf32>
    %160 = tpu.matmul %159, %16, %cst_57 {dimension_numbers = #tpu.dot_dimension_numbers<[1], [0], [0], [1], [0, 0, 1, 1], [], []>} : vector<16x32xf32>, vector<32x64xf32>, vector<16x64xf32> -> vector<16x64xf32>
    %161 = vector.broadcast %22 : vector<1x64xf32> to vector<16x64xf32>
    %162 = arith.addf %160, %161 : vector<16x64xf32>
    %cst_58 = arith.constant 0.000000e+00 : f32
    %163 = vector.broadcast %cst_58 : f32 to vector<16x64xf32>
    %164 = arith.maximumf %162, %163 : vector<16x64xf32>
    %cst_59 = arith.constant dense<0.000000e+00> : vector<16x32xf32>
    %165 = tpu.matmul %164, %18, %cst_59 {dimension_numbers = #tpu.dot_dimension_numbers<[1], [0], [0], [1], [0, 0, 1, 1], [], []>} : vector<16x64xf32>, vector<64x32xf32>, vector<16x32xf32> -> vector<16x32xf32>
    %166 = vector.extract_strided_slice %20 {offsets = [6, 0], sizes = [1, 32], strides = [1, 1]} : vector<9x32xf32> to vector<1x32xf32>
    %167 = vector.broadcast %166 : vector<1x32xf32> to vector<16x32xf32>
    %168 = arith.addf %165, %167 : vector<16x32xf32>
    %169 = arith.addf %159, %168 : vector<16x32xf32>
    %cst_60 = arith.constant dense<0.000000e+00> : vector<16xf32>
    %170 = vector.multi_reduction <add>, %169, %cst_60 [1] : vector<16x32xf32> to vector<16xf32>
    %171 = vector.shape_cast %170 : vector<16xf32> to vector<16x1xf32>
    %cst_61 = arith.constant 3.200000e+01 : f32
    %172 = vector.broadcast %cst_61 : f32 to vector<16x1xf32>
    %173 = arith.divf %171, %172 : vector<16x1xf32>
    %174 = vector.broadcast %173 : vector<16x1xf32> to vector<16x32xf32>
    %175 = arith.subf %169, %174 : vector<16x32xf32>
    %176 = arith.mulf %175, %175 : vector<16x32xf32>
    %cst_62 = arith.constant dense<0.000000e+00> : vector<16xf32>
    %177 = vector.multi_reduction <add>, %176, %cst_62 [1] : vector<16x32xf32> to vector<16xf32>
    %178 = vector.shape_cast %177 : vector<16xf32> to vector<16x1xf32>
    %cst_63 = arith.constant 3.200000e+01 : f32
    %179 = vector.broadcast %cst_63 : f32 to vector<16x1xf32>
    %180 = arith.divf %178, %179 : vector<16x1xf32>
    %181 = vector.broadcast %173 : vector<16x1xf32> to vector<16x32xf32>
    %182 = arith.subf %169, %181 : vector<16x32xf32>
    %cst_64 = arith.constant 9.99999974E-6 : f32
    %183 = vector.broadcast %cst_64 : f32 to vector<16x1xf32>
    %184 = arith.addf %180, %183 : vector<16x1xf32>
    %185 = math.rsqrt %184 : vector<16x1xf32>
    %186 = vector.broadcast %185 : vector<16x1xf32> to vector<16x32xf32>
    %187 = arith.mulf %182, %186 : vector<16x32xf32>
    %188 = vector.extract_strided_slice %20 {offsets = [7, 0], sizes = [1, 32], strides = [1, 1]} : vector<9x32xf32> to vector<1x32xf32>
    %189 = vector.broadcast %188 : vector<1x32xf32> to vector<16x32xf32>
    %190 = arith.mulf %187, %189 : vector<16x32xf32>
    %191 = vector.extract_strided_slice %20 {offsets = [8, 0], sizes = [1, 32], strides = [1, 1]} : vector<9x32xf32> to vector<1x32xf32>
    %192 = vector.broadcast %191 : vector<1x32xf32> to vector<16x32xf32>
    %193 = arith.addf %190, %192 : vector<16x32xf32>
    %c1 = arith.constant 1 : index
    %c0_65 = arith.constant 0 : index
    %c0_66 = arith.constant 0 : index
    %194 = vector.load %arg4[%c1, %c0_65, %c0_66] : memref<2x32x96xf32, #tpu.memory_space<vmem>>, vector<1x32x96xf32>
    %195 = vector.shape_cast %194 : vector<1x32x96xf32> to vector<32x96xf32>
    %c1_67 = arith.constant 1 : index
    %c0_68 = arith.constant 0 : index
    %c0_69 = arith.constant 0 : index
    %196 = vector.load %arg5[%c1_67, %c0_68, %c0_69] : memref<2x32x32xf32, #tpu.memory_space<vmem>>, vector<1x32x32xf32>
    %197 = vector.shape_cast %196 : vector<1x32x32xf32> to vector<32x32xf32>
    %c1_70 = arith.constant 1 : index
    %c0_71 = arith.constant 0 : index
    %c0_72 = arith.constant 0 : index
    %198 = vector.load %arg6[%c1_70, %c0_71, %c0_72] : memref<2x32x64xf32, #tpu.memory_space<vmem>>, vector<1x32x64xf32>
    %199 = vector.shape_cast %198 : vector<1x32x64xf32> to vector<32x64xf32>
    %c1_73 = arith.constant 1 : index
    %c0_74 = arith.constant 0 : index
    %c0_75 = arith.constant 0 : index
    %200 = vector.load %arg7[%c1_73, %c0_74, %c0_75] : memref<2x64x32xf32, #tpu.memory_space<vmem>>, vector<1x64x32xf32>
    %201 = vector.shape_cast %200 : vector<1x64x32xf32> to vector<64x32xf32>
    %c1_76 = arith.constant 1 : index
    %c0_77 = arith.constant 0 : index
    %c0_78 = arith.constant 0 : index
    %202 = vector.load %arg8[%c1_76, %c0_77, %c0_78] : memref<2x9x32xf32, #tpu.memory_space<vmem>>, vector<1x9x32xf32>
    %203 = vector.shape_cast %202 : vector<1x9x32xf32> to vector<9x32xf32>
    %c1_79 = arith.constant 1 : index
    %c0_80 = arith.constant 0 : index
    %c0_81 = arith.constant 0 : index
    %204 = vector.load %arg9[%c1_79, %c0_80, %c0_81] : memref<2x1x64xf32, #tpu.memory_space<vmem>>, vector<1x1x64xf32>
    %205 = vector.shape_cast %204 : vector<1x1x64xf32> to vector<1x64xf32>
    %cst_82 = arith.constant dense<0.000000e+00> : vector<16x96xf32>
    %206 = tpu.matmul %193, %195, %cst_82 {dimension_numbers = #tpu.dot_dimension_numbers<[1], [0], [0], [1], [0, 0, 1, 1], [], []>} : vector<16x32xf32>, vector<32x96xf32>, vector<16x96xf32> -> vector<16x96xf32>
    %207 = vector.extract_strided_slice %206 {offsets = [0, 0], sizes = [16, 32], strides = [1, 1]} : vector<16x96xf32> to vector<16x32xf32>
    %208 = vector.extract_strided_slice %203 {offsets = [0, 0], sizes = [1, 32], strides = [1, 1]} : vector<9x32xf32> to vector<1x32xf32>
    %209 = vector.broadcast %208 : vector<1x32xf32> to vector<16x32xf32>
    %210 = arith.addf %207, %209 : vector<16x32xf32>
    %211 = vector.shape_cast %210 : vector<16x32xf32> to vector<2x8x32xf32>
    %212 = vector.extract_strided_slice %206 {offsets = [0, 32], sizes = [16, 32], strides = [1, 1]} : vector<16x96xf32> to vector<16x32xf32>
    %213 = vector.extract_strided_slice %203 {offsets = [1, 0], sizes = [1, 32], strides = [1, 1]} : vector<9x32xf32> to vector<1x32xf32>
    %214 = vector.broadcast %213 : vector<1x32xf32> to vector<16x32xf32>
    %215 = arith.addf %212, %214 : vector<16x32xf32>
    %216 = vector.shape_cast %215 : vector<16x32xf32> to vector<2x8x32xf32>
    %217 = vector.extract_strided_slice %206 {offsets = [0, 64], sizes = [16, 32], strides = [1, 1]} : vector<16x96xf32> to vector<16x32xf32>
    %218 = vector.extract_strided_slice %203 {offsets = [2, 0], sizes = [1, 32], strides = [1, 1]} : vector<9x32xf32> to vector<1x32xf32>
    %219 = vector.broadcast %218 : vector<1x32xf32> to vector<16x32xf32>
    %220 = arith.addf %217, %219 : vector<16x32xf32>
    %221 = vector.shape_cast %220 : vector<16x32xf32> to vector<2x8x32xf32>
    %cst_83 = arith.constant 0.000000e+00 : f32
    %222 = vector.broadcast %cst_83 : f32 to vector<16x32xf32>
    %223 = vector.extract_strided_slice %211 {offsets = [0, 0, 0], sizes = [2, 8, 8], strides = [1, 1, 1]} : vector<2x8x32xf32> to vector<2x8x8xf32>
    %224 = vector.extract_strided_slice %216 {offsets = [0, 0, 0], sizes = [2, 8, 8], strides = [1, 1, 1]} : vector<2x8x32xf32> to vector<2x8x8xf32>
    %225 = vector.extract_strided_slice %221 {offsets = [0, 0, 0], sizes = [2, 8, 8], strides = [1, 1, 1]} : vector<2x8x32xf32> to vector<2x8x8xf32>
    "tpu.trace_start"() <{level = 10 : i32, message = "bqd,bkd->bqk"}> : () -> ()
    %cst_84 = arith.constant dense<0.000000e+00> : vector<2x8x8xf32>
    %226 = tpu.matmul %223, %224, %cst_84 {dimension_numbers = #tpu.dot_dimension_numbers<[2], [2], [1], [1], [0, 0, 0, 1, 1, 1], [0], [0]>} : vector<2x8x8xf32>, vector<2x8x8xf32>, vector<2x8x8xf32> -> vector<2x8x8xf32>
    "tpu.trace_stop"() : () -> ()
    %cst_85 = arith.constant 0.353553385 : f32
    %227 = vector.broadcast %cst_85 : f32 to vector<2x8x8xf32>
    %228 = arith.mulf %226, %227 : vector<2x8x8xf32>
    %229 = vector.broadcast %4 : vector<2x1x8xf32> to vector<2x8x8xf32>
    %230 = arith.addf %228, %229 : vector<2x8x8xf32>
    %cst_86 = arith.constant dense<0xFF800000> : vector<2x8xf32>
    %231 = vector.multi_reduction <maximumf>, %230, %cst_86 [2] : vector<2x8x8xf32> to vector<2x8xf32>
    %232 = vector.shape_cast %231 : vector<2x8xf32> to vector<2x8x1xf32>
    %233 = vector.broadcast %232 : vector<2x8x1xf32> to vector<2x8x8xf32>
    %234 = arith.subf %230, %233 : vector<2x8x8xf32>
    %235 = math.exp %234 : vector<2x8x8xf32>
    %cst_87 = arith.constant dense<0.000000e+00> : vector<2x8xf32>
    %236 = vector.multi_reduction <add>, %235, %cst_87 [2] : vector<2x8x8xf32> to vector<2x8xf32>
    %237 = vector.shape_cast %236 : vector<2x8xf32> to vector<2x8x1xf32>
    %238 = tpu.reciprocal %237 {approx = true} : vector<2x8x1xf32> -> vector<2x8x1xf32>
    %239 = vector.broadcast %238 : vector<2x8x1xf32> to vector<2x8x8xf32>
    %240 = arith.mulf %235, %239 : vector<2x8x8xf32>
    "tpu.trace_start"() <{level = 10 : i32, message = "bqk,bkd->bqd"}> : () -> ()
    %cst_88 = arith.constant dense<0.000000e+00> : vector<2x8x8xf32>
    %241 = tpu.matmul %240, %225, %cst_88 {dimension_numbers = #tpu.dot_dimension_numbers<[2], [1], [1], [2], [0, 0, 0, 1, 1, 2], [0], [0]>} : vector<2x8x8xf32>, vector<2x8x8xf32>, vector<2x8x8xf32> -> vector<2x8x8xf32>
    "tpu.trace_stop"() : () -> ()
    %242 = vector.shape_cast %241 : vector<2x8x8xf32> to vector<16x8xf32>
    %243 = vector.extract_strided_slice %197 {offsets = [0, 0], sizes = [8, 32], strides = [1, 1]} : vector<32x32xf32> to vector<8x32xf32>
    %cst_89 = arith.constant dense<0.000000e+00> : vector<16x32xf32>
    %244 = tpu.matmul %242, %243, %cst_89 {dimension_numbers = #tpu.dot_dimension_numbers<[1], [0], [0], [1], [0, 0, 1, 1], [], []>} : vector<16x8xf32>, vector<8x32xf32>, vector<16x32xf32> -> vector<16x32xf32>
    %245 = arith.addf %222, %244 : vector<16x32xf32>
    %246 = vector.extract_strided_slice %211 {offsets = [0, 0, 8], sizes = [2, 8, 8], strides = [1, 1, 1]} : vector<2x8x32xf32> to vector<2x8x8xf32>
    %247 = vector.extract_strided_slice %216 {offsets = [0, 0, 8], sizes = [2, 8, 8], strides = [1, 1, 1]} : vector<2x8x32xf32> to vector<2x8x8xf32>
    %248 = vector.extract_strided_slice %221 {offsets = [0, 0, 8], sizes = [2, 8, 8], strides = [1, 1, 1]} : vector<2x8x32xf32> to vector<2x8x8xf32>
    "tpu.trace_start"() <{level = 10 : i32, message = "bqd,bkd->bqk"}> : () -> ()
    %cst_90 = arith.constant dense<0.000000e+00> : vector<2x8x8xf32>
    %249 = tpu.matmul %246, %247, %cst_90 {dimension_numbers = #tpu.dot_dimension_numbers<[2], [2], [1], [1], [0, 0, 0, 1, 1, 1], [0], [0]>} : vector<2x8x8xf32>, vector<2x8x8xf32>, vector<2x8x8xf32> -> vector<2x8x8xf32>
    "tpu.trace_stop"() : () -> ()
    %cst_91 = arith.constant 0.353553385 : f32
    %250 = vector.broadcast %cst_91 : f32 to vector<2x8x8xf32>
    %251 = arith.mulf %249, %250 : vector<2x8x8xf32>
    %252 = vector.broadcast %4 : vector<2x1x8xf32> to vector<2x8x8xf32>
    %253 = arith.addf %251, %252 : vector<2x8x8xf32>
    %cst_92 = arith.constant dense<0xFF800000> : vector<2x8xf32>
    %254 = vector.multi_reduction <maximumf>, %253, %cst_92 [2] : vector<2x8x8xf32> to vector<2x8xf32>
    %255 = vector.shape_cast %254 : vector<2x8xf32> to vector<2x8x1xf32>
    %256 = vector.broadcast %255 : vector<2x8x1xf32> to vector<2x8x8xf32>
    %257 = arith.subf %253, %256 : vector<2x8x8xf32>
    %258 = math.exp %257 : vector<2x8x8xf32>
    %cst_93 = arith.constant dense<0.000000e+00> : vector<2x8xf32>
    %259 = vector.multi_reduction <add>, %258, %cst_93 [2] : vector<2x8x8xf32> to vector<2x8xf32>
    %260 = vector.shape_cast %259 : vector<2x8xf32> to vector<2x8x1xf32>
    %261 = tpu.reciprocal %260 {approx = true} : vector<2x8x1xf32> -> vector<2x8x1xf32>
    %262 = vector.broadcast %261 : vector<2x8x1xf32> to vector<2x8x8xf32>
    %263 = arith.mulf %258, %262 : vector<2x8x8xf32>
    "tpu.trace_start"() <{level = 10 : i32, message = "bqk,bkd->bqd"}> : () -> ()
    %cst_94 = arith.constant dense<0.000000e+00> : vector<2x8x8xf32>
    %264 = tpu.matmul %263, %248, %cst_94 {dimension_numbers = #tpu.dot_dimension_numbers<[2], [1], [1], [2], [0, 0, 0, 1, 1, 2], [0], [0]>} : vector<2x8x8xf32>, vector<2x8x8xf32>, vector<2x8x8xf32> -> vector<2x8x8xf32>
    "tpu.trace_stop"() : () -> ()
    %265 = vector.shape_cast %264 : vector<2x8x8xf32> to vector<16x8xf32>
    %266 = vector.extract_strided_slice %197 {offsets = [8, 0], sizes = [8, 32], strides = [1, 1]} : vector<32x32xf32> to vector<8x32xf32>
    %cst_95 = arith.constant dense<0.000000e+00> : vector<16x32xf32>
    %267 = tpu.matmul %265, %266, %cst_95 {dimension_numbers = #tpu.dot_dimension_numbers<[1], [0], [0], [1], [0, 0, 1, 1], [], []>} : vector<16x8xf32>, vector<8x32xf32>, vector<16x32xf32> -> vector<16x32xf32>
    %268 = arith.addf %245, %267 : vector<16x32xf32>
    %269 = vector.extract_strided_slice %211 {offsets = [0, 0, 16], sizes = [2, 8, 8], strides = [1, 1, 1]} : vector<2x8x32xf32> to vector<2x8x8xf32>
    %270 = vector.extract_strided_slice %216 {offsets = [0, 0, 16], sizes = [2, 8, 8], strides = [1, 1, 1]} : vector<2x8x32xf32> to vector<2x8x8xf32>
    %271 = vector.extract_strided_slice %221 {offsets = [0, 0, 16], sizes = [2, 8, 8], strides = [1, 1, 1]} : vector<2x8x32xf32> to vector<2x8x8xf32>
    "tpu.trace_start"() <{level = 10 : i32, message = "bqd,bkd->bqk"}> : () -> ()
    %cst_96 = arith.constant dense<0.000000e+00> : vector<2x8x8xf32>
    %272 = tpu.matmul %269, %270, %cst_96 {dimension_numbers = #tpu.dot_dimension_numbers<[2], [2], [1], [1], [0, 0, 0, 1, 1, 1], [0], [0]>} : vector<2x8x8xf32>, vector<2x8x8xf32>, vector<2x8x8xf32> -> vector<2x8x8xf32>
    "tpu.trace_stop"() : () -> ()
    %cst_97 = arith.constant 0.353553385 : f32
    %273 = vector.broadcast %cst_97 : f32 to vector<2x8x8xf32>
    %274 = arith.mulf %272, %273 : vector<2x8x8xf32>
    %275 = vector.broadcast %4 : vector<2x1x8xf32> to vector<2x8x8xf32>
    %276 = arith.addf %274, %275 : vector<2x8x8xf32>
    %cst_98 = arith.constant dense<0xFF800000> : vector<2x8xf32>
    %277 = vector.multi_reduction <maximumf>, %276, %cst_98 [2] : vector<2x8x8xf32> to vector<2x8xf32>
    %278 = vector.shape_cast %277 : vector<2x8xf32> to vector<2x8x1xf32>
    %279 = vector.broadcast %278 : vector<2x8x1xf32> to vector<2x8x8xf32>
    %280 = arith.subf %276, %279 : vector<2x8x8xf32>
    %281 = math.exp %280 : vector<2x8x8xf32>
    %cst_99 = arith.constant dense<0.000000e+00> : vector<2x8xf32>
    %282 = vector.multi_reduction <add>, %281, %cst_99 [2] : vector<2x8x8xf32> to vector<2x8xf32>
    %283 = vector.shape_cast %282 : vector<2x8xf32> to vector<2x8x1xf32>
    %284 = tpu.reciprocal %283 {approx = true} : vector<2x8x1xf32> -> vector<2x8x1xf32>
    %285 = vector.broadcast %284 : vector<2x8x1xf32> to vector<2x8x8xf32>
    %286 = arith.mulf %281, %285 : vector<2x8x8xf32>
    "tpu.trace_start"() <{level = 10 : i32, message = "bqk,bkd->bqd"}> : () -> ()
    %cst_100 = arith.constant dense<0.000000e+00> : vector<2x8x8xf32>
    %287 = tpu.matmul %286, %271, %cst_100 {dimension_numbers = #tpu.dot_dimension_numbers<[2], [1], [1], [2], [0, 0, 0, 1, 1, 2], [0], [0]>} : vector<2x8x8xf32>, vector<2x8x8xf32>, vector<2x8x8xf32> -> vector<2x8x8xf32>
    "tpu.trace_stop"() : () -> ()
    %288 = vector.shape_cast %287 : vector<2x8x8xf32> to vector<16x8xf32>
    %289 = vector.extract_strided_slice %197 {offsets = [16, 0], sizes = [8, 32], strides = [1, 1]} : vector<32x32xf32> to vector<8x32xf32>
    %cst_101 = arith.constant dense<0.000000e+00> : vector<16x32xf32>
    %290 = tpu.matmul %288, %289, %cst_101 {dimension_numbers = #tpu.dot_dimension_numbers<[1], [0], [0], [1], [0, 0, 1, 1], [], []>} : vector<16x8xf32>, vector<8x32xf32>, vector<16x32xf32> -> vector<16x32xf32>
    %291 = arith.addf %268, %290 : vector<16x32xf32>
    %292 = vector.extract_strided_slice %211 {offsets = [0, 0, 24], sizes = [2, 8, 8], strides = [1, 1, 1]} : vector<2x8x32xf32> to vector<2x8x8xf32>
    %293 = vector.extract_strided_slice %216 {offsets = [0, 0, 24], sizes = [2, 8, 8], strides = [1, 1, 1]} : vector<2x8x32xf32> to vector<2x8x8xf32>
    %294 = vector.extract_strided_slice %221 {offsets = [0, 0, 24], sizes = [2, 8, 8], strides = [1, 1, 1]} : vector<2x8x32xf32> to vector<2x8x8xf32>
    "tpu.trace_start"() <{level = 10 : i32, message = "bqd,bkd->bqk"}> : () -> ()
    %cst_102 = arith.constant dense<0.000000e+00> : vector<2x8x8xf32>
    %295 = tpu.matmul %292, %293, %cst_102 {dimension_numbers = #tpu.dot_dimension_numbers<[2], [2], [1], [1], [0, 0, 0, 1, 1, 1], [0], [0]>} : vector<2x8x8xf32>, vector<2x8x8xf32>, vector<2x8x8xf32> -> vector<2x8x8xf32>
    "tpu.trace_stop"() : () -> ()
    %cst_103 = arith.constant 0.353553385 : f32
    %296 = vector.broadcast %cst_103 : f32 to vector<2x8x8xf32>
    %297 = arith.mulf %295, %296 : vector<2x8x8xf32>
    %298 = vector.broadcast %4 : vector<2x1x8xf32> to vector<2x8x8xf32>
    %299 = arith.addf %297, %298 : vector<2x8x8xf32>
    %cst_104 = arith.constant dense<0xFF800000> : vector<2x8xf32>
    %300 = vector.multi_reduction <maximumf>, %299, %cst_104 [2] : vector<2x8x8xf32> to vector<2x8xf32>
    %301 = vector.shape_cast %300 : vector<2x8xf32> to vector<2x8x1xf32>
    %302 = vector.broadcast %301 : vector<2x8x1xf32> to vector<2x8x8xf32>
    %303 = arith.subf %299, %302 : vector<2x8x8xf32>
    %304 = math.exp %303 : vector<2x8x8xf32>
    %cst_105 = arith.constant dense<0.000000e+00> : vector<2x8xf32>
    %305 = vector.multi_reduction <add>, %304, %cst_105 [2] : vector<2x8x8xf32> to vector<2x8xf32>
    %306 = vector.shape_cast %305 : vector<2x8xf32> to vector<2x8x1xf32>
    %307 = tpu.reciprocal %306 {approx = true} : vector<2x8x1xf32> -> vector<2x8x1xf32>
    %308 = vector.broadcast %307 : vector<2x8x1xf32> to vector<2x8x8xf32>
    %309 = arith.mulf %304, %308 : vector<2x8x8xf32>
    "tpu.trace_start"() <{level = 10 : i32, message = "bqk,bkd->bqd"}> : () -> ()
    %cst_106 = arith.constant dense<0.000000e+00> : vector<2x8x8xf32>
    %310 = tpu.matmul %309, %294, %cst_106 {dimension_numbers = #tpu.dot_dimension_numbers<[2], [1], [1], [2], [0, 0, 0, 1, 1, 2], [0], [0]>} : vector<2x8x8xf32>, vector<2x8x8xf32>, vector<2x8x8xf32> -> vector<2x8x8xf32>
    "tpu.trace_stop"() : () -> ()
    %311 = vector.shape_cast %310 : vector<2x8x8xf32> to vector<16x8xf32>
    %312 = vector.extract_strided_slice %197 {offsets = [24, 0], sizes = [8, 32], strides = [1, 1]} : vector<32x32xf32> to vector<8x32xf32>
    %cst_107 = arith.constant dense<0.000000e+00> : vector<16x32xf32>
    %313 = tpu.matmul %311, %312, %cst_107 {dimension_numbers = #tpu.dot_dimension_numbers<[1], [0], [0], [1], [0, 0, 1, 1], [], []>} : vector<16x8xf32>, vector<8x32xf32>, vector<16x32xf32> -> vector<16x32xf32>
    %314 = arith.addf %291, %313 : vector<16x32xf32>
    %315 = vector.extract_strided_slice %203 {offsets = [3, 0], sizes = [1, 32], strides = [1, 1]} : vector<9x32xf32> to vector<1x32xf32>
    %316 = vector.broadcast %315 : vector<1x32xf32> to vector<16x32xf32>
    %317 = arith.addf %314, %316 : vector<16x32xf32>
    %318 = arith.addf %193, %317 : vector<16x32xf32>
    %cst_108 = arith.constant dense<0.000000e+00> : vector<16xf32>
    %319 = vector.multi_reduction <add>, %318, %cst_108 [1] : vector<16x32xf32> to vector<16xf32>
    %320 = vector.shape_cast %319 : vector<16xf32> to vector<16x1xf32>
    %cst_109 = arith.constant 3.200000e+01 : f32
    %321 = vector.broadcast %cst_109 : f32 to vector<16x1xf32>
    %322 = arith.divf %320, %321 : vector<16x1xf32>
    %323 = vector.broadcast %322 : vector<16x1xf32> to vector<16x32xf32>
    %324 = arith.subf %318, %323 : vector<16x32xf32>
    %325 = arith.mulf %324, %324 : vector<16x32xf32>
    %cst_110 = arith.constant dense<0.000000e+00> : vector<16xf32>
    %326 = vector.multi_reduction <add>, %325, %cst_110 [1] : vector<16x32xf32> to vector<16xf32>
    %327 = vector.shape_cast %326 : vector<16xf32> to vector<16x1xf32>
    %cst_111 = arith.constant 3.200000e+01 : f32
    %328 = vector.broadcast %cst_111 : f32 to vector<16x1xf32>
    %329 = arith.divf %327, %328 : vector<16x1xf32>
    %330 = vector.broadcast %322 : vector<16x1xf32> to vector<16x32xf32>
    %331 = arith.subf %318, %330 : vector<16x32xf32>
    %cst_112 = arith.constant 9.99999974E-6 : f32
    %332 = vector.broadcast %cst_112 : f32 to vector<16x1xf32>
    %333 = arith.addf %329, %332 : vector<16x1xf32>
    %334 = math.rsqrt %333 : vector<16x1xf32>
    %335 = vector.broadcast %334 : vector<16x1xf32> to vector<16x32xf32>
    %336 = arith.mulf %331, %335 : vector<16x32xf32>
    %337 = vector.extract_strided_slice %203 {offsets = [4, 0], sizes = [1, 32], strides = [1, 1]} : vector<9x32xf32> to vector<1x32xf32>
    %338 = vector.broadcast %337 : vector<1x32xf32> to vector<16x32xf32>
    %339 = arith.mulf %336, %338 : vector<16x32xf32>
    %340 = vector.extract_strided_slice %203 {offsets = [5, 0], sizes = [1, 32], strides = [1, 1]} : vector<9x32xf32> to vector<1x32xf32>
    %341 = vector.broadcast %340 : vector<1x32xf32> to vector<16x32xf32>
    %342 = arith.addf %339, %341 : vector<16x32xf32>
    %cst_113 = arith.constant dense<0.000000e+00> : vector<16x64xf32>
    %343 = tpu.matmul %342, %199, %cst_113 {dimension_numbers = #tpu.dot_dimension_numbers<[1], [0], [0], [1], [0, 0, 1, 1], [], []>} : vector<16x32xf32>, vector<32x64xf32>, vector<16x64xf32> -> vector<16x64xf32>
    %344 = vector.broadcast %205 : vector<1x64xf32> to vector<16x64xf32>
    %345 = arith.addf %343, %344 : vector<16x64xf32>
    %cst_114 = arith.constant 0.000000e+00 : f32
    %346 = vector.broadcast %cst_114 : f32 to vector<16x64xf32>
    %347 = arith.maximumf %345, %346 : vector<16x64xf32>
    %cst_115 = arith.constant dense<0.000000e+00> : vector<16x32xf32>
    %348 = tpu.matmul %347, %201, %cst_115 {dimension_numbers = #tpu.dot_dimension_numbers<[1], [0], [0], [1], [0, 0, 1, 1], [], []>} : vector<16x64xf32>, vector<64x32xf32>, vector<16x32xf32> -> vector<16x32xf32>
    %349 = vector.extract_strided_slice %203 {offsets = [6, 0], sizes = [1, 32], strides = [1, 1]} : vector<9x32xf32> to vector<1x32xf32>
    %350 = vector.broadcast %349 : vector<1x32xf32> to vector<16x32xf32>
    %351 = arith.addf %348, %350 : vector<16x32xf32>
    %352 = arith.addf %342, %351 : vector<16x32xf32>
    %cst_116 = arith.constant dense<0.000000e+00> : vector<16xf32>
    %353 = vector.multi_reduction <add>, %352, %cst_116 [1] : vector<16x32xf32> to vector<16xf32>
    %354 = vector.shape_cast %353 : vector<16xf32> to vector<16x1xf32>
    %cst_117 = arith.constant 3.200000e+01 : f32
    %355 = vector.broadcast %cst_117 : f32 to vector<16x1xf32>
    %356 = arith.divf %354, %355 : vector<16x1xf32>
    %357 = vector.broadcast %356 : vector<16x1xf32> to vector<16x32xf32>
    %358 = arith.subf %352, %357 : vector<16x32xf32>
    %359 = arith.mulf %358, %358 : vector<16x32xf32>
    %cst_118 = arith.constant dense<0.000000e+00> : vector<16xf32>
    %360 = vector.multi_reduction <add>, %359, %cst_118 [1] : vector<16x32xf32> to vector<16xf32>
    %361 = vector.shape_cast %360 : vector<16xf32> to vector<16x1xf32>
    %cst_119 = arith.constant 3.200000e+01 : f32
    %362 = vector.broadcast %cst_119 : f32 to vector<16x1xf32>
    %363 = arith.divf %361, %362 : vector<16x1xf32>
    %364 = vector.broadcast %356 : vector<16x1xf32> to vector<16x32xf32>
    %365 = arith.subf %352, %364 : vector<16x32xf32>
    %cst_120 = arith.constant 9.99999974E-6 : f32
    %366 = vector.broadcast %cst_120 : f32 to vector<16x1xf32>
    %367 = arith.addf %363, %366 : vector<16x1xf32>
    %368 = math.rsqrt %367 : vector<16x1xf32>
    %369 = vector.broadcast %368 : vector<16x1xf32> to vector<16x32xf32>
    %370 = arith.mulf %365, %369 : vector<16x32xf32>
    %371 = vector.extract_strided_slice %203 {offsets = [7, 0], sizes = [1, 32], strides = [1, 1]} : vector<9x32xf32> to vector<1x32xf32>
    %372 = vector.broadcast %371 : vector<1x32xf32> to vector<16x32xf32>
    %373 = arith.mulf %370, %372 : vector<16x32xf32>
    %374 = vector.extract_strided_slice %203 {offsets = [8, 0], sizes = [1, 32], strides = [1, 1]} : vector<9x32xf32> to vector<1x32xf32>
    %375 = vector.broadcast %374 : vector<1x32xf32> to vector<16x32xf32>
    %376 = arith.addf %373, %375 : vector<16x32xf32>
    %377 = vector.shape_cast %376 : vector<16x32xf32> to vector<2x8x32xf32>
    "tpu.trace_start"() <{level = 10 : i32, message = "bks,bsd->bkd"}> : () -> ()
    %cst_121 = arith.constant dense<0.000000e+00> : vector<2x1x32xf32>
    %378 = tpu.matmul %0, %377, %cst_121 {dimension_numbers = #tpu.dot_dimension_numbers<[2], [1], [1], [2], [0, 0, 0, 1, 1, 2], [0], [0]>} : vector<2x1x8xf32>, vector<2x8x32xf32>, vector<2x1x32xf32> -> vector<2x1x32xf32>
    "tpu.trace_stop"() : () -> ()
    %379 = vector.shape_cast %378 : vector<2x1x32xf32> to vector<2x32xf32>
    %cst_122 = arith.constant dense<0.000000e+00> : vector<2x1xf32>
    %380 = vector.multi_reduction <add>, %0, %cst_122 [2] : vector<2x1x8xf32> to vector<2x1xf32>
    %cst_123 = arith.constant 1.000000e+00 : f32
    %381 = vector.broadcast %cst_123 : f32 to vector<2x1xf32>
    %382 = arith.maximumf %380, %381 : vector<2x1xf32>
    %383 = tpu.reciprocal %382 {approx = true} : vector<2x1xf32> -> vector<2x1xf32>
    %384 = vector.broadcast %383 : vector<2x1xf32> to vector<2x32xf32>
    %385 = arith.mulf %379, %384 : vector<2x32xf32>
    %c0_124 = arith.constant 0 : index
    %c0_125 = arith.constant 0 : index
    %c0_126 = arith.constant 0 : index
    %386 = vector.load %arg10[%c0_124, %c0_125, %c0_126] : memref<1x2x32xf32, #tpu.memory_space<vmem>>, vector<1x2x32xf32>
    %387 = vector.shape_cast %386 : vector<1x2x32xf32> to vector<2x32xf32>
    %388 = vector.shape_cast %385 : vector<2x32xf32> to vector<1x2x32xf32>
    tpu.vector_store %arg10[%c0_124, %c0_125, %c0_126], %388 {strides = array<i32>} : memref<1x2x32xf32, #tpu.memory_space<vmem>>, vector<1x2x32xf32>,
    return
  }
  func.func @transform_0(%arg0: i32) -> (i32, i32, i32) {
    %c0_i32 = arith.constant 0 : i32
    %c0_i32_0 = arith.constant 0 : i32
    %c0_i32_1 = arith.constant 0 : i32
    return %arg0, %c0_i32, %c0_i32_0 : i32, i32, i32
  }
  func.func @transform_1(%arg0: i32) -> (i32, i32, i32) {
    %c0_i32 = arith.constant 0 : i32
    %c0_i32_0 = arith.constant 0 : i32
    %c0_i32_1 = arith.constant 0 : i32
    return %arg0, %c0_i32, %c0_i32_0 : i32, i32, i32
  }
  func.func @transform_2(%arg0: i32) -> (i32, i32) {
    %c0_i32 = arith.constant 0 : i32
    %c0_i32_0 = arith.constant 0 : i32
    %c0_i32_1 = arith.constant 0 : i32
    return %c0_i32, %c0_i32_0 : i32, i32
  }
  func.func @transform_3(%arg0: i32) -> (i32, i32, i32) {
    %c0_i32 = arith.constant 0 : i32
    %c0_i32_0 = arith.constant 0 : i32
    %c0_i32_1 = arith.constant 0 : i32
    %c0_i32_2 = arith.constant 0 : i32
    return %c0_i32, %c0_i32_0, %c0_i32_1 : i32, i32, i32
  }
  func.func @transform_4(%arg0: i32) -> (i32, i32, i32) {
    %c0_i32 = arith.constant 0 : i32
    %c0_i32_0 = arith.constant 0 : i32
    %c0_i32_1 = arith.constant 0 : i32
    %c0_i32_2 = arith.constant 0 : i32
    return %c0_i32, %c0_i32_0, %c0_i32_1 : i32, i32, i32
  }
  func.func @transform_5(%arg0: i32) -> (i32, i32, i32) {
    %c0_i32 = arith.constant 0 : i32
    %c0_i32_0 = arith.constant 0 : i32
    %c0_i32_1 = arith.constant 0 : i32
    %c0_i32_2 = arith.constant 0 : i32
    return %c0_i32, %c0_i32_0, %c0_i32_1 : i32, i32, i32
  }
  func.func @transform_6(%arg0: i32) -> (i32, i32, i32) {
    %c0_i32 = arith.constant 0 : i32
    %c0_i32_0 = arith.constant 0 : i32
    %c0_i32_1 = arith.constant 0 : i32
    %c0_i32_2 = arith.constant 0 : i32
    return %c0_i32, %c0_i32_0, %c0_i32_1 : i32, i32, i32
  }
  func.func @transform_7(%arg0: i32) -> (i32, i32, i32) {
    %c0_i32 = arith.constant 0 : i32
    %c0_i32_0 = arith.constant 0 : i32
    %c0_i32_1 = arith.constant 0 : i32
    %c0_i32_2 = arith.constant 0 : i32
    return %c0_i32, %c0_i32_0, %c0_i32_1 : i32, i32, i32
  }
  func.func @transform_8(%arg0: i32) -> (i32, i32, i32) {
    %c0_i32 = arith.constant 0 : i32
    %c0_i32_0 = arith.constant 0 : i32
    %c0_i32_1 = arith.constant 0 : i32
    %c0_i32_2 = arith.constant 0 : i32
    return %c0_i32, %c0_i32_0, %c0_i32_1 : i32, i32, i32
  }
  func.func @transform_9(%arg0: i32) -> (i32, i32, i32) {
    %c0_i32 = arith.constant 0 : i32
    %c0_i32_0 = arith.constant 0 : i32
    %c0_i32_1 = arith.constant 0 : i32
    return %arg0, %c0_i32, %c0_i32_0 : i32, i32, i32
  }
}

</mosaic_0001>

<bundles_post_ra>
// kernel: spatial_encoder_forward.3
= control target key start
LH: loop header
LB: loop body
LE: loop exit
PB: predicated region body
PF: predicated region fallthrough
CT: control target
= control target key end

     0   :  { %14 = vsyncpa [#allocation3], 0  ;;  %s4301_s0 = inlined_call_operand.vmem [shape: f32[2,2,32], index: 0, kind: input, shape index: {}]   ;;  %s4302_s1 = inlined_call_operand.vmem [shape: f32[2,1,2], index: 1, kind: input, shape index: {}]   ;;  %s4303_s2 = inlined_call_operand.vmem [shape: f32[2,32], index: 2, kind: input, shape index: {}]   ;;  %s4304_s3 = inlined_call_operand.vmem [shape: f32[2,32,96], index: 3, kind: input, shape index: {}]   ;;  %s4305_s4 = inlined_call_operand.vmem [shape: f32[2,32,32], index: 4, kind: input, shape index: {}]   ;;  %s4306_s5 = inlined_call_operand.vmem [shape: f32[2,32,64], index: 5, kind: input, shape index: {}]   ;;  %s4307_s6 = inlined_call_operand.vmem [shape: f32[2,64,32], index: 6, kind: input, shape index: {}]   ;;  %s4308_s7 = inlined_call_operand.vmem [shape: f32[2,9,32], index: 7, kind: input, shape index: {}]   ;;  %s4309_s8 = inlined_call_operand.vmem [shape: f32[2,1,64], index: 8, kind: input, shape index: {}]   ;;  %s4310_s9 = inlined_call_operand.hbm [shape: f32[2,1,32], index: 9, kind: output, shape index: {}]  }
   0x1   :  { %16 = vsyncpa [#allocation3 + $0x1], 0  ;;  %s3722_s30 = smov 0   ;;  %s3724_s10 = smov 0  }
   0x2   :  { %s3726_s11 = smov 0   ;;  %s3728_s12 = smov 0  }
   0x3 LB: > { %s3743_s13 = sadd.s32 4294967295, %s3655_s12   ;;  %s3121_s14 = sadd.s32 4294967294, %s3655_s12   ;;  %s3655_s12 = sphi %s3728_s12, %s4335_s12   ;;  %s3651_s11 = sphi %s3726_s11, %s4334_s11   ;;  %s3647_s10 = sphi %s3724_s10, %s4333_s10   ;;  %s3643_s30 = sphi %s3722_s30, %s4332_s30  }
   0x4   : > { %s3747_s15 = sadd.s32 1, %s3655_s12   ;;  %s228_s16 = sadd.s32 1, %s3651_s11 }
   0x5   : > { %s225_s17 = ssub.s32 %s3655_s12, %s3747_s15  ;;  %p238_p0 = scmp.ne.s32.totalorder %s3651_s11, %s3647_s10 }
   0x6   : > { %p226_p1 = scmp.eq.s32.totalorder %s225_s17, 0  ;;  %p239_p2 = scmp.eq.s32.totalorder %s3743_s13, 1 }
   0x7   : > { %p244_p3 = scmp.ne.s32.totalorder %s3647_s10, %s3643_s30  ;;  %p245_p4 = scmp.eq.s32.totalorder %s3121_s14, 1 }
   0x8   : > { %s3758_s18 = scalar_select %p226_p1, %s3651_s11, %s228_s16  }
   0x9   : > { %p3760_p5 = por %p239_p2, %p238_p0  ;;  %p3764_p6 = por %p245_p4, %p244_p3 }
   0xa   : > { %p3124_p7 = scmp.ge.s32.totalorder %s3655_s12, 1  ;;  %p297_p8 = scmp.lt.s32.totalorder %s3655_s12, 3 }
   0xc   : > { %p298_p9 = pnand %p3124_p7, %p297_p8 }
   0xd   : > { %p334_p10 = scmp.lt.s32.totalorder (!%p298_p9), %s3743_s13, 1  ;;  %s3659_s27 = smov (!%p298_p9), 32  }
   0xe   : > { %301 = sbr.rel (%p298_p9) target bundleno = 7132 (0x1bdc), region = 56  ;;  %s3660_s28 = smov (!%p298_p9), 88  }
   0xf   : > { %s3661_s29 = smov (!%p298_p9), 96   ;;  %s4317_s22 = smov (!%p298_p9), 56  }
  0x10   : > { %s4316_s23 = smov (!%p298_p9), 80   ;;  %s4311_s24 = smov (!%p298_p9), 112  }
  0x11   : > { %s4315_s16 = smov (!%p298_p9), 48  }
  0x13   : > { %v350_v0 = vld [vmem:[%s4304_s3 + $0x18] sm:$0xff]  ;;  %v444_v1 = vlaneseq  ;;  %v3657_v2 = vmov 0.0   ;;  %v349_v3 = vld [vmem:[%s4304_s3 + $0x10] sm:$0xff]  ;;  %vm3658_vm0 = vmmov 0   ;;  %s3781_s25 = scalar_select %p334_p10, %s3743_s13, 1  ;;  %v348_v5 = vld [vmem:[%s4304_s3 + $0x8] sm:$0xff] }
  0x14   : > { %3292 = vmatprep.subr.mxu0 %v3657_v2  ;;  %3300 = vmatprep.mubr.msk.f32.mxu0 %vm3658_vm0, %v3657_v2  ;;  %v3793_v6 = vld [vmem:[%s4308_s7] sm:$0xff]  ;;  %vm370_vm1 = vcmask 261120   ;;  %vm470_vm2 = vcmask 64512   ;;  %vm554_vm3 = vcmask 9216   ;;  %vm573_vm4 = vcmask 1041408   ;;  %v352_v60 = vld [vmem:[%s4305_s4 + $0x8] sm:$0xff] }
  0x15   : > { %3293 = vmatpush3.msra.mxu0 %v350_v0  ;;  %v3783_v4 = vshrl.u32 %v444_v1, 7  ;;  %3303 = vmatprep.subr.mxu1 %v3657_v2  ;;  %s3125_s14 = sshll.u32 %s3781_s25, 1  ;;  %v345_v7 = vld [vmem:[%s4303_s2] sm:$0x3]  ;;  %s3851_s21 = scalar_lea.vmem %s4302_s1, %s3781_s25  ;;  %vm569_vm5 = vcmask 15360   ;;  %vm1450_vm6 = vcmask 254976  }
  0x16   : > { %3294 = vmatprep.subr.mxu0 %v3657_v2  ;;  %3305 = vmatprep.mubr.msk.f32.mxu1 %vm3658_vm0, %v3657_v2  ;;  %v347_v9 = vld [vmem:[%s4304_s3] sm:$0xff]  ;;  %s337_s26 = scalar_lea.vmem %s4301_s0, %s3125_s14  ;;  %s4320_s14 = smov 120   ;;  %vm1559_vm7 = vcmask 523264   ;;  %vm3035_vm8 = vcmask 8192   ;;  %vm3042_vm9 = vcmask 253952  }
  0x17   : > { %3295 = vmatpush3.msra.mxu0 %v349_v3  ;;  %v451_v8 = vsub.s32 1, %v3783_v4  ;;  %v344_v10 = vld [vmem:[%s337_s26] sm:$0x3]  ;;  %v3822_v13 = vsub.s32 0, %v3783_v4  ;;  %v460_v37 = vsub.s32 2, %v3783_v4  ;;  %s4318_s25 = smov 64  }
  0x18   : > { %3296 = vmatprep.subr.mxu0 %v3657_v2  ;;  %v3813_v12 = vadd.f32 %v345_v7, %v344_v10  ;;  %v341_v23 = vld [vmem:[%s3851_s21] sm:$0x1]  ;;  %s4314_s26 = smov 104  }
  0x19   : > { %3297 = vmatpush3.msra.mxu0 %v348_v5  ;;  %v452_v11 = vrot.slane %v3793_v6, %v451_v8  ;;  %v447_v16 = vrot.slane %v3793_v6, %v3822_v13  ;;  %v342_v24 = vsub.f32 1.0, %v341_v23  ;;  %v461_v38 = vrot.slane %v3793_v6, %v460_v37  ;;  %v351_v59 = vld [vmem:[%s4305_s4] sm:$0xff] }
  0x1a   : > { %3298 = vmatprep.subr.mxu0 %v3657_v2 }
  0x1b   : > { %3299 = vmatpush3.msra.mxu0 %v347_v9  ;;  %454 = vrot.lane.b32.xlu0 %v452_v11, %s3659_s27  ;;  %v343_v25 = vmul.f32 -1e+09, %v342_v24 }
  0x1c   : > { %3301 = vmatmul.mubr.msk.f32.vlgmr.msra.gmra.mxu0 %vm370_vm1, %v3813_v12  ;;  %3313 = vmatprep.subr.mxu0 %v3657_v2 }
  0x1d   : > { %3315 = vmatprep.mubr.msk.f32.mxu0 %vm3658_vm0, %v3657_v2  ;;  %v3855_v26 = vrot.slane %v343_v25, %v3822_v13 }
  0x8d   : > { %v455_v14 = vpop.permute.xlu0 %454 }
  0xdc   : > { %v440_v15 = vpop.f32.mrf.mxu0 }
  0xdd   : > { %v3826_v17 = vadd.f32 %v455_v14, %v440_v15  ;;  %v3832_v19 = vadd.f32 %v447_v16, %v440_v15 }
  0xde   : > { %v3302_v18 = vpop.f32.mrf.mxu0 }
  0xdf   : > { %648 = vrot.lane.b32.xlu1 %v3826_v17, %s3660_s28  ;;  %468 = vrot.lane.b32.xlu0 %v3826_v17, %s3661_s29 }
  0xe3   : > { %646 = vrot.lane.b32.xlu1 %v3832_v19, %s4320_s14  ;;  %s4329_s14 = smov 104  }
 0x151   : > { %v649_v20 = vpop.permute.xlu1 %648  ;;  %v469_v21 = vpop.permute.xlu0 %468 }
 0x152   : > { %3304 = vmatpush3.xpose.msk.msra.mxu1 %vm470_vm2, %v469_v21  ;;  %3314 = vmatpush3.xpose.msk.msra.mxu0 %vm470_vm2, %v649_v20 }
 0x153   : > { %3308 = vmatprep.subr.mxu1 %v3657_v2  ;;  %3323 = vmatprep.subr.mxu0 %v3657_v2 }
 0x155   : > { %v647_v22 = vpop.permute.xlu1 %646  ;;  %3306 = vmatmul.mubr.msk.f32.vlgmr.msra.gmra.mxu1 %vm470_vm2, %v3832_v19 }
 0x156   : > { %3316 = vmatmul.mubr.msk.f32.vlgmr.msra.gmra.mxu0 %vm470_vm2, %v647_v22  ;;  %3310 = vmatprep.mubr.msk.f32.mxu1 %vm3658_vm0, %v3657_v2 }
 0x157   : > { %3325 = vmatprep.mubr.msk.f32.mxu0 %vm3658_vm0, %v3657_v2  ;;  %3324 = vmatpush3.msra.mxu0 %v352_v60 }
 0x158   : > { %3333 = vmatprep.subr.mxu0 %v3657_v2 }
 0x215   : > { %v542_v27 = vpop.f32.mrf.mxu1 }
 0x216   : > { %v546_v28 = vmul.f32 0.35355338, %v542_v27  ;;  %v720_v29 = vpop.f32.mrf.mxu0 }
 0x217   : > { %v724_v30 = vmul.f32 0.35355338, %v720_v29  ;;  %v3307_v31 = vpop.f32.mrf.mxu1 }
 0x218   : > { %v3317_v32 = vpop.f32.mrf.mxu0  ;;  %v553_v33 = vadd.f32 %v3855_v26, %v546_v28  ;;  %v353_v31 = vld [vmem:[%s4305_s4 + $0x10] sm:$0xff] }
 0x219   : > { %v725_v34 = vadd.f32 %v724_v30, %v3855_v26 }
 0x21a   : > { %v555_v35 = vsel %vm554_vm3, %v553_v33, -inf }
 0x21b   : > { %556 = vmax.xlane.f32.xlu0 %v555_v35  ;;  %v726_v36 = vsel %vm554_vm3, %v725_v34, -inf }
 0x21c   : > { %727 = vmax.xlane.f32.xlu1 %v726_v36 }
 0x231   : > { %463 = vrot.lane.b32.xlu0 %v461_v38, %s4318_s25 }
 0x2a4   : > { %v557_v39 = vpop.xlane.xlu0 %556 }
 0x2a5   : > { %v558_v40 = vsub.f32 %v553_v33, %v557_v39  ;;  %v728_v41 = vpop.xlane.xlu1 %727 }
 0x2a6   : > { %v729_v42 = vsub.f32 %v725_v34, %v728_v41 }
 0x2a7   : > { %v559_v43 = vmul.f32 1.442695, %v558_v40 }
 0x2a8   : > { %v730_v44 = vmul.f32 1.442695, %v729_v42  ;;  %v464_v45 = vpop.permute.xlu0 %463 }
 0x2a9   : > { %3552 = vpow2.f32 %v559_v43  ;;  %v3866_v46 = vadd.f32 %v464_v45, %v440_v15 }
 0x2aa   : > { %3554 = vpow2.f32 %v730_v44 }
 0x2ab   : > { %737 = vrot.lane.b32.xlu0 %v3866_v46, %s4317_s22  ;;  %s4328_s22 = smov 48  }
 0x2af   : > { %962 = vrot.lane.b32.xlu0 %v3826_v17, %s4316_s23  ;;  %s4327_s23 = smov 112  }
 0x2b3   : > { %960 = vrot.lane.b32.xlu0 %v3832_v19, %s4311_s24  ;;  %s4312_s24 = smov 72  }
 0x2b6   : > { %v3553_v47 = vpop.eup %3552 }
 0x2b7   : > { %v561_v48 = vsel %vm554_vm3, %v3553_v47, 0.0  ;;  %v3555_v49 = vpop.eup %3554 }
 0x2b8   : > { %562 = vadd.xlane.f32.xlu1 %v561_v48  ;;  %v732_v50 = vsel %vm554_vm3, %v3555_v49, 0.0 }
 0x2bc   : > { %733 = vadd.xlane.f32.xlu1 %v732_v50 }
 0x2cd   : > { %567 = vrot.lane.b32.xlu1 %v3866_v46, %s4318_s25  ;;  %s4326_s25 = smov 80  }
 0x31d   : > { %v738_v56 = vpop.permute.xlu0 %737 }
 0x321   : > { %v963_v62 = vpop.permute.xlu0 %962 }
 0x325   : > { %v961_v3 = vpop.permute.xlu0 %960 }
 0x341   : > { %v563_v51 = vpop.xlane.xlu1 %562 }
 0x342   : > { %3556 = vrcp.f32 %v563_v51 }
 0x345   : > { %v734_v52 = vpop.xlane.xlu1 %733 }
 0x346   : > { %3558 = vrcp.f32 %v734_v52  ;;  %v354_v52 = vld [vmem:[%s4305_s4 + $0x18] sm:$0xff] }
 0x349   : > { %v568_v53 = vpop.permute.xlu1 %567 }
 0x34a   : > { %3309 = vmatpush3.msk.msra.mxu1 %vm573_vm4, %v568_v53 }
 0x34b   : > { %3318 = vmatprep.subr.mxu1 %v3657_v2 }
 0x34f   : > { %v3557_v54 = vpop.eup %3556 }
 0x350   : > { %v565_v55 = vmul.f32 %v3557_v54, %v3553_v47 }
 0x352   : > { %3311 = vmatmul.mubr.msk.f32.vlgmr.msra.gmra.mxu1 %vm569_vm5, %v565_v55  ;;  %v1446_v55 = vsub.s32 3, %v3783_v4 }
 0x353   : > { %v3559_v57 = vpop.eup %3558  ;;  %3319 = vmatpush3.msk.msra.mxu1 %vm573_vm4, %v738_v56  ;;  %3320 = vmatprep.mubr.msk.f32.mxu1 %vm3658_vm0, %v3657_v2 }
 0x354   : > { %v736_v58 = vmul.f32 %v3559_v57, %v3555_v49  ;;  %3328 = vmatprep.subr.mxu1 %v3657_v2  ;;  %v1447_v56 = vrot.slane %v3793_v6, %v1446_v55 }
 0x356   : > { %3321 = vmatmul.mubr.msk.f32.vlgmr.msra.gmra.mxu1 %vm569_vm5, %v736_v58 }
 0x357   : > { %3330 = vmatprep.mubr.msk.f32.mxu1 %vm3658_vm0, %v3657_v2  ;;  %3329 = vmatpush3.msra.mxu1 %v351_v59 }
 0x358   : > { %3338 = vmatprep.subr.mxu1 %v3657_v2 }
 0x412   : > { %v642_v61 = vpop.f32.mrf.mxu1 }
 0x413   : > { %3331 = vmatmul.mubr.msk.f32.vlgmr.msra.gmra.mxu1 %vm470_vm2, %v642_v61 }
 0x414   : > { %v3312_v63 = vpop.f32.mrf.mxu1  ;;  %3340 = vmatprep.mubr.msk.f32.mxu1 %vm3658_vm0, %v3657_v2 }
 0x416   : > { %v810_v0 = vpop.f32.mrf.mxu1 }
 0x417   : > { %3326 = vmatmul.mubr.msk.f32.vlgmr.msra.gmra.mxu0 %vm470_vm2, %v810_v0 }
 0x418   : > { %3334 = vmatpush3.xpose.msk.msra.mxu0 %vm470_vm2, %v963_v62  ;;  %v3322_v1 = vpop.f32.mrf.mxu1  ;;  %3335 = vmatprep.mubr.msk.f32.mxu0 %vm3658_vm0, %v3657_v2 }
 0x419   : > { %3343 = vmatprep.subr.mxu0 %v3657_v2 }
 0x41b   : > { %3336 = vmatmul.mubr.msk.f32.vlgmr.msra.gmra.mxu0 %vm470_vm2, %v961_v3 }
 0x41c   : > { %3345 = vmatprep.mubr.msk.f32.mxu0 %vm3658_vm0, %v3657_v2  ;;  %3344 = vmatpush3.msra.mxu0 %v353_v31  ;;  %v360_v31 = vld [vmem:[%s4307_s6 + $0x8] sm:$0xff] }
 0x41d   : > { %3353 = vmatprep.subr.mxu0 %v3657_v2 }
 0x4d3   : > { %v956_v5 = vpop.f32.mrf.mxu1 }
 0x4d5   : > { %v3332_v7 = vpop.f32.mrf.mxu1 }
 0x4d6   : > { %v358_v7 = vld [vmem:[%s4306_s5 + $0x18] sm:$0xff] }
 0x4d7   : > { %v883_v9 = vpop.f32.mrf.mxu0 }
 0x4d8   : > { %v957_v10 = vadd.f32 %v956_v5, %v883_v9  ;;  %v357_v9 = vld [vmem:[%s4306_s5 + $0x10] sm:$0xff] }
 0x4d9   : > { %v3327_v11 = vpop.f32.mrf.mxu0 }
 0x4da   : > { %v366_v11 = vld [vmem:[%s4307_s6 + $0x38] sm:$0xff] }
 0x4db   : > { %v1034_v14 = vpop.f32.mrf.mxu0 }
 0x4dc   : > { %v1038_v15 = vmul.f32 0.35355338, %v1034_v14  ;;  %v365_v14 = vld [vmem:[%s4307_s6 + $0x30] sm:$0xff] }
 0x4dd   : > { %v3337_v16 = vpop.f32.mrf.mxu0 }
 0x4de   : > { %v1039_v18 = vadd.f32 %v1038_v15, %v3855_v26  ;;  %v364_v15 = vld [vmem:[%s4307_s6 + $0x28] sm:$0xff]  ;;  %v363_v16 = vld [vmem:[%s4307_s6 + $0x20] sm:$0xff] }
 0x4e0   : > { %v1040_v20 = vsel %vm554_vm3, %v1039_v18, -inf }
 0x4e1   : > { %1041 = vmax.xlane.f32.xlu1 %v1040_v20 }
 0x4f2   : > { %1204 = vrot.lane.b32.xlu1 %v3826_v17, %s4312_s24  ;;  %s4313_s24 = smov 40  }
 0x4f6   : > { %1202 = vrot.lane.b32.xlu1 %v3832_v19, %s4314_s26 }
 0x56a   : > { %v1042_v21 = vpop.xlane.xlu1 %1041 }
 0x56b   : > { %v1043_v22 = vsub.f32 %v1039_v18, %v1042_v21  ;;  %v362_v18 = vld [vmem:[%s4307_s6 + $0x18] sm:$0xff] }
 0x56d   : > { %v1044_v23 = vmul.f32 1.442695, %v1043_v22 }
 0x56e   : > { %v1205_v19 = vpop.permute.xlu1 %1204 }
 0x56f   : > { %3560 = vpow2.f32 %v1044_v23  ;;  %v1467_v23 = vsub.s32 4, %v3783_v4 }
 0x572   : > { %v1203_v30 = vpop.permute.xlu1 %1202 }
 0x57c   : > { %v3561_v24 = vpop.eup %3560 }
 0x57d   : > { %v1046_v25 = vsel %vm554_vm3, %v3561_v24, 0.0 }
 0x57e   : > { %1047 = vadd.xlane.f32.xlu0 %v1046_v25  ;;  %v1468_v25 = vrot.slane %v3793_v6, %v1467_v23 }
 0x594   : > { %1051 = vrot.lane.b32.xlu0 %v3866_v46, %s4315_s16 }
 0x607   : > { %v1048_v27 = vpop.xlane.xlu0 %1047 }
 0x608   : > { %3562 = vrcp.f32 %v1048_v27 }
 0x60b   : > { %v1052_v28 = vpop.permute.xlu0 %1051 }
 0x60c   : > { %3339 = vmatpush3.msk.msra.mxu1 %vm573_vm4, %v1052_v28 }
 0x60d   : > { %3348 = vmatprep.subr.mxu1 %v3657_v2 }
 0x615   : > { %v3563_v17 = vpop.eup %3562 }
 0x616   : > { %v1050_v29 = vmul.f32 %v3563_v17, %v3561_v24  ;;  %v1472_v24 = vsub.s32 5, %v3783_v4 }
 0x618   : > { %3341 = vmatmul.mubr.msk.f32.vlgmr.msra.gmra.mxu1 %vm569_vm5, %v1050_v29  ;;  %v1473_v17 = vrot.slane %v3793_v6, %v1472_v24 }
 0x619   : > { %3349 = vmatpush3.xpose.msk.msra.mxu1 %vm470_vm2, %v1205_v19  ;;  %3350 = vmatprep.mubr.msk.f32.mxu1 %vm3658_vm0, %v3657_v2 }
 0x61a   : > { %3358 = vmatprep.subr.mxu1 %v3657_v2 }
 0x61c   : > { %3351 = vmatmul.mubr.msk.f32.vlgmr.msra.gmra.mxu1 %vm470_vm2, %v1203_v30  ;;  %v361_v30 = vld [vmem:[%s4307_s6 + $0x10] sm:$0xff] }
 0x61d   : > { %3360 = vmatprep.mubr.msk.f32.mxu1 %vm3658_vm0, %v3657_v2  ;;  %3359 = vmatpush3.msra.mxu1 %v354_v52  ;;  %v3153_v52 = vld [vmem:[%s4304_s3 + $0x30] sm:$0xff] }
 0x61e   : > { %3374 = vmatprep.subr.mxu1 %v3657_v2 }
 0x6d8   : > { %v1124_v32 = vpop.f32.mrf.mxu1 }
 0x6d9   : > { %3346 = vmatmul.mubr.msk.f32.vlgmr.msra.gmra.mxu0 %vm470_vm2, %v1124_v32  ;;  %v359_v32 = vld [vmem:[%s4307_s6] sm:$0xff] }
 0x6da   : > { %v3342_v33 = vpop.f32.mrf.mxu1  ;;  %3355 = vmatprep.mubr.msk.f32.mxu0 %vm3658_vm0, %v3657_v2 }
 0x6db   : > { %v3147_v33 = vld [vmem:[%s4309_s8] ss:$0 sm:$0xff] }
 0x6dc   : > { %v1276_v34 = vpop.f32.mrf.mxu1 }
 0x6dd   : > { %v1280_v35 = vmul.f32 0.35355338, %v1276_v34 }
 0x6de   : > { %v3352_v36 = vpop.f32.mrf.mxu1 }
 0x6df   : > { %v1281_v38 = vadd.f32 %v1280_v35, %v3855_v26 }
 0x6e1   : > { %v1282_v39 = vsel %vm554_vm3, %v1281_v38, -inf }
 0x6e2   : > { %1283 = vmax.xlane.f32.xlu0 %v1282_v39  ;;  %v1557_v39 = vsub.s32 6, %v3783_v4 }
 0x6f8   : > { %1293 = vrot.lane.b32.xlu0 %v3866_v46, %s4313_s24 }
 0x76b   : > { %v1284_v40 = vpop.xlane.xlu0 %1283 }
 0x76c   : > { %v1285_v41 = vsub.f32 %v1281_v38, %v1284_v40  ;;  %v1558_v40 = vrot.slane %v3793_v6, %v1557_v39 }
 0x76e   : > { %v1286_v42 = vmul.f32 1.442695, %v1285_v41 }
 0x76f   : > { %v1294_v43 = vpop.permute.xlu0 %1293 }
 0x770   : > { %3564 = vpow2.f32 %v1286_v42  ;;  %3354 = vmatpush3.msk.msra.mxu0 %vm573_vm4, %v1294_v43 }
 0x771   : > { %3363 = vmatprep.subr.mxu0 %v3657_v2 }
 0x77d   : > { %v3565_v44 = vpop.eup %3564 }
 0x77e   : > { %v1288_v45 = vsel %vm554_vm3, %v3565_v44, 0.0 }
 0x77f   : > { %1289 = vadd.xlane.f32.xlu1 %v1288_v45 }
 0x799   : > { %v1197_v47 = vpop.f32.mrf.mxu0 }
 0x79a   : > { %v1201_v48 = vadd.f32 %v1197_v47, %v957_v10  ;;  %v355_v10 = vld [vmem:[%s4306_s5] sm:$0xff] }
 0x79b   : > { %v3347_v49 = vpop.f32.mrf.mxu0 }
 0x808   : > { %v1290_v50 = vpop.xlane.xlu1 %1289 }
 0x809   : > { %3566 = vrcp.f32 %v1290_v50 }
 0x816   : > { %v3567_v51 = vpop.eup %3566 }
 0x817   : > { %v1292_v46 = vmul.f32 %v3567_v51, %v3565_v44 }
 0x819   : > { %3356 = vmatmul.mubr.msk.f32.vlgmr.msra.gmra.mxu0 %vm569_vm5, %v1292_v46  ;;  %v3154_v46 = vld [vmem:[%s4304_s3 + $0x38] sm:$0xff] }
 0x81a   : > { %3371 = vmatprep.mubr.msk.f32.mxu0 %vm3658_vm0, %v3657_v2  ;;  %3364 = vmatpush3.msra.mxu0 %v358_v7 }
 0x81b   : > { %3365 = vmatprep.subr.mxu0 %v3657_v2 }
 0x81c   : > { %3366 = vmatpush3.msra.mxu0 %v357_v9 }
 0x81d   : > { %3367 = vmatprep.subr.mxu0 %v3657_v2 }
 0x8d9   : > { %v1366_v53 = vpop.f32.mrf.mxu0 }
 0x8da   : > { %3361 = vmatmul.mubr.msk.f32.vlgmr.msra.gmra.mxu1 %vm470_vm2, %v1366_v53  ;;  %v3152_v53 = vld [vmem:[%s4304_s3 + $0x28] sm:$0xff] }
 0x8db   : > { %v3357_v54 = vpop.f32.mrf.mxu0  ;;  %3390 = vmatprep.mubr.msk.f32.mxu1 %vm3658_vm0, %v3657_v2  ;;  %3375 = vmatpush3.msra.mxu1 %v366_v11 }
 0x8dc   : > { %3376 = vmatprep.subr.mxu1 %v3657_v2  ;;  %v3151_v54 = vld [vmem:[%s4304_s3 + $0x20] sm:$0xff] }
 0x8dd   : > { %3377 = vmatpush3.msra.mxu1 %v365_v14 }
 0x8de   : > { %3378 = vmatprep.subr.mxu1 %v3657_v2 }
 0x8df   : > { %3379 = vmatpush3.msra.mxu1 %v364_v15 }
 0x8e0   : > { %3380 = vmatprep.subr.mxu1 %v3657_v2 }
 0x8e1   : > { %3381 = vmatpush3.msra.mxu1 %v363_v16 }
 0x8e2   : > { %3382 = vmatprep.subr.mxu1 %v3657_v2 }
 0x8e3   : > { %3383 = vmatpush3.msra.mxu1 %v362_v18 }
 0x8e4   : > { %3384 = vmatprep.subr.mxu1 %v3657_v2 }
 0x8e5   : > { %3385 = vmatpush3.msra.mxu1 %v361_v30 }
 0x8e6   : > { %3386 = vmatprep.subr.mxu1 %v3657_v2 }
 0x8e7   : > { %3387 = vmatpush3.msra.mxu1 %v360_v31 }
 0x8e8   : > { %3388 = vmatprep.subr.mxu1 %v3657_v2 }
 0x8e9   : > { %3389 = vmatpush3.msra.mxu1 %v359_v32 }
 0x8ea   : > { %3409 = vmatprep.subr.mxu1 %v3657_v2 }
 0x99a   : > { %v1439_v57 = vpop.f32.mrf.mxu1 }
 0x99b   : > { %v1443_v58 = vadd.f32 %v1439_v57, %v1201_v48 }
 0x99c   : > { %v3362_v59 = vpop.f32.mrf.mxu1 }
 0x99d   : > { %v1448_v60 = vadd.f32 %v1447_v56, %v1443_v58  ;;  %v4046_v56 = vld [vmem:[%s4308_s7 + $0x10] sm:$0xff] }
 0x99e   : > { %v1767_v57 = vrot.slane %v4046_v56, %v451_v8  ;;  %v3150_v8 = vld [vmem:[%s4308_s7 + $0x8] ss:$0 sm:$0xff] }
 0x99f   : > { %v1449_v61 = vadd.f32 %v1448_v60, %v3813_v12  ;;  %v356_v12 = vld [vmem:[%s4306_s5 + $0x8] sm:$0xff] }
 0x9a0   : > { %3368 = vmatpush3.msra.mxu0 %v356_v12  ;;  %v1762_v12 = vrot.slane %v4046_v56, %v3822_v13 }
 0x9a1   : > { %v1451_v62 = vsel %vm1450_vm6, %v1449_v61, 0.0  ;;  %3369 = vmatprep.subr.mxu0 %v3657_v2 }
 0x9a2   : > { %1452 = vadd.xlane.f32.xlu1 %v1451_v62  ;;  %3370 = vmatpush3.msra.mxu0 %v355_v10 }
 0x9a3   : > { %3393 = vmatprep.subr.mxu0 %v3657_v2 }
 0xa2b   : > { %v1453_v63 = vpop.xlane.xlu1 %1452 }
 0xa2c   : > { %v1455_v0 = vmul.f32 0.03125, %v1453_v63 }
 0xa2e   : > { %v1456_v1 = vsub.f32 %v1449_v61, %v1455_v0  ;;  %v1649_v61 = vsub.s32 7, %v3783_v4 }
 0xa30   : > { %v1457_v3 = vmul.f32 %v1456_v1, %v1456_v1  ;;  %v1650_v62 = vrot.slane %v3793_v6, %v1649_v61 }
 0xa32   : > { %v1458_v5 = vsel %vm1450_vm6, %v1457_v3, 0.0 }
 0xa33   : > { %1459 = vadd.xlane.f32.xlu1 %v1458_v5 }
 0xabc   : > { %v1460_v20 = vpop.xlane.xlu1 %1459 }
 0xabd   : > { %v1461_v21 = vmul.f32 0.03125, %v1460_v20 }
 0xabf   : > { %v1462_v22 = vadd.f32 1e-05, %v1461_v21 }
 0xac1   : > { %3568 = vrsqrt.f32 %v1462_v22 }
 0xace   : > { %v3569_v27 = vpop.eup %3568 }
 0xacf   : > { %v1464_v28 = vmul.f32 %v3569_v27, %v1456_v1 }
 0xad1   : > { %v1469_v19 = vmul.f32 %v1468_v25, %v1464_v28 }
 0xad3   : > { %v1474_v29 = vadd.f32 %v1473_v17, %v1469_v19  ;;  %v1776_v19 = vrot.slane %v4046_v56, %v460_v37 }
 0xad5   : > { %3372 = vmatmul.mubr.msk.f32.vlgmr.msra.gmra.mxu0 %vm370_vm1, %v1474_v29 }
 0xad6   : > { %3401 = vmatprep.mubr.msk.f32.mxu0 %vm3658_vm0, %v3657_v2  ;;  %3394 = vmatpush3.msra.mxu0 %v3154_v46  ;;  %v3156_v46 = vld [vmem:[%s4305_s4 + $0x28] sm:$0xff] }
 0xad7   : > { %3395 = vmatprep.subr.mxu0 %v3657_v2 }
 0xad8   : > { %3396 = vmatpush3.msra.mxu0 %v3153_v52 }
 0xad9   : > { %3397 = vmatprep.subr.mxu0 %v3657_v2 }
 0xada   : > { %3398 = vmatpush3.msra.mxu0 %v3152_v53 }
 0xadb   : > { %3399 = vmatprep.subr.mxu0 %v3657_v2 }
 0xadc   : > { %3400 = vmatpush3.msra.mxu0 %v3151_v54 }
 0xadd   : > { %3404 = vmatprep.subr.mxu0 %v3657_v2 }
 0xb95   : > { %v1550_v34 = vpop.f32.mrf.mxu0 }
 0xb96   : > { %v1551_v35 = vadd.f32 %v3147_v33, %v1550_v34 }
 0xb97   : > { %v3373_v36 = vpop.f32.mrf.mxu0 }
 0xb98   : > { %v1554_v38 = vmax.f32 %v1551_v35, 0.0 }
 0xb9a   : > { %3391 = vmatmul.mubr.msk.f32.vlgmr.msra.gmra.mxu1 %vm1559_vm7, %v1554_v38 }
 0xb9b   : > { %3411 = vmatprep.mubr.msk.f32.mxu1 %vm3658_vm0, %v3657_v2 }
 0xc5a   : > { %v1629_v41 = vpop.f32.mrf.mxu1 }
 0xc5b   : > { %v1630_v42 = vadd.f32 %v1629_v41, %v1558_v40 }
 0xc5c   : > { %v3392_v43 = vpop.f32.mrf.mxu1 }
 0xc5d   : > { %v1633_v44 = vadd.f32 %v1630_v42, %v1474_v29 }
 0xc5f   : > { %v1634_v45 = vsel %vm1450_vm6, %v1633_v44, 0.0 }
 0xc60   : > { %1635 = vadd.xlane.f32.xlu1 %v1634_v45 }
 0xce9   : > { %v1636_v47 = vpop.xlane.xlu1 %1635 }
 0xcea   : > { %v1637_v48 = vmul.f32 0.03125, %v1636_v47 }
 0xcec   : > { %v1638_v49 = vsub.f32 %v1633_v44, %v1637_v48 }
 0xcee   : > { %v1639_v50 = vmul.f32 %v1638_v49, %v1638_v49 }
 0xcf0   : > { %v1640_v51 = vsel %vm1450_vm6, %v1639_v50, 0.0 }
 0xcf1   : > { %1641 = vadd.xlane.f32.xlu1 %v1640_v51  ;;  %v3155_v51 = vld [vmem:[%s4305_s4 + $0x20] sm:$0xff] }
 0xd02   : > { %1769 = vrot.lane.b32.xlu1 %v1767_v57, %s3659_s27  ;;  %s4323_s27 = smov 120  }
 0xd7a   : > { %v1642_v58 = vpop.xlane.xlu1 %1641 }
 0xd7b   : > { %v1643_v59 = vmul.f32 0.03125, %v1642_v58 }
 0xd7d   : > { %v1644_v60 = vadd.f32 1e-05, %v1643_v59 }
 0xd7e   : > { %v1770_v5 = vpop.permute.xlu1 %1769 }
 0xd7f   : > { %3570 = vrsqrt.f32 %v1644_v60 }
 0xd8c   : > { %v3571_v63 = vpop.eup %3570 }
 0xd8d   : > { %v1646_v0 = vmul.f32 %v3571_v63, %v1638_v49 }
 0xd8f   : > { %v1651_v1 = vmul.f32 %v1650_v62, %v1646_v0 }
 0xd91   : > { %v4060_v3 = vadd.f32 %v3150_v8, %v1651_v1 }
 0xd93   : > { %3402 = vmatmul.mubr.msk.f32.vlgmr.msra.gmra.mxu0 %vm370_vm1, %v4060_v3 }
 0xd94   : > { %3406 = vmatprep.mubr.msk.f32.mxu0 %vm3658_vm0, %v3657_v2 }
 0xe53   : > { %v1755_v7 = vpop.f32.mrf.mxu0 }
 0xe54   : > { %v4066_v9 = vadd.f32 %v1770_v5, %v1755_v7  ;;  %v4074_v10 = vadd.f32 %v1762_v12, %v1755_v7 }
 0xe55   : > { %v3403_v6 = vpop.f32.mrf.mxu0 }
 0xe56   : > { %1783 = vrot.lane.b32.xlu0 %v4066_v9, %s3661_s29  ;;  %s4325_s29 = smov 56  }
 0xe5a   : > { %1953 = vrot.lane.b32.xlu0 %v4066_v9, %s3660_s28  ;;  %s4324_s28 = smov 64  }
 0xe5e   : > { %1951 = vrot.lane.b32.xlu0 %v4074_v10, %s4323_s27  ;;  %s4330_s27 = smov 72  }
 0xec8   : > { %v1784_v11 = vpop.permute.xlu0 %1783 }
 0xec9   : > { %3405 = vmatpush3.xpose.msk.msra.mxu0 %vm470_vm2, %v1784_v11 }
 0xeca   : > { %3414 = vmatprep.subr.mxu0 %v3657_v2 }
 0xecc   : > { %v1954_v14 = vpop.permute.xlu0 %1953  ;;  %3407 = vmatmul.mubr.msk.f32.vlgmr.msra.gmra.mxu0 %vm470_vm2, %v4074_v10 }
 0xecd   : > { %3415 = vmatpush3.xpose.msk.msra.mxu0 %vm470_vm2, %v1954_v14  ;;  %3416 = vmatprep.mubr.msk.f32.mxu0 %vm3658_vm0, %v3657_v2 }
 0xece   : > { %3424 = vmatprep.subr.mxu0 %v3657_v2 }
 0xed0   : > { %v1952_v13 = vpop.permute.xlu0 %1951 }
 0xed1   : > { %3417 = vmatmul.mubr.msk.f32.vlgmr.msra.gmra.mxu0 %vm470_vm2, %v1952_v13 }
 0xed2   : > { %3426 = vmatprep.mubr.msk.f32.mxu0 %vm3658_vm0, %v3657_v2  ;;  %3425 = vmatpush3.msra.mxu0 %v3156_v46 }
 0xed3   : > { %3434 = vmatprep.subr.mxu0 %v3657_v2 }
 0xf8c   : > { %v1856_v15 = vpop.f32.mrf.mxu0 }
 0xf8d   : > { %v1860_v16 = vmul.f32 0.35355338, %v1856_v15 }
 0xf8e   : > { %v3408_v18 = vpop.f32.mrf.mxu0 }
 0xf8f   : > { %v1861_v20 = vadd.f32 %v1860_v16, %v3855_v26 }
 0xf91   : > { %v2025_v21 = vpop.f32.mrf.mxu0  ;;  %v1862_v22 = vsel %vm554_vm3, %v1861_v20, -inf }
 0xf92   : > { %v2029_v25 = vmul.f32 0.35355338, %v2025_v21  ;;  %1863 = vmax.xlane.f32.xlu0 %v1862_v22 }
 0xf93   : > { %v3418_v27 = vpop.f32.mrf.mxu0 }
 0xf94   : > { %v2030_v28 = vadd.f32 %v2029_v25, %v3855_v26 }
 0xf96   : > { %v2031_v17 = vsel %vm554_vm3, %v2030_v28, -inf }
 0xf97   : > { %2032 = vmax.xlane.f32.xlu1 %v2031_v17 }
 0xfa8   : > { %1778 = vrot.lane.b32.xlu0 %v1776_v19, %s4324_s28 }
0x101b   : > { %v1864_v29 = vpop.xlane.xlu0 %1863 }
0x101c   : > { %v1865_v30 = vsub.f32 %v1861_v20, %v1864_v29 }
0x101e   : > { %v1866_v31 = vmul.f32 1.442695, %v1865_v30 }
0x101f   : > { %v1779_v32 = vpop.permute.xlu0 %1778 }
0x1020   : > { %3572 = vpow2.f32 %v1866_v31  ;;  %v4097_v33 = vadd.f32 %v1779_v32, %v1755_v7  ;;  %v2033_v34 = vpop.xlane.xlu1 %2032 }
0x1021   : > { %v2034_v35 = vsub.f32 %v2030_v28, %v2033_v34 }
0x1022   : > { %2042 = vrot.lane.b32.xlu0 %v4097_v33, %s4325_s29 }
0x1023   : > { %v2035_v36 = vmul.f32 1.442695, %v2034_v35 }
0x1025   : > { %3574 = vpow2.f32 %v2035_v36 }
0x1026   : > { %2267 = vrot.lane.b32.xlu0 %v4066_v9, %s4326_s25  ;;  %s4331_s25 = smov 40  }
0x102a   : > { %2265 = vrot.lane.b32.xlu0 %v4074_v10, %s4327_s23 }
0x102d   : > { %v3573_v37 = vpop.eup %3572 }
0x102e   : > { %v1868_v38 = vsel %vm554_vm3, %v3573_v37, 0.0 }
0x102f   : > { %1869 = vadd.xlane.f32.xlu1 %v1868_v38 }
0x1032   : > { %v3575_v40 = vpop.eup %3574 }
0x1033   : > { %v2037_v41 = vsel %vm554_vm3, %v3575_v40, 0.0 }
0x1034   : > { %2038 = vadd.xlane.f32.xlu1 %v2037_v41 }
0x1045   : > { %1874 = vrot.lane.b32.xlu1 %v4097_v33, %s4324_s28  ;;  %s3201_s28 = sshll.u32 %s3743_s13, 4  ;;  %s3671_s13 = smov [#allocation2]  }
0x1046   : > { %s4266_s26 = scalar_lea.hbm %s4310_s9, %s3201_s28 }
0x1094   : > { %v2043_v48 = vpop.permute.xlu0 %2042 }
0x1098   : > { %v2268_v54 = vpop.permute.xlu0 %2267 }
0x109c   : > { %v2266_v59 = vpop.permute.xlu0 %2265 }
0x10b8   : > { %v1870_v42 = vpop.xlane.xlu1 %1869 }
0x10b9   : > { %3576 = vrcp.f32 %v1870_v42 }
0x10bd   : > { %v2039_v43 = vpop.xlane.xlu1 %2038 }
0x10be   : > { %3578 = vrcp.f32 %v2039_v43 }
0x10c1   : > { %v1875_v44 = vpop.permute.xlu1 %1874 }
0x10c2   : > { %3410 = vmatpush3.msk.msra.mxu1 %vm573_vm4, %v1875_v44 }
0x10c3   : > { %3419 = vmatprep.subr.mxu1 %v3657_v2 }
0x10c6   : > { %v3577_v45 = vpop.eup %3576 }
0x10c7   : > { %v1872_v47 = vmul.f32 %v3577_v45, %v3573_v37 }
0x10c9   : > { %3412 = vmatmul.mubr.msk.f32.vlgmr.msra.gmra.mxu1 %vm569_vm5, %v1872_v47 }
0x10ca   : > { %3420 = vmatpush3.msk.msra.mxu1 %vm573_vm4, %v2043_v48  ;;  %3421 = vmatprep.mubr.msk.f32.mxu1 %vm3658_vm0, %v3657_v2  ;;  %v2752_v48 = vrot.slane %v4046_v56, %v1446_v55  ;;  %v3162_v55 = vld [vmem:[%s4306_s5 + $0x38] sm:$0xff] }
0x10cb   : > { %v3579_v49 = vpop.eup %3578  ;;  %3429 = vmatprep.subr.mxu1 %v3657_v2 }
0x10cc   : > { %v2041_v50 = vmul.f32 %v3579_v49, %v3575_v40 }
0x10ce   : > { %3422 = vmatmul.mubr.msk.f32.vlgmr.msra.gmra.mxu1 %vm569_vm5, %v2041_v50 }
0x10cf   : > { %3431 = vmatprep.mubr.msk.f32.mxu1 %vm3658_vm0, %v3657_v2  ;;  %3430 = vmatpush3.msra.mxu1 %v3155_v51 }
0x10d0   : > { %3439 = vmatprep.subr.mxu1 %v3657_v2 }
0x1189   : > { %v1947_v52 = vpop.f32.mrf.mxu1 }
0x118a   : > { %3432 = vmatmul.mubr.msk.f32.vlgmr.msra.gmra.mxu1 %vm470_vm2, %v1947_v52 }
0x118b   : > { %v3413_v53 = vpop.f32.mrf.mxu1  ;;  %3441 = vmatprep.mubr.msk.f32.mxu1 %vm3658_vm0, %v3657_v2 }
0x118e   : > { %v2115_v57 = vpop.f32.mrf.mxu1 }
0x118f   : > { %3427 = vmatmul.mubr.msk.f32.vlgmr.msra.gmra.mxu0 %vm470_vm2, %v2115_v57 }
0x1190   : > { %3435 = vmatpush3.xpose.msk.msra.mxu0 %vm470_vm2, %v2268_v54  ;;  %v3423_v58 = vpop.f32.mrf.mxu1  ;;  %3436 = vmatprep.mubr.msk.f32.mxu0 %vm3658_vm0, %v3657_v2 }
0x1191   : > { %3444 = vmatprep.subr.mxu0 %v3657_v2 }
0x1193   : > { %3437 = vmatmul.mubr.msk.f32.vlgmr.msra.gmra.mxu0 %vm470_vm2, %v2266_v59 }
0x1194   : > { %3446 = vmatprep.mubr.msk.f32.mxu0 %vm3658_vm0, %v3657_v2 }
0x124a   : > { %v2261_v60 = vpop.f32.mrf.mxu1 }
0x124c   : > { %v3433_v62 = vpop.f32.mrf.mxu1 }
0x124d   : > { %v3161_v62 = vld [vmem:[%s4306_s5 + $0x30] sm:$0xff] }
0x124f   : > { %v2188_v63 = vpop.f32.mrf.mxu0 }
0x1250   : > { %v2262_v0 = vadd.f32 %v2261_v60, %v2188_v63  ;;  %v3159_v63 = vld [vmem:[%s4306_s5 + $0x20] sm:$0xff] }
0x1251   : > { %v3428_v8 = vpop.f32.mrf.mxu0 }
0x1252   : > { %v3169_v8 = vld [vmem:[%s4307_s6 + $0x70] sm:$0xff] }
0x1253   : > { %v2339_v1 = vpop.f32.mrf.mxu0 }
0x1254   : > { %v2343_v5 = vmul.f32 0.35355338, %v2339_v1  ;;  %v3168_v1 = vld [vmem:[%s4307_s6 + $0x68] sm:$0xff] }
0x1255   : > { %v3438_v7 = vpop.f32.mrf.mxu0 }
0x1256   : > { %v2344_v6 = vadd.f32 %v2343_v5, %v3855_v26  ;;  %v3167_v5 = vld [vmem:[%s4307_s6 + $0x60] sm:$0xff]  ;;  %v3166_v7 = vld [vmem:[%s4307_s6 + $0x58] sm:$0xff] }
0x1258   : > { %v2345_v12 = vsel %vm554_vm3, %v2344_v6, -inf }
0x1259   : > { %2346 = vmax.xlane.f32.xlu0 %v2345_v12 }
0x126f   : > { %2356 = vrot.lane.b32.xlu0 %v4097_v33, %s4328_s22  ;;  %s3599_s22 = sshll.u32 %s3671_s13, 4  ;;  %s3600_s22 = int_to_ptr.vmem [resolvable:$false] %s3599_s22 }
0x1273   : > { %2507 = vrot.lane.b32.xlu0 %v4074_v10, %s4329_s14  ;;  %s3601_s14 = scalar_lea.vmem %s3600_s22, 32 }
0x12e2   : > { %v2347_v11 = vpop.xlane.xlu0 %2346 }
0x12e3   : > { %v2348_v14 = vsub.f32 %v2344_v6, %v2347_v11 }
0x12e5   : > { %v2349_v13 = vmul.f32 1.442695, %v2348_v14  ;;  %v2771_v14 = vrot.slane %v4046_v56, %v1467_v23  ;;  %v3164_v23 = vld [vmem:[%s4307_s6 + $0x48] sm:$0xff] }
0x12e6   : > { %v2357_v15 = vpop.permute.xlu0 %2356 }
0x12e7   : > { %3580 = vpow2.f32 %v2349_v13  ;;  %3440 = vmatpush3.msk.msra.mxu1 %vm573_vm4, %v2357_v15 }
0x12e8   : > { %3449 = vmatprep.subr.mxu1 %v3657_v2 }
0x12ea   : > { %v2508_v25 = vpop.permute.xlu0 %2507 }
0x12f4   : > { %v3581_v16 = vpop.eup %3580 }
0x12f5   : > { %v2351_v18 = vsel %vm554_vm3, %v3581_v16, 0.0 }
0x12f6   : > { %2352 = vadd.xlane.f32.xlu1 %v2351_v18 }
0x1307   : > { %2509 = vrot.lane.b32.xlu1 %v4066_v9, %s4330_s27  ;;  %v3157_v9 = vld [vmem:[%s4305_s4 + $0x30] sm:$0xff] }
0x1308   : > { %3445 = vmatpush3.msra.mxu0 %v3157_v9 }
0x1309   : > { %3454 = vmatprep.subr.mxu0 %v3657_v2 }
0x137f   : > { %v2353_v20 = vpop.xlane.xlu1 %2352 }
0x1380   : > { %3582 = vrcp.f32 %v2353_v20 }
0x1383   : > { %v2510_v22 = vpop.permute.xlu1 %2509 }
0x138d   : > { %v3583_v21 = vpop.eup %3582 }
0x138e   : > { %v2355_v10 = vmul.f32 %v3583_v21, %v3581_v16  ;;  %v2776_v16 = vrot.slane %v4046_v56, %v1472_v24  ;;  %v3165_v21 = vld [vmem:[%s4307_s6 + $0x50] sm:$0xff]  ;;  %v3163_v24 = vld [vmem:[%s4307_s6 + $0x40] sm:$0xff] }
0x1390   : > { %3442 = vmatmul.mubr.msk.f32.vlgmr.msra.gmra.mxu1 %vm569_vm5, %v2355_v10  ;;  %v3195_v10 = vld [vmem:[%s4309_s8 + $0x1] ss:$0 sm:$0xff] }
0x1391   : > { %3450 = vmatpush3.xpose.msk.msra.mxu1 %vm470_vm2, %v2510_v22  ;;  %3451 = vmatprep.mubr.msk.f32.mxu1 %vm3658_vm0, %v3657_v2 }
0x1392   : > { %3459 = vmatprep.subr.mxu1 %v3657_v2 }
0x1394   : > { %3452 = vmatmul.mubr.msk.f32.vlgmr.msra.gmra.mxu1 %vm470_vm2, %v2508_v25 }
0x1395   : > { %3461 = vmatprep.mubr.msk.f32.mxu1 %vm3658_vm0, %v3657_v2 }
0x1450   : > { %v2429_v27 = vpop.f32.mrf.mxu1 }
0x1451   : > { %3447 = vmatmul.mubr.msk.f32.vlgmr.msra.gmra.mxu0 %vm470_vm2, %v2429_v27 }
0x1452   : > { %v3443_v28 = vpop.f32.mrf.mxu1  ;;  %3456 = vmatprep.mubr.msk.f32.mxu0 %vm3658_vm0, %v3657_v2 }
0x1453   : > { %v2861_v28 = vrot.slane %v4046_v56, %v1557_v39 }
0x1454   : > { %v2581_v17 = vpop.f32.mrf.mxu1 }
0x1455   : > { %v2585_v19 = vmul.f32 0.35355338, %v2581_v17 }
0x1456   : > { %v3453_v29 = vpop.f32.mrf.mxu1 }
0x1457   : > { %v2586_v30 = vadd.f32 %v2585_v19, %v3855_v26 }
0x1459   : > { %v2587_v31 = vsel %vm554_vm3, %v2586_v30, -inf }
0x145a   : > { %2588 = vmax.xlane.f32.xlu1 %v2587_v31 }
0x14e3   : > { %v2589_v32 = vpop.xlane.xlu1 %2588 }
0x14e4   : > { %v2590_v34 = vsub.f32 %v2586_v30, %v2589_v32 }
0x14e6   : > { %v2591_v35 = vmul.f32 1.442695, %v2590_v34 }
0x14e8   : > { %3584 = vpow2.f32 %v2591_v35 }
0x14f5   : > { %v3585_v36 = vpop.eup %3584 }
0x14f6   : > { %v2593_v37 = vsel %vm554_vm3, %v3585_v36, 0.0 }
0x14f7   : > { %2594 = vadd.xlane.f32.xlu0 %v2593_v37  ;;  %v3594_v37 = vld [vmem:[%s3851_s21] sm:$0x1]  ;;  %s332_s21 = sand.u32 1, %s3647_s10  }
0x14f8   : > { %s333_s29 = scalar_lea.vmem [#allocation2], %s332_s21  ;;  %s3045_s16 = scalar_lea.sflag [#allocation3], %s332_s21 }
0x150d   : > { %2598 = vrot.lane.b32.xlu0 %v4097_v33, %s4331_s25  ;;  %v3158_v33 = vld [vmem:[%s4305_s4 + $0x38] sm:$0xff]  ;;  %s3057_s25 = sshll.u32 %s333_s29, 4  ;;  %s3058_s25 = int_to_ptr.vmem [resolvable:$true] %s3057_s25 }
0x150e   : > { %3460 = vmatpush3.msra.mxu1 %v3158_v33  ;;  %s3595_s17 = scalar_lea.vmem %s3058_s25, 16  ;;  %p3602_p0 = scmp.lt.s32.totalorder %s3058_s25, %s3600_s22 }
0x150f   : > { %3475 = vmatprep.subr.mxu1 %v3657_v2  ;;  %p3596_p11 = scmp.ne.s32.totalorder %s3058_s25, %s3595_s17  ;;  %p3603_p1 = scmp.lt.s32.totalorder %s3601_s14, %s3595_s17 }
0x1511   : > { %v2502_v38 = vpop.f32.mrf.mxu0  ;;  %p3597_p12 = pnand %p3596_p11, %p3760_p5  ;;  %p3604_p2 = por %p3603_p1, %p3602_p0 }
0x1512   : > { %v2506_v40 = vadd.f32 %v2502_v38, %v2262_v0  ;;  %v3170_v0 = vld [vmem:[%s4307_s6 + $0x78] sm:$0xff]  ;;  %v3036_v38 = vsel %vm3035_vm8, %v3594_v37, 0.0 }
0x1513   : > { %v3448_v41 = vpop.f32.mrf.mxu0  ;;  %p3598_p13 = pneg %p3597_p12 }
0x1515   : > { %p3605_p3 = pnand %p3604_p2, %p3598_p13 }
0x1580   : > { %v2595_v42 = vpop.xlane.xlu0 %2594 }
0x1581   : > { %3586 = vrcp.f32 %v2595_v42  ;;  %v2952_v42 = vrot.slane %v4046_v56, %v1649_v61 }
0x1584   : > { %v2599_v26 = vpop.permute.xlu0 %2598 }
0x1585   : > { %3455 = vmatpush3.msk.msra.mxu0 %vm573_vm4, %v2599_v26 }
0x1586   : > { %3464 = vmatprep.subr.mxu0 %v3657_v2 }
0x158e   : > { %v3587_v43 = vpop.eup %3586 }
0x158f   : > { %v2597_v44 = vmul.f32 %v3587_v43, %v3585_v36 }
0x1591   : > { %3457 = vmatmul.mubr.msk.f32.vlgmr.msra.gmra.mxu0 %vm569_vm5, %v2597_v44  ;;  %v3198_v44 = vld [vmem:[%s4308_s7 + $0x18] ss:$0 sm:$0xff] }
0x1592   : > { %3472 = vmatprep.mubr.msk.f32.mxu0 %vm3658_vm0, %v3657_v2  ;;  %3465 = vmatpush3.msra.mxu0 %v3162_v55 }
0x1593   : > { %3466 = vmatprep.subr.mxu0 %v3657_v2 }
0x1594   : > { %3467 = vmatpush3.msra.mxu0 %v3161_v62 }
0x1595   : > { %3468 = vmatprep.subr.mxu0 %v3657_v2 }
0x1651   : > { %v2671_v45 = vpop.f32.mrf.mxu0 }
0x1652   : > { %3462 = vmatmul.mubr.msk.f32.vlgmr.msra.gmra.mxu1 %vm470_vm2, %v2671_v45 }
0x1653   : > { %v3458_v47 = vpop.f32.mrf.mxu0  ;;  %3491 = vmatprep.mubr.msk.f32.mxu1 %vm3658_vm0, %v3657_v2  ;;  %3476 = vmatpush3.msra.mxu1 %v3170_v0 }
0x1654   : > { %3477 = vmatprep.subr.mxu1 %v3657_v2 }
0x1655   : > { %3478 = vmatpush3.msra.mxu1 %v3169_v8 }
0x1656   : > { %3479 = vmatprep.subr.mxu1 %v3657_v2 }
0x1657   : > { %3480 = vmatpush3.msra.mxu1 %v3168_v1 }
0x1658   : > { %3481 = vmatprep.subr.mxu1 %v3657_v2 }
0x1659   : > { %3482 = vmatpush3.msra.mxu1 %v3167_v5 }
0x165a   : > { %3483 = vmatprep.subr.mxu1 %v3657_v2 }
0x165b   : > { %3484 = vmatpush3.msra.mxu1 %v3166_v7 }
0x165c   : > { %3485 = vmatprep.subr.mxu1 %v3657_v2 }
0x165d   : > { %3486 = vmatpush3.msra.mxu1 %v3165_v21 }
0x165e   : > { %3487 = vmatprep.subr.mxu1 %v3657_v2 }
0x165f   : > { %3488 = vmatpush3.msra.mxu1 %v3164_v23 }
0x1660   : > { %3489 = vmatprep.subr.mxu1 %v3657_v2 }
0x1661   : > { %3490 = vmatpush3.msra.mxu1 %v3163_v24 }
0x1712   : > { %v2744_v49 = vpop.f32.mrf.mxu1 }
0x1713   : > { %v2748_v50 = vadd.f32 %v2744_v49, %v2506_v40 }
0x1714   : > { %v3463_v51 = vpop.f32.mrf.mxu1 }
0x1715   : > { %v2753_v46 = vadd.f32 %v2752_v48, %v2748_v50 }
0x1717   : > { %v2754_v52 = vadd.f32 %v2753_v46, %v4060_v3  ;;  %v3160_v3 = vld [vmem:[%s4306_s5 + $0x28] sm:$0xff] }
0x1718   : > { %3469 = vmatpush3.msra.mxu0 %v3160_v3 }
0x1719   : > { %v2755_v53 = vsel %vm1450_vm6, %v2754_v52, 0.0  ;;  %3470 = vmatprep.subr.mxu0 %v3657_v2 }
0x171a   : > { %2756 = vadd.xlane.f32.xlu1 %v2755_v53  ;;  %3471 = vmatpush3.msra.mxu0 %v3159_v63 }
0x171b   : > { %3494 = vmatprep.subr.mxu0 %v3657_v2 }
0x17a3   : > { %v2757_v54 = vpop.xlane.xlu1 %2756 }
0x17a4   : > { %v2758_v57 = vmul.f32 0.03125, %v2757_v54 }
0x17a6   : > { %v2759_v58 = vsub.f32 %v2754_v52, %v2758_v57 }
0x17a8   : > { %v2760_v59 = vmul.f32 %v2759_v58, %v2759_v58 }
0x17aa   : > { %v2761_v60 = vsel %vm1450_vm6, %v2760_v59, 0.0 }
0x17ab   : > { %2762 = vadd.xlane.f32.xlu1 %v2761_v60 }
0x1834   : > { %v2763_v6 = vpop.xlane.xlu1 %2762 }
0x1835   : > { %v2764_v12 = vmul.f32 0.03125, %v2763_v6 }
0x1837   : > { %v2765_v11 = vadd.f32 1e-05, %v2764_v12 }
0x1839   : > { %3588 = vrsqrt.f32 %v2765_v11 }
0x1846   : > { %v3589_v13 = vpop.eup %3588 }
0x1847   : > { %v2767_v15 = vmul.f32 %v3589_v13, %v2759_v58 }
0x1849   : > { %v2772_v18 = vmul.f32 %v2771_v14, %v2767_v15 }
0x184b   : > { %v2777_v20 = vadd.f32 %v2776_v16, %v2772_v18 }
0x184d   : > { %3473 = vmatmul.mubr.msk.f32.vlgmr.msra.gmra.mxu0 %vm370_vm1, %v2777_v20 }
0x184e   : > { %3496 = vmatprep.mubr.msk.f32.mxu0 %vm3658_vm0, %v3657_v2 }
0x190d   : > { %v2853_v22 = vpop.f32.mrf.mxu0 }
0x190e   : > { %v2854_v25 = vadd.f32 %v3195_v10, %v2853_v22 }
0x190f   : > { %v3474_v9 = vpop.f32.mrf.mxu0 }
0x1910   : > { %v2857_v27 = vmax.f32 %v2854_v25, 0.0 }
0x1912   : > { %3492 = vmatmul.mubr.msk.f32.vlgmr.msra.gmra.mxu1 %vm1559_vm7, %v2857_v27 }
0x19d2   : > { %v2931_v17 = vpop.f32.mrf.mxu1 }
0x19d3   : > { %v2932_v19 = vadd.f32 %v2931_v17, %v2861_v28 }
0x19d4   : > { %v3493_v29 = vpop.f32.mrf.mxu1 }
0x19d5   : > { %v2935_v2 = vadd.f32 %v2932_v19, %v2777_v20 }
0x19d7   : > { %v2936_v30 = vsel %vm1450_vm6, %v2935_v2, 0.0 }
0x19d8   : > { %2937 = vadd.xlane.f32.xlu1 %v2936_v30 }
0x1a61   : > { %v2938_v31 = vpop.xlane.xlu1 %2937 }
0x1a62   : > { %v2939_v32 = vmul.f32 0.03125, %v2938_v31 }
0x1a64   : > { %v2940_v34 = vsub.f32 %v2935_v2, %v2939_v32 }
0x1a66   : > { %v2941_v35 = vmul.f32 %v2940_v34, %v2940_v34 }
0x1a68   : > { %v2942_v36 = vsel %vm1450_vm6, %v2941_v35, 0.0 }
0x1a69   : > { %2943 = vadd.xlane.f32.xlu1 %v2942_v36 }
0x1a6d   : > { %3037 = vadd.xlane.f32.xlu1 %v3036_v38 }
0x1af2   : > { %v2944_v39 = vpop.xlane.xlu1 %2943 }
0x1af3   : > { %v2945_v40 = vmul.f32 0.03125, %v2944_v39 }
0x1af5   : > { %v2946_v41 = vadd.f32 1e-05, %v2945_v40 }
0x1af6   : > { %v3038_v47 = vpop.xlane.xlu1 %3037 }
0x1af7   : > { %3590 = vrsqrt.f32 %v2946_v41  ;;  %v3039_v48 = vmax.f32 %v3038_v47, 1.0 }
0x1af9   : > { %3592 = vrcp.f32 %v3039_v48 }
0x1b04   : > { %v3591_v26 = vpop.eup %3590 }
0x1b05   : > { %v2948_v43 = vmul.f32 %v3591_v26, %v2940_v34 }
0x1b06   : > { %v3593_v4 = vpop.eup %3592 }
0x1b07   : > { %v2953_v33 = vmul.f32 %v2952_v42, %v2948_v43 }
0x1b09   : > { %v2958_v45 = vadd.f32 %v3198_v44, %v2953_v33 }
0x1b0b   : > { %3495 = vmatpush3.msk.msra.mxu0 %vm573_vm4, %v2958_v45 }
0x1b0c   : > { %3497 = vmatmul.mubr.msk.f32.vlgmr.msra.gmra.mxu0 %vm569_vm5, %v3594_v37 }
0x1bcc   : > { %v3031_v56 = vpop.f32.mrf.mxu0 }
0x1bcd   : > { %v3041_v61 = vmul.f32 %v3593_v4, %v3031_v56 }
0x1bce   : > { %v3498_v49 = vpop.f32.mrf.mxu0 }
0x1bcf   : > { %3043 = vst.msk [vmem:[%s333_s29] sm:$0x1] %vm3042_vm9, %v3041_v61 }
0x1bd0   : > { %3608 = shalt.err (!%p3605_p3)
}
0x1bd1   : > { %s3609_s27 = scalar_lea.hbm %s4266_s26, 16  ;;  %s3613_s29 = scalar_lea.hbm %s4310_s9, 32 }
0x1bd2   : > { %p3610_p4 = scmp.ne.s32.totalorder %s4266_s26, %s3609_s27  ;;  %p3614_p9 = scmp.lt.s32.totalorder %s4266_s26, %s4310_s9 }
0x1bd3   : > { %p3615_p10 = scmp.lt.s32.totalorder %s3613_s29, %s3609_s27 }
0x1bd4   : > { %p3611_p7 = pnand %p3610_p4, %p3760_p5 }
0x1bd5   : > { %p3616_p11 = por %p3615_p10, %p3614_p9 }
0x1bd6   : > { %p3612_p8 = pneg %p3611_p7 }
0x1bd8   : > { %p3617_p12 = pnand %p3616_p11, %p3612_p8 }
0x1bda   : > { %3620 = shalt.err (!%p3617_p12)
}
0x1bdb   : > { %3499 = dma.vmem_to_hbm [thread:$0]  (%p3760_p5), %s3058_s25, 16, %s4266_s26, %s3045_s16  }
0x1bdc PF: > { %p3505_p13 = scmp.ge.s32.totalorder %s3655_s12, 2  ;;  %s3069_s17 = sand.u32 1, %s3643_s30  }
0x1bdd   : > { %s3070_s13 = scalar_lea.sflag [#allocation3], %s3069_s17 }
0x1bde   : > { %p3502_p0 = pnand %p3505_p13, %p3764_p6 }
0x1be0   : > { %p3503_p1 = pneg %p3502_p0 }
0x1be2   : > { %3638 = dma.done.wait (%p3503_p1), %s3070_s13, 16  }
0x1be3   : > { %3640 = vsyncadd (%p3503_p1), %s3070_s13, 4294967280  ;;  %p19_p2 = scmp.ge.s32.totalorder %s3747_s15, 4   ;;  %s4332_s30 = smov %s3647_s10 }
0x1be4   : > { %s4333_s10 = smov %s3651_s11  ;;  %s4334_s11 = smov %s3758_s18 }
0x1be5   : > { %s4335_s12 = smov %s3747_s15  ;;  %21 = sbr.rel (!%p19_p2) target bundleno = 3 (0x3), region = 100 }
0x1bea   :  { %3074 = vsyncpa [#allocation3], 1 }
0x1beb   :  { %3076 = vsyncpa [#allocation3 + $0x1], 1 }

// kernel: spatial_encoder_forward.2
= control target key start
LH: loop header
LB: loop body
LE: loop exit
PB: predicated region body
PF: predicated region fallthrough
CT: control target
= control target key end

     0   :  { %s5458_s30 = smov 0   ;;  %s6108_s0 = inlined_call_operand.vmem [shape: f32[4,8,32], index: 0, kind: input, shape index: {}]   ;;  %s6109_s1 = inlined_call_operand.vmem [shape: f32[4,1,8], index: 1, kind: input, shape index: {}]   ;;  %s6110_s2 = inlined_call_operand.vmem [shape: f32[8,32], index: 2, kind: input, shape index: {}]   ;;  %s6111_s3 = inlined_call_operand.vmem [shape: f32[2,32,96], index: 3, kind: input, shape index: {}]   ;;  %s6112_s4 = inlined_call_operand.vmem [shape: f32[2,32,32], index: 4, kind: input, shape index: {}]   ;;  %s6113_s5 = inlined_call_operand.vmem [shape: f32[2,32,64], index: 5, kind: input, shape index: {}]   ;;  %s6114_s6 = inlined_call_operand.vmem [shape: f32[2,64,32], index: 6, kind: input, shape index: {}]   ;;  %s6115_s7 = inlined_call_operand.vmem [shape: f32[2,9,32], index: 7, kind: input, shape index: {}]   ;;  %s6116_s8 = inlined_call_operand.vmem [shape: f32[2,1,64], index: 8, kind: input, shape index: {}]   ;;  %s6117_s9 = inlined_call_operand.vmem [shape: f32[2,2,32], index: 9, kind: output, shape index: {}]  }
   0x1 LB: > { %s5464_s10 = sadd.s32 4294967295, %s5392_s30   ;;  %p4738_p0 = scmp.ge.s32.totalorder %s5392_s30, 1  ;;  %s5392_s30 = sphi %s5458_s30, %s19_s30  }
   0x2   : > { %p298_p1 = scmp.lt.s32.totalorder %s5392_s30, 3 }
   0x4   : > { %p299_p2 = pnand %p4738_p0, %p298_p1 }
   0x5   : > { %s4739_s15 = sshll.u32 (!%p299_p2), %s5464_s10, 1  ;;  %s5394_s28 = smov (!%p299_p2), 32  }
   0x6   : > { %302 = sbr.rel (%p299_p2) target bundleno = 8610 (0x21a2), region = 56  ;;  %p338_p3 = scmp.lt.s32.totalorder (!%p299_p2), %s4739_s15, 3 }
   0x7   : > { %s5397_s29 = smov (!%p299_p2), 96   ;;  %s5398_s14 = smov (!%p299_p2), 64  }
   0x8   : > { %s5400_s16 = smov (!%p299_p2), 120   ;;  %s5401_s17 = smov (!%p299_p2), 56  }
   0x9   : > { %s5402_s18 = smov (!%p299_p2), 80   ;;  %s5403_s19 = smov (!%p299_p2), 112  }
   0xa   : > { %s5404_s24 = smov (!%p299_p2), 48   ;;  %s5405_s25 = smov (!%p299_p2), 72  }
   0xb   : > { %v366_v0 = vld [vmem:[%s6111_s3 + $0x18] sm:$0xff]  ;;  %v365_v1 = vld [vmem:[%s6111_s3 + $0x10] sm:$0xff]  ;;  %v468_v2 = vlaneseq  ;;  %v364_v3 = vld [vmem:[%s6111_s3 + $0x8] sm:$0xff]  ;;  %s6125_s15 = smov (!%p338_p3, %s4739_s15), 3  ;;  %vm386_vm0 = vcmask 261120   ;;  %v5395_v14 = vmov 0.0  }
   0xc   : > { %4986 = vmatprep.subr.mxu0 %v366_v0  ;;  %v5485_v5 = vld [vmem:[%s6115_s7] sm:$0xff]  ;;  %s4740_s22 = sshll.u32 %s6125_s15, 3  ;;  %4997 = vmatprep.subr.mxu1 %v5395_v14  ;;  %vm5396_vm1 = vmmov 0   ;;  %vm497_vm2 = vcmask 64512   ;;  %s5549_s13 = scalar_lea.vmem %s6109_s1, %s6125_s15  ;;  %vm2313_vm3 = vcmask 523264   ;;  %vm4643_vm4 = vcmask 57344  }
   0xd   : > { %4987 = vmatpush3.msra.mxu0 %v366_v0  ;;  %v5478_v4 = vshrl.u32 %v468_v2, 7  ;;  %v363_v6 = vld [vmem:[%s6111_s3] sm:$0xff]  ;;  %s341_s27 = scalar_lea.vmem %s6108_s0, %s4740_s22  ;;  %4999 = vmatprep.mubr.msk.f32.mxu1 %vm5396_vm1, %v5395_v14  ;;  %s5399_s15 = smov 88   ;;  %vm4667_vm5 = vcmask 1041409   ;;  %vm4670_vm6 = vcmask 254976  }
   0xe   : > { %4988 = vmatprep.subr.mxu0 %v365_v1  ;;  %v360_v8 = vld [vmem:[%s6110_s2] sm:$0xff]  ;;  %v359_v11 = vld [vmem:[%s341_s27 + $0x8] sm:$0xff]  ;;  %s6120_s26 = smov 104   ;;  %s6118_s12 = smov 40  }
   0xf   : > { %4989 = vmatpush3.msra.mxu0 %v365_v1  ;;  %v476_v7 = vsub.s32 1, %v5478_v4  ;;  %v358_v10 = vld [vmem:[%s341_s27] sm:$0xff]  ;;  %v5503_v13 = vadd.f32 %v360_v8, %v359_v11  ;;  %v5525_v20 = vsub.s32 0, %v5478_v4  ;;  %v486_v44 = vsub.s32 2, %v5478_v4  ;;  %p348_p4 = scmp.lt.s32.totalorder %s5464_s10, 1 }
  0x10   : > { %4990 = vmatprep.subr.mxu0 %v364_v3  ;;  %v5501_v12 = vadd.f32 %v360_v8, %v358_v10  ;;  %v352_v26 = vld [vmem:[%s5549_s13] sm:$0x1]  ;;  %v353_v28 = vld [vmem:[%s5549_s13 + $0x1] sm:$0x1] }
  0x11   : > { %4991 = vmatpush3.msra.mxu0 %v364_v3  ;;  %v477_v9 = vrot.slane %v5485_v5, %v476_v7  ;;  %v471_v21 = vrot.slane %v5485_v5, %v5525_v20  ;;  %v354_v27 = vsub.f32 1.0, %v352_v26  ;;  %v355_v29 = vsub.f32 1.0, %v353_v28  ;;  %s6127_s10 = smov (!%p348_p4, %s5464_s10), 1 }
  0x12   : > { %4992 = vmatprep.subr.mxu0 %v363_v6  ;;  %4994 = vmatprep.mubr.msk.f32.mxu0 %vm386_vm0, %v5501_v12  ;;  %v487_v45 = vrot.slane %v5485_v5, %v486_v44 }
  0x13   : > { %4993 = vmatpush3.msra.mxu0 %v363_v6  ;;  %479 = vrot.lane.b32.xlu0 %v477_v9, %s5394_s28  ;;  %v356_v30 = vmul.f32 -1e+09, %v354_v27  ;;  %v357_v31 = vmul.f32 -1e+09, %v355_v29 }
  0x14   : > { %4995 = vmatmul.mubr.msk.f32.vlgmr.msra.gmra.mxu0 %vm386_vm0, %v5503_v13  ;;  %5007 = vmatprep.subr.mxu0 %v5395_v14 }
  0x15   : > { %5009 = vmatprep.mubr.msk.f32.mxu0 %vm5396_vm1, %v5395_v14  ;;  %v5554_v32 = vrot.slane %v356_v30, %v5525_v20  ;;  %v5557_v36 = vrot.slane %v357_v31, %v5525_v20 }
  0x85   : > { %v480_v15 = vpop.permute.xlu0 %479 }
  0xd4   : > { %v4996_v16 = vpop.f32.mrf.mxu0 }
  0xd5   : > { %v5516_v17 = vadd.f32 %v4996_v16, %v480_v15  ;;  %v5538_v25 = vadd.f32 %v4996_v16, %v471_v21 }
  0xd6   : > { %v459_v18 = vpop.f32.mrf.mxu0 }
  0xd7   : > { %v5518_v19 = vadd.f32 %v480_v15, %v459_v18  ;;  %574 = vrot.lane.b32.xlu1 %v5516_v17, %s5397_s29  ;;  %v5530_v23 = vadd.f32 %v471_v21, %v459_v18 }
  0xd9   : > { %495 = vrot.lane.b32.xlu0 %v5518_v19, %s5397_s29 }
 0x149   : > { %v575_v24 = vpop.permute.xlu1 %574 }
 0x14b   : > { %v496_v22 = vpop.permute.xlu0 %495 }
 0x14c   : > { %4998 = vmatpush3.xpose.msk.msra.mxu1 %vm497_vm2, %v496_v22 }
 0x14d   : > { %5002 = vmatprep.subr.mxu1 %v5395_v14 }
 0x14f   : > { %5000 = vmatmul.mubr.msk.f32.vlgmr.msra.gmra.mxu1 %vm497_vm2, %v5530_v23 }
 0x150   : > { %5003 = vmatpush3.xpose.msk.msra.mxu1 %vm497_vm2, %v575_v24  ;;  %5004 = vmatprep.mubr.msk.f32.mxu1 %vm5396_vm1, %v5395_v14 }
 0x151   : > { %5012 = vmatprep.subr.mxu1 %v5395_v14 }
 0x153   : > { %5005 = vmatmul.mubr.msk.f32.vlgmr.msra.gmra.mxu1 %vm497_vm2, %v5538_v25 }
 0x154   : > { %5014 = vmatprep.mubr.msk.f32.mxu1 %vm5396_vm1, %v5395_v14 }
 0x20f   : > { %v569_v33 = vpop.f32.mrf.mxu1 }
 0x210   : > { %v651_v34 = vmul.f32 0.35355338, %v569_v33 }
 0x211   : > { %v5001_v35 = vpop.f32.mrf.mxu1 }
 0x212   : > { %v665_v37 = vadd.f32 %v5554_v32, %v651_v34 }
 0x213   : > { %v647_v38 = vpop.f32.mrf.mxu1 }
 0x214   : > { %v652_v39 = vmul.f32 0.35355338, %v647_v38  ;;  %v667_v40 = vsel %vm497_vm2, %v665_v37, -inf }
 0x215   : > { %668 = vmax.xlane.f32.xlu1 %v667_v40  ;;  %v5006_v41 = vpop.f32.mrf.mxu1 }
 0x216   : > { %v666_v42 = vadd.f32 %v5557_v36, %v652_v39 }
 0x218   : > { %v670_v43 = vsel %vm497_vm2, %v666_v42, -inf }
 0x219   : > { %671 = vmax.xlane.f32.xlu0 %v670_v43 }
 0x22f   : > { %489 = vrot.lane.b32.xlu0 %v487_v45, %s5398_s14 }
 0x29e   : > { %v669_v50 = vpop.xlane.xlu1 %668 }
 0x29f   : > { %v673_v51 = vsub.f32 %v665_v37, %v669_v50  ;;  %v367_v50 = vld [vmem:[%s6112_s4] sm:$0xff] }
 0x2a1   : > { %v675_v52 = vmul.f32 1.442695, %v673_v51 }
 0x2a2   : > { %v672_v46 = vpop.xlane.xlu0 %671 }
 0x2a3   : > { %v674_v53 = vsub.f32 %v666_v42, %v672_v46  ;;  %5300 = vpow2.f32 %v675_v52 }
 0x2a5   : > { %v677_v54 = vmul.f32 1.442695, %v674_v53 }
 0x2a6   : > { %v490_v47 = vpop.permute.xlu0 %489 }
 0x2a7   : > { %v5568_v48 = vadd.f32 %v490_v47, %v459_v18  ;;  %v5570_v49 = vadd.f32 %v4996_v16, %v490_v47  ;;  %5302 = vpow2.f32 %v677_v54 }
 0x2a9   : > { %767 = vrot.lane.b32.xlu0 %v5570_v49, %s5398_s14  ;;  %690 = vrot.lane.b32.xlu1 %v5568_v48, %s5398_s14 }
 0x2ad   : > { %845 = vrot.lane.b32.xlu0 %v5518_v19, %s5399_s15  ;;  %923 = vrot.lane.b32.xlu1 %v5516_v17, %s5399_s15 }
 0x2b0   : > { %v5301_v55 = vpop.eup %5300 }
 0x2b1   : > { %843 = vrot.lane.b32.xlu0 %v5530_v23, %s5400_s16  ;;  %v679_v56 = vsel %vm497_vm2, %v5301_v55, 0.0 }
 0x2b4   : > { %v5303_v57 = vpop.eup %5302 }
 0x2b5   : > { %v682_v58 = vsel %vm497_vm2, %v5303_v57, 0.0 }
 0x2d1   : > { %680 = vadd.xlane.f32.xlu1 %v679_v56 }
 0x2d5   : > { %683 = vadd.xlane.f32.xlu1 %v682_v58 }
 0x2e6   : > { %921 = vrot.lane.b32.xlu1 %v5538_v25, %s5400_s16 }
 0x31b   : > { %v768_v59 = vpop.permute.xlu0 %767  ;;  %v691_v60 = vpop.permute.xlu1 %690 }
 0x31c   : > { %5008 = vmatpush3.msra.mxu0 %v691_v60  ;;  %5013 = vmatpush3.msra.mxu1 %v768_v59  ;;  %v368_v59 = vld [vmem:[%s6112_s4 + $0x8] sm:$0xff] }
 0x31d   : > { %5017 = vmatprep.subr.mxu0 %v5395_v14  ;;  %5022 = vmatprep.subr.mxu1 %v5395_v14 }
 0x31f   : > { %v924_v61 = vpop.permute.xlu1 %923  ;;  %v846_v1 = vpop.permute.xlu0 %845 }
 0x323   : > { %v844_v8 = vpop.permute.xlu0 %843 }
 0x35a   : > { %v681_v62 = vpop.xlane.xlu1 %680 }
 0x35b   : > { %5304 = vrcp.f32 %v681_v62 }
 0x35e   : > { %v684_v63 = vpop.xlane.xlu1 %683 }
 0x35f   : > { %5306 = vrcp.f32 %v684_v63 }
 0x362   : > { %v922_v9 = vpop.permute.xlu1 %921 }
 0x368   : > { %v5305_v0 = vpop.eup %5304 }
 0x369   : > { %v687_v2 = vmul.f32 %v5305_v0, %v5301_v55 }
 0x36b   : > { %5010 = vmatmul.mubr.msk.f32.vlgmr.msra.gmra.mxu0 %vm497_vm2, %v687_v2 }
 0x36c   : > { %v5307_v3 = vpop.eup %5306  ;;  %5018 = vmatpush3.xpose.msk.msra.mxu0 %vm497_vm2, %v846_v1  ;;  %5019 = vmatprep.mubr.msk.f32.mxu0 %vm5396_vm1, %v5395_v14 }
 0x36d   : > { %v688_v6 = vmul.f32 %v5307_v3, %v5303_v57  ;;  %5027 = vmatprep.subr.mxu0 %v5395_v14 }
 0x36f   : > { %5015 = vmatmul.mubr.msk.f32.vlgmr.msra.gmra.mxu1 %vm497_vm2, %v688_v6  ;;  %5020 = vmatmul.mubr.msk.f32.vlgmr.msra.gmra.mxu0 %vm497_vm2, %v844_v8 }
 0x370   : > { %5023 = vmatpush3.xpose.msk.msra.mxu1 %vm497_vm2, %v924_v61  ;;  %5024 = vmatprep.mubr.msk.f32.mxu1 %vm5396_vm1, %v5395_v14 }
 0x371   : > { %5032 = vmatprep.subr.mxu1 %v5395_v14  ;;  %5029 = vmatprep.mubr.msk.f32.mxu0 %vm5396_vm1, %v5395_v14 }
 0x373   : > { %5025 = vmatmul.mubr.msk.f32.vlgmr.msra.gmra.mxu1 %vm497_vm2, %v922_v9 }
 0x374   : > { %5034 = vmatprep.mubr.msk.f32.mxu1 %vm5396_vm1, %v5395_v14 }
 0x42b   : > { %v762_v10 = vpop.f32.mrf.mxu0 }
 0x42d   : > { %v5011_v11 = vpop.f32.mrf.mxu0 }
 0x42f   : > { %v839_v15 = vpop.f32.mrf.mxu1  ;;  %v917_v16 = vpop.f32.mrf.mxu0 }
 0x430   : > { %v999_v18 = vmul.f32 0.35355338, %v917_v16 }
 0x431   : > { %v5016_v21 = vpop.f32.mrf.mxu1  ;;  %v5021_v22 = vpop.f32.mrf.mxu0 }
 0x432   : > { %v1001_v24 = vadd.f32 %v999_v18, %v5554_v32 }
 0x433   : > { %v995_v26 = vpop.f32.mrf.mxu1 }
 0x434   : > { %v1000_v27 = vmul.f32 0.35355338, %v995_v26  ;;  %v1003_v28 = vsel %vm497_vm2, %v1001_v24, -inf }
 0x435   : > { %1004 = vmax.xlane.f32.xlu0 %v1003_v28  ;;  %v5026_v29 = vpop.f32.mrf.mxu1 }
 0x436   : > { %v1002_v30 = vadd.f32 %v1000_v27, %v5557_v36 }
 0x438   : > { %v1006_v31 = vsel %vm497_vm2, %v1002_v30, -inf }
 0x439   : > { %1007 = vmax.xlane.f32.xlu1 %v1006_v31 }
 0x44a   : > { %1025 = vrot.lane.b32.xlu1 %v5568_v48, %s5401_s17 }
 0x44e   : > { %1341 = vrot.lane.b32.xlu1 %v5518_v19, %s5402_s18 }
 0x452   : > { %1419 = vrot.lane.b32.xlu1 %v5516_v17, %s5402_s18 }
 0x456   : > { %1417 = vrot.lane.b32.xlu1 %v5538_v25, %s5403_s19 }
 0x4be   : > { %v1005_v33 = vpop.xlane.xlu0 %1004 }
 0x4bf   : > { %v1009_v34 = vsub.f32 %v1001_v24, %v1005_v33 }
 0x4c1   : > { %v1011_v35 = vmul.f32 1.442695, %v1009_v34 }
 0x4c2   : > { %v1008_v37 = vpop.xlane.xlu1 %1007 }
 0x4c3   : > { %5308 = vpow2.f32 %v1011_v35  ;;  %v1010_v38 = vsub.f32 %v1002_v30, %v1008_v37 }
 0x4c5   : > { %v1013_v39 = vmul.f32 1.442695, %v1010_v38 }
 0x4c6   : > { %v1026_v40 = vpop.permute.xlu1 %1025 }
 0x4c7   : > { %5310 = vpow2.f32 %v1013_v39  ;;  %5028 = vmatpush3.msra.mxu0 %v1026_v40 }
 0x4c8   : > { %5037 = vmatprep.subr.mxu0 %v368_v59 }
 0x4ca   : > { %v1342_v54 = vpop.permute.xlu1 %1341 }
 0x4ce   : > { %v1420_v57 = vpop.permute.xlu1 %1419 }
 0x4d0   : > { %v5309_v41 = vpop.eup %5308 }
 0x4d1   : > { %v1015_v42 = vsel %vm497_vm2, %v5309_v41, 0.0 }
 0x4d2   : > { %1016 = vadd.xlane.f32.xlu0 %v1015_v42  ;;  %v1418_v58 = vpop.permute.xlu1 %1417 }
 0x4d4   : > { %v5311_v43 = vpop.eup %5310 }
 0x4d5   : > { %v1018_v45 = vsel %vm497_vm2, %v5311_v43, 0.0 }
 0x4d6   : > { %1019 = vadd.xlane.f32.xlu0 %v1018_v45  ;;  %v369_v45 = vld [vmem:[%s6112_s4 + $0x10] sm:$0xff] }
 0x4ec   : > { %1101 = vrot.lane.b32.xlu0 %v5570_v49, %s5401_s17 }
 0x4f0   : > { %1339 = vrot.lane.b32.xlu0 %v5530_v23, %s5403_s19 }
 0x55b   : > { %v1017_v46 = vpop.xlane.xlu0 %1016 }
 0x55c   : > { %5312 = vrcp.f32 %v1017_v46 }
 0x55f   : > { %v1020_v47 = vpop.xlane.xlu0 %1019 }
 0x560   : > { %5314 = vrcp.f32 %v1020_v47 }
 0x563   : > { %v1102_v51 = vpop.permute.xlu0 %1101 }
 0x564   : > { %5033 = vmatpush3.msra.mxu1 %v1102_v51 }
 0x565   : > { %5042 = vmatprep.subr.mxu1 %v367_v50 }
 0x567   : > { %v1340_v0 = vpop.permute.xlu0 %1339 }
 0x569   : > { %v5313_v52 = vpop.eup %5312 }
 0x56a   : > { %v1023_v53 = vmul.f32 %v5313_v52, %v5309_v41 }
 0x56c   : > { %5030 = vmatmul.mubr.msk.f32.vlgmr.msra.gmra.mxu0 %vm497_vm2, %v1023_v53 }
 0x56d   : > { %v5315_v55 = vpop.eup %5314  ;;  %5038 = vmatpush3.msra.mxu0 %v368_v59 }
 0x56e   : > { %v1024_v56 = vmul.f32 %v5315_v55, %v5311_v43  ;;  %5047 = vmatprep.subr.mxu0 %v5395_v14 }
 0x570   : > { %5035 = vmatmul.mubr.msk.f32.vlgmr.msra.gmra.mxu1 %vm497_vm2, %v1024_v56 }
 0x571   : > { %5044 = vmatprep.mubr.msk.f32.mxu1 %vm497_vm2, %v762_v10  ;;  %5043 = vmatpush3.msra.mxu1 %v367_v50 }
 0x572   : > { %5052 = vmatprep.subr.mxu1 %v5395_v14 }
 0x574   : > { %5045 = vmatmul.mubr.msk.f32.vlgmr.msra.gmra.mxu1 %vm497_vm2, %v839_v15 }
 0x575   : > { %5053 = vmatpush3.xpose.msk.msra.mxu1 %vm497_vm2, %v1420_v57  ;;  %5054 = vmatprep.mubr.msk.f32.mxu1 %vm5396_vm1, %v5395_v14 }
 0x576   : > { %5062 = vmatprep.subr.mxu1 %v5395_v14 }
 0x578   : > { %5055 = vmatmul.mubr.msk.f32.vlgmr.msra.gmra.mxu1 %vm497_vm2, %v1418_v58 }
 0x579   : > { %5064 = vmatprep.mubr.msk.f32.mxu1 %vm5396_vm1, %v5395_v14 }
 0x62c   : > { %v1097_v60 = vpop.f32.mrf.mxu0 }
 0x62d   : > { %5039 = vmatprep.mubr.msk.f32.mxu0 %vm497_vm2, %v1097_v60 }
 0x62e   : > { %v5031_v61 = vpop.f32.mrf.mxu0 }
 0x630   : > { %v1173_v62 = vpop.f32.mrf.mxu1 }
 0x631   : > { %5040 = vmatmul.mubr.msk.f32.vlgmr.msra.gmra.mxu0 %vm497_vm2, %v1173_v62 }
 0x632   : > { %5048 = vmatpush3.xpose.msk.msra.mxu0 %vm497_vm2, %v1342_v54  ;;  %v5036_v63 = vpop.f32.mrf.mxu1  ;;  %5049 = vmatprep.mubr.msk.f32.mxu0 %vm5396_vm1, %v5395_v14 }
 0x633   : > { %5057 = vmatprep.subr.mxu0 %v5395_v14 }
 0x634   : > { %v5647_v1 = vpop.f32.mrf.mxu1 }
 0x635   : > { %5050 = vmatmul.mubr.msk.f32.vlgmr.msra.gmra.mxu0 %vm497_vm2, %v1340_v0 }
 0x636   : > { %v5650_v2 = vpop.f32.mrf.mxu1  ;;  %5059 = vmatprep.mubr.msk.f32.mxu0 %vm5396_vm1, %v5395_v14 }
 0x638   : > { %v1491_v3 = vpop.f32.mrf.mxu1 }
 0x639   : > { %v1496_v6 = vmul.f32 0.35355338, %v1491_v3 }
 0x63a   : > { %v5056_v8 = vpop.f32.mrf.mxu1 }
 0x63b   : > { %v1498_v9 = vadd.f32 %v1496_v6, %v5557_v36 }
 0x63d   : > { %v1502_v10 = vsel %vm497_vm2, %v1498_v9, -inf }
 0x63e   : > { %1503 = vmax.xlane.f32.xlu1 %v1502_v10 }
 0x64f   : > { %1521 = vrot.lane.b32.xlu1 %v5568_v48, %s5404_s24 }
 0x653   : > { %1758 = vrot.lane.b32.xlu1 %v5518_v19, %s5405_s25 }
 0x657   : > { %1836 = vrot.lane.b32.xlu1 %v5516_v17, %s5405_s25 }
 0x65b   : > { %1834 = vrot.lane.b32.xlu1 %v5538_v25, %s6120_s26 }
 0x6c7   : > { %v1504_v11 = vpop.xlane.xlu1 %1503 }
 0x6c8   : > { %v1506_v16 = vsub.f32 %v1498_v9, %v1504_v11 }
 0x6ca   : > { %v1509_v18 = vmul.f32 1.442695, %v1506_v16 }
 0x6cb   : > { %v1522_v15 = vpop.permute.xlu1 %1521 }
 0x6cc   : > { %5058 = vmatpush3.msra.mxu0 %v1522_v15  ;;  %5316 = vpow2.f32 %v1509_v18 }
 0x6cd   : > { %5067 = vmatprep.subr.mxu0 %v369_v45 }
 0x6cf   : > { %v1759_v41 = vpop.permute.xlu1 %1758 }
 0x6d3   : > { %v1837_v55 = vpop.permute.xlu1 %1836 }
 0x6d7   : > { %v1835_v58 = vpop.permute.xlu1 %1834 }
 0x6d9   : > { %v5317_v28 = vpop.eup %5316 }
 0x6da   : > { %v1514_v25 = vsel %vm497_vm2, %v5317_v28, 0.0 }
 0x6f1   : > { %v5664_v21 = vpop.f32.mrf.mxu0 }
 0x6f2   : > { %v1336_v0 = vadd.f32 %v5647_v1, %v5664_v21 }
 0x6f3   : > { %v5666_v22 = vpop.f32.mrf.mxu0 }
 0x6f4   : > { %v1331_v6 = vadd.f32 %v5650_v2, %v5666_v22 }
 0x6f5   : > { %v1413_v24 = vpop.f32.mrf.mxu0 }
 0x6f6   : > { %v1495_v26 = vmul.f32 0.35355338, %v1413_v24 }
 0x6f7   : > { %v5051_v19 = vpop.f32.mrf.mxu0 }
 0x6f8   : > { %v1497_v27 = vadd.f32 %v1495_v26, %v5554_v32 }
 0x6fa   : > { %v1499_v17 = vsel %vm497_vm2, %v1497_v27, -inf }
 0x6fb   : > { %1500 = vmax.xlane.f32.xlu0 %v1499_v17 }
 0x6ff   : > { %1515 = vadd.xlane.f32.xlu0 %v1514_v25 }
 0x784   : > { %v1501_v29 = vpop.xlane.xlu0 %1500 }
 0x785   : > { %v1505_v30 = vsub.f32 %v1497_v27, %v1501_v29 }
 0x787   : > { %v1507_v31 = vmul.f32 1.442695, %v1505_v30 }
 0x788   : > { %v1516_v35 = vpop.xlane.xlu0 %1515 }
 0x789   : > { %5318 = vpow2.f32 %v1507_v31 }
 0x78a   : > { %5320 = vrcp.f32 %v1516_v35 }
 0x796   : > { %v5319_v33 = vpop.eup %5318 }
 0x797   : > { %v1511_v34 = vsel %vm497_vm2, %v5319_v33, 0.0  ;;  %v5321_v38 = vpop.eup %5320 }
 0x798   : > { %1512 = vadd.xlane.f32.xlu0 %v1511_v34  ;;  %v1520_v40 = vmul.f32 %v5321_v38, %v5317_v28 }
 0x7ae   : > { %1597 = vrot.lane.b32.xlu0 %v5570_v49, %s5404_s24 }
 0x7b2   : > { %1756 = vrot.lane.b32.xlu0 %v5530_v23, %s6120_s26 }
 0x821   : > { %v1513_v37 = vpop.xlane.xlu0 %1512 }
 0x822   : > { %5322 = vrcp.f32 %v1513_v37  ;;  %v2175_v37 = vsub.s32 3, %v5478_v4 }
 0x824   : > { %v2176_v38 = vrot.slane %v5485_v5, %v2175_v37 }
 0x825   : > { %v1598_v39 = vpop.permute.xlu0 %1597 }
 0x826   : > { %5063 = vmatpush3.msra.mxu1 %v1598_v39 }
 0x827   : > { %5065 = vmatmul.mubr.msk.f32.vlgmr.msra.gmra.mxu1 %vm497_vm2, %v1520_v40  ;;  %5072 = vmatprep.subr.mxu1 %v5395_v14 }
 0x828   : > { %5073 = vmatpush3.xpose.msk.msra.mxu1 %vm497_vm2, %v1759_v41  ;;  %5074 = vmatprep.mubr.msk.f32.mxu1 %vm5396_vm1, %v5395_v14 }
 0x829   : > { %v1757_v42 = vpop.permute.xlu0 %1756  ;;  %5082 = vmatprep.subr.mxu1 %v5395_v14 }
 0x82b   : > { %5075 = vmatmul.mubr.msk.f32.vlgmr.msra.gmra.mxu1 %vm497_vm2, %v1757_v42 }
 0x82c   : > { %5084 = vmatprep.mubr.msk.f32.mxu1 %vm5396_vm1, %v5395_v14 }
 0x82f   : > { %v5323_v23 = vpop.eup %5322 }
 0x830   : > { %v1519_v43 = vmul.f32 %v5323_v23, %v5319_v33 }
 0x832   : > { %5060 = vmatmul.mubr.msk.f32.vlgmr.msra.gmra.mxu0 %vm497_vm2, %v1519_v43 }
 0x833   : > { %5068 = vmatpush3.msra.mxu0 %v369_v45 }
 0x834   : > { %5077 = vmatprep.subr.mxu0 %v5395_v14 }
 0x8e7   : > { %v1669_v46 = vpop.f32.mrf.mxu1 }
 0x8e9   : > { %v5066_v47 = vpop.f32.mrf.mxu1 }
 0x8eb   : > { %v1830_v50 = vpop.f32.mrf.mxu1 }
 0x8ec   : > { %v1912_v51 = vmul.f32 0.35355338, %v1830_v50 }
 0x8ed   : > { %v5076_v52 = vpop.f32.mrf.mxu1 }
 0x8ee   : > { %v1914_v53 = vadd.f32 %v1912_v51, %v5554_v32 }
 0x8f0   : > { %v1916_v54 = vsel %vm497_vm2, %v1914_v53, -inf }
 0x8f1   : > { %1917 = vmax.xlane.f32.xlu0 %v1916_v54 }
 0x8f2   : > { %v1593_v56 = vpop.f32.mrf.mxu0 }
 0x8f3   : > { %5069 = vmatprep.mubr.msk.f32.mxu0 %vm497_vm2, %v1593_v56 }
 0x8f4   : > { %v5061_v57 = vpop.f32.mrf.mxu0  ;;  %5070 = vmatmul.mubr.msk.f32.vlgmr.msra.gmra.mxu0 %vm497_vm2, %v1669_v46 }
 0x8f5   : > { %5078 = vmatpush3.xpose.msk.msra.mxu0 %vm497_vm2, %v1837_v55  ;;  %5079 = vmatprep.mubr.msk.f32.mxu0 %vm5396_vm1, %v5395_v14 }
 0x8f6   : > { %5087 = vmatprep.subr.mxu0 %v5395_v14 }
 0x8f8   : > { %5080 = vmatmul.mubr.msk.f32.vlgmr.msra.gmra.mxu0 %vm497_vm2, %v1835_v58 }
 0x8f9   : > { %5089 = vmatprep.mubr.msk.f32.mxu0 %vm5396_vm1, %v5395_v14 }
 0x97a   : > { %v1918_v59 = vpop.xlane.xlu0 %1917 }
 0x97b   : > { %v1922_v60 = vsub.f32 %v1914_v53, %v1918_v59 }
 0x97d   : > { %v1924_v61 = vmul.f32 1.442695, %v1922_v60  ;;  %v373_v60 = vld [vmem:[%s6113_s5 + $0x10] sm:$0xff] }
 0x97f   : > { %5324 = vpow2.f32 %v1924_v61  ;;  %v372_v61 = vld [vmem:[%s6113_s5 + $0x8] sm:$0xff] }
 0x98c   : > { %v5325_v62 = vpop.eup %5324 }
 0x98d   : > { %v1928_v63 = vsel %vm497_vm2, %v5325_v62, 0.0 }
 0x98e   : > { %1929 = vadd.xlane.f32.xlu0 %v1928_v63  ;;  %v382_v63 = vld [vmem:[%s6114_s6 + $0x38] sm:$0xff] }
 0x9b4   : > { %v5071_v3 = vpop.f32.mrf.mxu0 }
 0x9b5   : > { %v1755_v8 = vadd.f32 %v5071_v3, %v1336_v0  ;;  %v381_v0 = vld [vmem:[%s6114_s6 + $0x30] sm:$0xff]  ;;  %v380_v3 = vld [vmem:[%s6114_s6 + $0x28] sm:$0xff] }
 0x9b6   : > { %v1745_v9 = vpop.f32.mrf.mxu0 }
 0x9b7   : > { %v1754_v10 = vadd.f32 %v1745_v9, %v1331_v6  ;;  %v379_v6 = vld [vmem:[%s6114_s6 + $0x20] sm:$0xff] }
 0x9b8   : > { %v1908_v11 = vpop.f32.mrf.mxu0 }
 0x9b9   : > { %v1913_v15 = vmul.f32 0.35355338, %v1908_v11 }
 0x9ba   : > { %v5081_v16 = vpop.f32.mrf.mxu0 }
 0x9bb   : > { %v1915_v18 = vadd.f32 %v1913_v15, %v5557_v36 }
 0x9bd   : > { %v1919_v24 = vsel %vm497_vm2, %v1915_v18, -inf }
 0x9be   : > { %1920 = vmax.xlane.f32.xlu1 %v1919_v24 }
 0x9cf   : > { %1938 = vrot.lane.b32.xlu1 %v5568_v48, %s6118_s12  ;;  %v370_v48 = vld [vmem:[%s6112_s4 + $0x18] sm:$0xff] }
 0xa17   : > { %v1930_v1 = vpop.xlane.xlu0 %1929 }
 0xa18   : > { %5326 = vrcp.f32 %v1930_v1 }
 0xa25   : > { %v5327_v26 = vpop.eup %5326 }
 0xa26   : > { %v1936_v27 = vmul.f32 %v5327_v26, %v5325_v62  ;;  %v371_v62 = vld [vmem:[%s6113_s5] sm:$0xff] }
 0xa47   : > { %v1921_v21 = vpop.xlane.xlu1 %1920 }
 0xa48   : > { %v1923_v2 = vsub.f32 %v1915_v18, %v1921_v21  ;;  %v2210_v18 = vsub.s32 4, %v5478_v4  ;;  %v2216_v21 = vsub.s32 5, %v5478_v4 }
 0xa4a   : > { %v1926_v22 = vmul.f32 1.442695, %v1923_v2  ;;  %v2211_v1 = vrot.slane %v5485_v5, %v2210_v18 }
 0xa4b   : > { %v1939_v19 = vpop.permute.xlu1 %1938 }
 0xa4c   : > { %5328 = vpow2.f32 %v1926_v22  ;;  %5083 = vmatpush3.msra.mxu1 %v1939_v19 }
 0xa4d   : > { %5085 = vmatmul.mubr.msk.f32.vlgmr.msra.gmra.mxu1 %vm497_vm2, %v1936_v27  ;;  %5092 = vmatprep.subr.mxu1 %v370_v48  ;;  %v2217_v27 = vrot.slane %v5485_v5, %v2216_v21 }
 0xa4e   : > { %5093 = vmatpush3.msra.mxu1 %v370_v48 }
 0xa4f   : > { %5108 = vmatprep.subr.mxu1 %v382_v63 }
 0xa59   : > { %v5329_v17 = vpop.eup %5328 }
 0xa5a   : > { %v1931_v28 = vsel %vm497_vm2, %v5329_v17, 0.0 }
 0xa5b   : > { %1932 = vadd.xlane.f32.xlu0 %v1931_v28 }
 0xa71   : > { %2014 = vrot.lane.b32.xlu0 %v5570_v49, %s6118_s12 }
 0xae4   : > { %v1933_v25 = vpop.xlane.xlu0 %1932 }
 0xae5   : > { %5330 = vrcp.f32 %v1933_v25  ;;  %v378_v25 = vld [vmem:[%s6114_s6 + $0x18] sm:$0xff] }
 0xae8   : > { %v2015_v29 = vpop.permute.xlu0 %2014 }
 0xae9   : > { %5088 = vmatpush3.msra.mxu0 %v2015_v29  ;;  %v377_v29 = vld [vmem:[%s6114_s6 + $0x10] sm:$0xff] }
 0xaf2   : > { %v5331_v30 = vpop.eup %5330 }
 0xaf3   : > { %v1937_v31 = vmul.f32 %v5331_v30, %v5329_v17  ;;  %v376_v30 = vld [vmem:[%s6114_s6 + $0x8] sm:$0xff] }
 0xaf5   : > { %5090 = vmatmul.mubr.msk.f32.vlgmr.msra.gmra.mxu0 %vm497_vm2, %v1937_v31  ;;  %v375_v31 = vld [vmem:[%s6114_s6] sm:$0xff] }
 0xb0d   : > { %v2010_v33 = vpop.f32.mrf.mxu1 }
 0xb0e   : > { %5094 = vmatprep.mubr.msk.f32.mxu1 %vm497_vm2, %v2010_v33  ;;  %v4777_v33 = vld [vmem:[%s6116_s8] ss:$0 sm:$0xff] }
 0xb0f   : > { %v5086_v34 = vpop.f32.mrf.mxu1 }
 0xbb5   : > { %v2086_v35 = vpop.f32.mrf.mxu0 }
 0xbb6   : > { %5095 = vmatmul.mubr.msk.f32.vlgmr.msra.gmra.mxu1 %vm497_vm2, %v2086_v35 }
 0xbb7   : > { %v5091_v49 = vpop.f32.mrf.mxu0  ;;  %5109 = vmatpush3.msra.mxu1 %v382_v63  ;;  %v4784_v63 = vld [vmem:[%s6111_s3 + $0x28] sm:$0xff] }
 0xbb8   : > { %5110 = vmatprep.subr.mxu1 %v381_v0 }
 0xbb9   : > { %5111 = vmatpush3.msra.mxu1 %v381_v0  ;;  %v4783_v0 = vld [vmem:[%s6111_s3 + $0x20] sm:$0xff] }
 0xbba   : > { %5112 = vmatprep.subr.mxu1 %v380_v3 }
 0xbbb   : > { %5113 = vmatpush3.msra.mxu1 %v380_v3  ;;  %v5808_v3 = vld [vmem:[%s6115_s7 + $0x10] sm:$0xff] }
 0xbbc   : > { %5114 = vmatprep.subr.mxu1 %v379_v6 }
 0xbbd   : > { %5115 = vmatpush3.msra.mxu1 %v379_v6  ;;  %v2554_v6 = vrot.slane %v5808_v3, %v476_v7 }
 0xbbe   : > { %5116 = vmatprep.subr.mxu1 %v378_v25 }
 0xbbf   : > { %5117 = vmatpush3.msra.mxu1 %v378_v25 }
 0xbc0   : > { %5118 = vmatprep.subr.mxu1 %v377_v29 }
 0xbc1   : > { %5119 = vmatpush3.msra.mxu1 %v377_v29 }
 0xbc2   : > { %5120 = vmatprep.subr.mxu1 %v376_v30 }
 0xbc3   : > { %5121 = vmatpush3.msra.mxu1 %v376_v30 }
 0xbc4   : > { %5122 = vmatprep.subr.mxu1 %v375_v31 }
 0xbc5   : > { %5123 = vmatpush3.msra.mxu1 %v375_v31 }
 0xbc6   : > { %5143 = vmatprep.subr.mxu1 %v5395_v14 }
 0xc76   : > { %v5096_v39 = vpop.f32.mrf.mxu1 }
 0xc77   : > { %v2172_v40 = vadd.f32 %v5096_v39, %v1755_v8 }
 0xc78   : > { %v2162_v41 = vpop.f32.mrf.mxu1 }
 0xc79   : > { %v2178_v42 = vadd.f32 %v2176_v38, %v2172_v40  ;;  %v2171_v23 = vadd.f32 %v2162_v41, %v1754_v10  ;;  %v2311_v41 = vsub.s32 6, %v5478_v4 }
 0xc7b   : > { %v2177_v43 = vadd.f32 %v2176_v38, %v2171_v23  ;;  %v2180_v45 = vadd.f32 %v2178_v42, %v5503_v13  ;;  %v2312_v42 = vrot.slane %v5485_v5, %v2311_v41 }
 0xc7d   : > { %v2184_v46 = vsel %vm386_vm0, %v2180_v45, 0.0  ;;  %v2179_v47 = vadd.f32 %v2177_v43, %v5501_v12  ;;  %v374_v12 = vld [vmem:[%s6113_s5 + $0x18] sm:$0xff] }
 0xc7e   : > { %2185 = vadd.xlane.f32.xlu0 %v2184_v46  ;;  %5097 = vmatprep.subr.mxu0 %v374_v12 }
 0xc7f   : > { %v2181_v50 = vsel %vm386_vm0, %v2179_v47, 0.0  ;;  %5098 = vmatpush3.msra.mxu0 %v374_v12 }
 0xc80   : > { %2182 = vadd.xlane.f32.xlu1 %v2181_v50  ;;  %5099 = vmatprep.subr.mxu0 %v373_v60 }
 0xc81   : > { %5100 = vmatpush3.msra.mxu0 %v373_v60 }
 0xc82   : > { %5101 = vmatprep.subr.mxu0 %v372_v61 }
 0xc83   : > { %5102 = vmatpush3.msra.mxu0 %v372_v61  ;;  %v4786_v61 = vld [vmem:[%s6111_s3 + $0x38] sm:$0xff] }
 0xc84   : > { %5103 = vmatprep.subr.mxu0 %v371_v62 }
 0xc85   : > { %5104 = vmatpush3.msra.mxu0 %v371_v62  ;;  %v4785_v62 = vld [vmem:[%s6111_s3 + $0x30] sm:$0xff] }
 0xc86   : > { %5127 = vmatprep.subr.mxu0 %v4786_v61 }
 0xd07   : > { %v2186_v51 = vpop.xlane.xlu0 %2185 }
 0xd08   : > { %v2189_v52 = vmul.f32 0.03125, %v2186_v51 }
 0xd09   : > { %v2183_v53 = vpop.xlane.xlu1 %2182 }
 0xd0a   : > { %v2191_v54 = vsub.f32 %v2180_v45, %v2189_v52  ;;  %v2188_v55 = vmul.f32 0.03125, %v2183_v53 }
 0xd0c   : > { %v2190_v56 = vsub.f32 %v2179_v47, %v2188_v55  ;;  %v2193_v57 = vmul.f32 %v2191_v54, %v2191_v54 }
 0xd0e   : > { %v2197_v58 = vsel %vm386_vm0, %v2193_v57, 0.0  ;;  %v2192_v59 = vmul.f32 %v2190_v56, %v2190_v56 }
 0xd0f   : > { %2198 = vadd.xlane.f32.xlu0 %v2197_v58 }
 0xd10   : > { %v2194_v13 = vsel %vm386_vm0, %v2192_v59, 0.0 }
 0xd11   : > { %2195 = vadd.xlane.f32.xlu1 %v2194_v13 }
 0xd98   : > { %v2199_v8 = vpop.xlane.xlu0 %2198 }
 0xd99   : > { %v2201_v9 = vmul.f32 0.03125, %v2199_v8 }
 0xd9a   : > { %v2196_v10 = vpop.xlane.xlu1 %2195 }
 0xd9b   : > { %v2203_v11 = vadd.f32 1e-05, %v2201_v9  ;;  %v2200_v15 = vmul.f32 0.03125, %v2196_v10 }
 0xd9d   : > { %5332 = vrsqrt.f32 %v2203_v11  ;;  %v2202_v16 = vadd.f32 1e-05, %v2200_v15 }
 0xd9f   : > { %5334 = vrsqrt.f32 %v2202_v16 }
 0xdaa   : > { %v5333_v24 = vpop.eup %5332 }
 0xdab   : > { %v2207_v26 = vmul.f32 %v5333_v24, %v2191_v54  ;;  %v2425_v24 = vsub.s32 7, %v5478_v4 }
 0xdac   : > { %v5335_v2 = vpop.eup %5334 }
 0xdad   : > { %v2206_v22 = vmul.f32 %v5335_v2, %v2190_v56  ;;  %v2213_v19 = vmul.f32 %v2211_v1, %v2207_v26  ;;  %v2426_v26 = vrot.slane %v5485_v5, %v2425_v24 }
 0xdaf   : > { %v2212_v17 = vmul.f32 %v2211_v1, %v2206_v22  ;;  %v2219_v48 = vadd.f32 %v2217_v27, %v2213_v19 }
 0xdb1   : > { %v2218_v28 = vadd.f32 %v2217_v27, %v2212_v17  ;;  %v4782_v27 = vld [vmem:[%s6115_s7 + $0x8] ss:$0 sm:$0xff] }
 0xdb3   : > { %5105 = vmatprep.mubr.msk.f32.mxu0 %vm386_vm0, %v2218_v28 }
 0xdb4   : > { %5106 = vmatmul.mubr.msk.f32.vlgmr.msra.gmra.mxu0 %vm386_vm0, %v2219_v48 }
 0xdb5   : > { %5128 = vmatpush3.msra.mxu0 %v4786_v61 }
 0xdb6   : > { %5129 = vmatprep.subr.mxu0 %v4785_v62 }
 0xdb7   : > { %5130 = vmatpush3.msra.mxu0 %v4785_v62 }
 0xdb8   : > { %5131 = vmatprep.subr.mxu0 %v4784_v63 }
 0xdb9   : > { %5132 = vmatpush3.msra.mxu0 %v4784_v63 }
 0xdba   : > { %5133 = vmatprep.subr.mxu0 %v4783_v0 }
 0xdbb   : > { %5134 = vmatpush3.msra.mxu0 %v4783_v0 }
 0xdbc   : > { %5138 = vmatprep.subr.mxu0 %v5395_v14 }
 0xe74   : > { %v5107_v34 = vpop.f32.mrf.mxu0 }
 0xe75   : > { %v2304_v35 = vadd.f32 %v5107_v34, %v4777_v33 }
 0xe76   : > { %v2298_v49 = vpop.f32.mrf.mxu0 }
 0xe77   : > { %v2299_v38 = vadd.f32 %v4777_v33, %v2298_v49  ;;  %v2308_v40 = vmax.f32 %v2304_v35, 0.0  ;;  %v2548_v33 = vrot.slane %v5808_v3, %v5525_v20 }
 0xe79   : > { %v2307_v39 = vmax.f32 %v2299_v38, 0.0 }
 0xe7b   : > { %5124 = vmatprep.mubr.msk.f32.mxu1 %vm2313_vm3, %v2307_v39 }
 0xe7c   : > { %5125 = vmatmul.mubr.msk.f32.vlgmr.msra.gmra.mxu1 %vm2313_vm3, %v2308_v40 }
 0xe7d   : > { %5145 = vmatprep.mubr.msk.f32.mxu1 %vm5396_vm1, %v5395_v14 }
 0xf3c   : > { %v5126_v23 = vpop.f32.mrf.mxu1 }
 0xf3d   : > { %v2392_v43 = vadd.f32 %v5126_v23, %v2312_v42 }
 0xf3e   : > { %v2386_v45 = vpop.f32.mrf.mxu1 }
 0xf3f   : > { %v2387_v46 = vadd.f32 %v2386_v45, %v2312_v42  ;;  %v2396_v47 = vadd.f32 %v2392_v43, %v2219_v48 }
 0xf41   : > { %v2400_v50 = vsel %vm386_vm0, %v2396_v47, 0.0  ;;  %v2395_v51 = vadd.f32 %v2387_v46, %v2218_v28 }
 0xf42   : > { %2401 = vadd.xlane.f32.xlu0 %v2400_v50 }
 0xf43   : > { %v2397_v52 = vsel %vm386_vm0, %v2395_v51, 0.0 }
 0xf44   : > { %2398 = vadd.xlane.f32.xlu1 %v2397_v52  ;;  %v2564_v52 = vrot.slane %v5808_v3, %v486_v44 }
 0xfcb   : > { %v2402_v53 = vpop.xlane.xlu0 %2401 }
 0xfcc   : > { %v2404_v54 = vmul.f32 0.03125, %v2402_v53 }
 0xfcd   : > { %v2399_v55 = vpop.xlane.xlu1 %2398 }
 0xfce   : > { %v2406_v56 = vsub.f32 %v2396_v47, %v2404_v54  ;;  %v2403_v57 = vmul.f32 0.03125, %v2399_v55 }
 0xfd0   : > { %v2405_v58 = vsub.f32 %v2395_v51, %v2403_v57  ;;  %v2408_v59 = vmul.f32 %v2406_v56, %v2406_v56 }
 0xfd2   : > { %v2412_v13 = vsel %vm386_vm0, %v2408_v59, 0.0  ;;  %v2407_v12 = vmul.f32 %v2405_v58, %v2405_v58 }
 0xfd3   : > { %2413 = vadd.xlane.f32.xlu0 %v2412_v13 }
 0xfd4   : > { %v2409_v60 = vsel %vm386_vm0, %v2407_v12, 0.0 }
 0xfd5   : > { %2410 = vadd.xlane.f32.xlu1 %v2409_v60 }
 0xfe6   : > { %2556 = vrot.lane.b32.xlu1 %v2554_v6, %s5394_s28 }
0x105c   : > { %v2414_v8 = vpop.xlane.xlu0 %2413 }
0x105d   : > { %v2416_v9 = vmul.f32 0.03125, %v2414_v8 }
0x105e   : > { %v2411_v10 = vpop.xlane.xlu1 %2410 }
0x105f   : > { %v2418_v11 = vadd.f32 1e-05, %v2416_v9  ;;  %v2415_v15 = vmul.f32 0.03125, %v2411_v10 }
0x1061   : > { %5336 = vrsqrt.f32 %v2418_v11  ;;  %v2417_v16 = vadd.f32 1e-05, %v2415_v15 }
0x1062   : > { %v2557_v5 = vpop.permute.xlu1 %2556 }
0x1063   : > { %5338 = vrsqrt.f32 %v2417_v16 }
0x106e   : > { %v5337_v1 = vpop.eup %5336 }
0x106f   : > { %v2422_v2 = vmul.f32 %v5337_v1, %v2406_v56 }
0x1070   : > { %v5339_v22 = vpop.eup %5338 }
0x1071   : > { %v2421_v7 = vmul.f32 %v5339_v22, %v2405_v58  ;;  %v2428_v19 = vmul.f32 %v2426_v26, %v2422_v2 }
0x1073   : > { %v2427_v17 = vmul.f32 %v2426_v26, %v2421_v7  ;;  %v5823_v48 = vadd.f32 %v4782_v27, %v2428_v19 }
0x1075   : > { %v5821_v28 = vadd.f32 %v4782_v27, %v2427_v17 }
0x1077   : > { %5135 = vmatprep.mubr.msk.f32.mxu0 %vm386_vm0, %v5821_v28 }
0x1078   : > { %5136 = vmatmul.mubr.msk.f32.vlgmr.msra.gmra.mxu0 %vm386_vm0, %v5823_v48 }
0x1079   : > { %5140 = vmatprep.mubr.msk.f32.mxu0 %vm5396_vm1, %v5395_v14 }
0x1138   : > { %v5137_v25 = vpop.f32.mrf.mxu0 }
0x1139   : > { %v5831_v29 = vadd.f32 %v5137_v25, %v2557_v5  ;;  %v5842_v35 = vadd.f32 %v5137_v25, %v2548_v33 }
0x113a   : > { %v2536_v30 = vpop.f32.mrf.mxu0 }
0x113b   : > { %v5833_v31 = vadd.f32 %v2557_v5, %v2536_v30  ;;  %2650 = vrot.lane.b32.xlu1 %v5831_v29, %s5397_s29  ;;  %v5846_v38 = vadd.f32 %v2548_v33, %v2536_v30 }
0x113d   : > { %2572 = vrot.lane.b32.xlu0 %v5833_v31, %s5397_s29 }
0x11ad   : > { %v2651_v34 = vpop.permute.xlu1 %2650 }
0x11ae   : > { %5144 = vmatpush3.xpose.msk.msra.mxu1 %vm497_vm2, %v2651_v34 }
0x11af   : > { %v2573_v49 = vpop.permute.xlu0 %2572  ;;  %5153 = vmatprep.subr.mxu1 %v5395_v14 }
0x11b0   : > { %5139 = vmatpush3.xpose.msk.msra.mxu0 %vm497_vm2, %v2573_v49 }
0x11b1   : > { %5146 = vmatmul.mubr.msk.f32.vlgmr.msra.gmra.mxu1 %vm497_vm2, %v5842_v35  ;;  %5148 = vmatprep.subr.mxu0 %v5395_v14 }
0x11b2   : > { %5155 = vmatprep.mubr.msk.f32.mxu1 %vm5396_vm1, %v5395_v14 }
0x11b3   : > { %5141 = vmatmul.mubr.msk.f32.vlgmr.msra.gmra.mxu0 %vm497_vm2, %v5846_v38 }
0x11b4   : > { %5150 = vmatprep.mubr.msk.f32.mxu0 %vm5396_vm1, %v5395_v14 }
0x1271   : > { %v2723_v39 = vpop.f32.mrf.mxu1 }
0x1272   : > { %v2728_v40 = vmul.f32 0.35355338, %v2723_v39 }
0x1273   : > { %v2645_v42 = vpop.f32.mrf.mxu0  ;;  %v5147_v23 = vpop.f32.mrf.mxu1 }
0x1274   : > { %v2727_v43 = vmul.f32 0.35355338, %v2645_v42  ;;  %v2730_v45 = vadd.f32 %v2728_v40, %v5557_v36 }
0x1275   : > { %v5142_v46 = vpop.f32.mrf.mxu0 }
0x1276   : > { %v2734_v47 = vsel %vm497_vm2, %v2730_v45, -inf  ;;  %v2729_v50 = vadd.f32 %v2727_v43, %v5554_v32 }
0x1277   : > { %2735 = vmax.xlane.f32.xlu0 %v2734_v47 }
0x1278   : > { %v2731_v51 = vsel %vm497_vm2, %v2729_v50, -inf }
0x1279   : > { %2732 = vmax.xlane.f32.xlu1 %v2731_v51 }
0x128d   : > { %2566 = vrot.lane.b32.xlu0 %v2564_v52, %s5398_s14 }
0x1300   : > { %v2736_v53 = vpop.xlane.xlu0 %2735 }
0x1301   : > { %v2738_v44 = vsub.f32 %v2730_v45, %v2736_v53 }
0x1302   : > { %v2733_v57 = vpop.xlane.xlu1 %2732 }
0x1303   : > { %v2741_v58 = vmul.f32 1.442695, %v2738_v44  ;;  %v2737_v59 = vsub.f32 %v2729_v50, %v2733_v57 }
0x1304   : > { %v2567_v54 = vpop.permute.xlu0 %2566 }
0x1305   : > { %v5865_v55 = vadd.f32 %v2567_v54, %v2536_v30  ;;  %v5867_v56 = vadd.f32 %v5137_v25, %v2567_v54  ;;  %5340 = vpow2.f32 %v2741_v58  ;;  %v2739_v13 = vmul.f32 1.442695, %v2737_v59  ;;  %v4787_v59 = vld [vmem:[%s6112_s4 + $0x20] sm:$0xff] }
0x1307   : > { %2831 = vrot.lane.b32.xlu0 %v5867_v56, %s5398_s14  ;;  %2754 = vrot.lane.b32.xlu1 %v5865_v55, %s5398_s14  ;;  %5342 = vpow2.f32 %v2739_v13  ;;  %s4742_s14 = sshll.u32 %s6127_s10, 1 }
0x130b   : > { %2909 = vrot.lane.b32.xlu0 %v5833_v31, %s5399_s15  ;;  %2987 = vrot.lane.b32.xlu1 %v5831_v29, %s5399_s15 }
0x130f   : > { %2907 = vrot.lane.b32.xlu0 %v5846_v38, %s5400_s16 }
0x1312   : > { %v5341_v12 = vpop.eup %5340 }
0x1313   : > { %v2746_v60 = vsel %vm497_vm2, %v5341_v12, 0.0 }
0x1314   : > { %v5343_v61 = vpop.eup %5342 }
0x1315   : > { %v2743_v62 = vsel %vm497_vm2, %v5343_v61, 0.0 }
0x132f   : > { %2747 = vadd.xlane.f32.xlu1 %v2746_v60 }
0x1333   : > { %2744 = vadd.xlane.f32.xlu1 %v2743_v62 }
0x1344   : > { %2985 = vrot.lane.b32.xlu1 %v5842_v35, %s5400_s16 }
0x1379   : > { %v2832_v63 = vpop.permute.xlu0 %2831  ;;  %v2755_v0 = vpop.permute.xlu1 %2754 }
0x137a   : > { %5149 = vmatpush3.msra.mxu0 %v2755_v0  ;;  %5154 = vmatpush3.msra.mxu1 %v2832_v63 }
0x137b   : > { %5163 = vmatprep.subr.mxu1 %v5395_v14  ;;  %5158 = vmatprep.subr.mxu0 %v5395_v14 }
0x137d   : > { %v2988_v6 = vpop.permute.xlu1 %2987  ;;  %v2910_v16 = vpop.permute.xlu0 %2909 }
0x1381   : > { %v2908_v2 = vpop.permute.xlu0 %2907 }
0x13b8   : > { %v2748_v8 = vpop.xlane.xlu1 %2747 }
0x13b9   : > { %5344 = vrcp.f32 %v2748_v8  ;;  %v4788_v8 = vld [vmem:[%s6112_s4 + $0x28] sm:$0xff] }
0x13bc   : > { %v2745_v9 = vpop.xlane.xlu1 %2744 }
0x13bd   : > { %5346 = vrcp.f32 %v2745_v9 }
0x13c0   : > { %v2986_v26 = vpop.permute.xlu1 %2985 }
0x13c6   : > { %v5345_v10 = vpop.eup %5344 }
0x13c7   : > { %v2752_v11 = vmul.f32 %v5345_v10, %v5341_v12 }
0x13c9   : > { %5156 = vmatmul.mubr.msk.f32.vlgmr.msra.gmra.mxu1 %vm497_vm2, %v2752_v11 }
0x13ca   : > { %v5347_v15 = vpop.eup %5346  ;;  %5164 = vmatpush3.xpose.msk.msra.mxu1 %vm497_vm2, %v2988_v6  ;;  %5165 = vmatprep.mubr.msk.f32.mxu1 %vm5396_vm1, %v5395_v14 }
0x13cb   : > { %v2751_v1 = vmul.f32 %v5347_v15, %v5343_v61  ;;  %5173 = vmatprep.subr.mxu1 %v5395_v14 }
0x13cd   : > { %5151 = vmatmul.mubr.msk.f32.vlgmr.msra.gmra.mxu0 %vm497_vm2, %v2751_v1  ;;  %5166 = vmatmul.mubr.msk.f32.vlgmr.msra.gmra.mxu1 %vm497_vm2, %v2986_v26 }
0x13ce   : > { %5159 = vmatpush3.xpose.msk.msra.mxu0 %vm497_vm2, %v2910_v16  ;;  %5160 = vmatprep.mubr.msk.f32.mxu0 %vm5396_vm1, %v5395_v14 }
0x13cf   : > { %5168 = vmatprep.subr.mxu0 %v5395_v14  ;;  %5175 = vmatprep.mubr.msk.f32.mxu1 %vm5396_vm1, %v5395_v14 }
0x13d1   : > { %5161 = vmatmul.mubr.msk.f32.vlgmr.msra.gmra.mxu0 %vm497_vm2, %v2908_v2 }
0x13d2   : > { %5170 = vmatprep.mubr.msk.f32.mxu0 %vm5396_vm1, %v5395_v14 }
0x1489   : > { %v2903_v22 = vpop.f32.mrf.mxu1 }
0x148b   : > { %v5157_v7 = vpop.f32.mrf.mxu1 }
0x148d   : > { %v2826_v19 = vpop.f32.mrf.mxu0  ;;  %v3059_v27 = vpop.f32.mrf.mxu1 }
0x148e   : > { %v3064_v17 = vmul.f32 0.35355338, %v3059_v27 }
0x148f   : > { %v5152_v5 = vpop.f32.mrf.mxu0  ;;  %v5167_v25 = vpop.f32.mrf.mxu1 }
0x1490   : > { %v3066_v30 = vadd.f32 %v3064_v17, %v5557_v36 }
0x1491   : > { %v2981_v33 = vpop.f32.mrf.mxu0 }
0x1492   : > { %v3063_v34 = vmul.f32 0.35355338, %v2981_v33  ;;  %v3070_v49 = vsel %vm497_vm2, %v3066_v30, -inf }
0x1493   : > { %v5162_v39 = vpop.f32.mrf.mxu0  ;;  %3071 = vmax.xlane.f32.xlu1 %v3070_v49 }
0x1494   : > { %v3065_v40 = vadd.f32 %v3063_v34, %v5554_v32 }
0x1496   : > { %v3067_v42 = vsel %vm497_vm2, %v3065_v40, -inf }
0x1497   : > { %3068 = vmax.xlane.f32.xlu0 %v3067_v42 }
0x14a4   : > { %3089 = vrot.lane.b32.xlu1 %v5865_v55, %s5401_s17 }
0x14a8   : > { %3405 = vrot.lane.b32.xlu1 %v5833_v31, %s5402_s18 }
0x14ac   : > { %3483 = vrot.lane.b32.xlu1 %v5831_v29, %s5402_s18 }
0x14b0   : > { %3481 = vrot.lane.b32.xlu1 %v5842_v35, %s5403_s19 }
0x151c   : > { %v3072_v23 = vpop.xlane.xlu1 %3071 }
0x151d   : > { %v3074_v43 = vsub.f32 %v3066_v30, %v3072_v23 }
0x151f   : > { %v3077_v45 = vmul.f32 1.442695, %v3074_v43 }
0x1520   : > { %v3069_v46 = vpop.xlane.xlu0 %3068  ;;  %v3090_v47 = vpop.permute.xlu1 %3089 }
0x1521   : > { %5348 = vpow2.f32 %v3077_v45  ;;  %v3073_v50 = vsub.f32 %v3065_v40, %v3069_v46  ;;  %5169 = vmatpush3.msra.mxu0 %v3090_v47 }
0x1522   : > { %5178 = vmatprep.subr.mxu0 %v4788_v8 }
0x1523   : > { %v3075_v51 = vmul.f32 1.442695, %v3073_v50 }
0x1524   : > { %v3406_v12 = vpop.permute.xlu1 %3405 }
0x1525   : > { %5350 = vpow2.f32 %v3075_v51 }
0x1528   : > { %v3484_v63 = vpop.permute.xlu1 %3483 }
0x152c   : > { %v3482_v6 = vpop.permute.xlu1 %3481 }
0x152e   : > { %v5349_v52 = vpop.eup %5348 }
0x152f   : > { %v3082_v53 = vsel %vm497_vm2, %v5349_v52, 0.0 }
0x1530   : > { %3083 = vadd.xlane.f32.xlu0 %v3082_v53 }
0x1532   : > { %v5351_v54 = vpop.eup %5350 }
0x1533   : > { %v3079_v44 = vsel %vm497_vm2, %v5351_v54, 0.0 }
0x1534   : > { %3080 = vadd.xlane.f32.xlu0 %v3079_v44 }
0x154a   : > { %3165 = vrot.lane.b32.xlu0 %v5867_v56, %s5401_s17  ;;  %s6122_s17 = smov 104  }
0x154e   : > { %3403 = vrot.lane.b32.xlu0 %v5846_v38, %s5403_s19 }
0x15b9   : > { %v3084_v57 = vpop.xlane.xlu0 %3083 }
0x15ba   : > { %5352 = vrcp.f32 %v3084_v57 }
0x15bd   : > { %v3081_v58 = vpop.xlane.xlu0 %3080 }
0x15be   : > { %5354 = vrcp.f32 %v3081_v58 }
0x15c1   : > { %v3166_v13 = vpop.permute.xlu0 %3165 }
0x15c2   : > { %5174 = vmatpush3.msra.mxu1 %v3166_v13 }
0x15c3   : > { %5183 = vmatprep.subr.mxu1 %v4787_v59 }
0x15c5   : > { %v3404_v2 = vpop.permute.xlu0 %3403 }
0x15c7   : > { %v5353_v60 = vpop.eup %5352 }
0x15c8   : > { %v3088_v61 = vmul.f32 %v5353_v60, %v5349_v52 }
0x15ca   : > { %5176 = vmatmul.mubr.msk.f32.vlgmr.msra.gmra.mxu1 %vm497_vm2, %v3088_v61 }
0x15cb   : > { %v5355_v62 = vpop.eup %5354  ;;  %5185 = vmatprep.mubr.msk.f32.mxu1 %vm497_vm2, %v2826_v19  ;;  %5184 = vmatpush3.msra.mxu1 %v4787_v59  ;;  %v4789_v59 = vld [vmem:[%s6112_s4 + $0x30] sm:$0xff] }
0x15cc   : > { %5193 = vmatprep.subr.mxu1 %v5395_v14  ;;  %v3087_v0 = vmul.f32 %v5355_v62, %v5351_v54 }
0x15ce   : > { %5171 = vmatmul.mubr.msk.f32.vlgmr.msra.gmra.mxu0 %vm497_vm2, %v3087_v0  ;;  %5186 = vmatmul.mubr.msk.f32.vlgmr.msra.gmra.mxu1 %vm497_vm2, %v2903_v22 }
0x15cf   : > { %5194 = vmatpush3.xpose.msk.msra.mxu1 %vm497_vm2, %v3484_v63  ;;  %5195 = vmatprep.mubr.msk.f32.mxu1 %vm5396_vm1, %v5395_v14 }
0x15d0   : > { %5203 = vmatprep.subr.mxu1 %v5395_v14  ;;  %5179 = vmatpush3.msra.mxu0 %v4788_v8 }
0x15d1   : > { %5188 = vmatprep.subr.mxu0 %v5395_v14 }
0x15d2   : > { %5196 = vmatmul.mubr.msk.f32.vlgmr.msra.gmra.mxu1 %vm497_vm2, %v3482_v6 }
0x15d3   : > { %5205 = vmatprep.mubr.msk.f32.mxu1 %vm5396_vm1, %v5395_v14 }
0x168a   : > { %v3237_v9 = vpop.f32.mrf.mxu1 }
0x168c   : > { %v5177_v10 = vpop.f32.mrf.mxu1 }
0x168e   : > { %v3161_v11 = vpop.f32.mrf.mxu0  ;;  %v5938_v15 = vpop.f32.mrf.mxu1 }
0x168f   : > { %5180 = vmatprep.mubr.msk.f32.mxu0 %vm497_vm2, %v3161_v11 }
0x1690   : > { %v5172_v16 = vpop.f32.mrf.mxu0  ;;  %5181 = vmatmul.mubr.msk.f32.vlgmr.msra.gmra.mxu0 %vm497_vm2, %v3237_v9  ;;  %v5942_v1 = vpop.f32.mrf.mxu1 }
0x1691   : > { %5189 = vmatpush3.xpose.msk.msra.mxu0 %vm497_vm2, %v3406_v12  ;;  %5190 = vmatprep.mubr.msk.f32.mxu0 %vm5396_vm1, %v5395_v14 }
0x1692   : > { %v3555_v26 = vpop.f32.mrf.mxu1  ;;  %5198 = vmatprep.subr.mxu0 %v5395_v14 }
0x1693   : > { %v3560_v22 = vmul.f32 0.35355338, %v3555_v26 }
0x1694   : > { %5191 = vmatmul.mubr.msk.f32.vlgmr.msra.gmra.mxu0 %vm497_vm2, %v3404_v2  ;;  %v5197_v7 = vpop.f32.mrf.mxu1 }
0x1695   : > { %v3562_v19 = vadd.f32 %v3560_v22, %v5557_v36  ;;  %5200 = vmatprep.mubr.msk.f32.mxu0 %vm5396_vm1, %v5395_v14 }
0x1697   : > { %v3566_v27 = vsel %vm497_vm2, %v3562_v19, -inf }
0x1698   : > { %3567 = vmax.xlane.f32.xlu1 %v3566_v27 }
0x16a9   : > { %3585 = vrot.lane.b32.xlu1 %v5865_v55, %s5404_s24 }
0x16ad   : > { %3822 = vrot.lane.b32.xlu1 %v5833_v31, %s5405_s25 }
0x16b1   : > { %3900 = vrot.lane.b32.xlu1 %v5831_v29, %s5405_s25 }
0x16b5   : > { %3898 = vrot.lane.b32.xlu1 %v5842_v35, %s6122_s17 }
0x1721   : > { %v3568_v17 = vpop.xlane.xlu1 %3567 }
0x1722   : > { %v3570_v25 = vsub.f32 %v3562_v19, %v3568_v17 }
0x1724   : > { %v3573_v30 = vmul.f32 1.442695, %v3570_v25 }
0x1725   : > { %v3586_v5 = vpop.permute.xlu1 %3585 }
0x1726   : > { %5199 = vmatpush3.msra.mxu0 %v3586_v5  ;;  %5356 = vpow2.f32 %v3573_v30 }
0x1727   : > { %5208 = vmatprep.subr.mxu0 %v4789_v59 }
0x1729   : > { %v3823_v44 = vpop.permute.xlu1 %3822 }
0x172d   : > { %v3901_v6 = vpop.permute.xlu1 %3900 }
0x1731   : > { %v3899_v10 = vpop.permute.xlu1 %3898 }
0x1733   : > { %v5357_v42 = vpop.eup %5356 }
0x1734   : > { %v3578_v35 = vsel %vm497_vm2, %v5357_v42, 0.0 }
0x1750   : > { %v5961_v33 = vpop.f32.mrf.mxu0 }
0x1751   : > { %v3400_v22 = vadd.f32 %v5938_v15, %v5961_v33 }
0x1752   : > { %v5963_v34 = vpop.f32.mrf.mxu0 }
0x1753   : > { %v3395_v19 = vadd.f32 %v5942_v1, %v5963_v34 }
0x1754   : > { %v3477_v49 = vpop.f32.mrf.mxu0 }
0x1755   : > { %v3559_v39 = vmul.f32 0.35355338, %v3477_v49 }
0x1756   : > { %v5192_v40 = vpop.f32.mrf.mxu0 }
0x1757   : > { %v3561_v31 = vadd.f32 %v3559_v39, %v5554_v32 }
0x1759   : > { %v3563_v29 = vsel %vm497_vm2, %v3561_v31, -inf }
0x175a   : > { %3564 = vmax.xlane.f32.xlu0 %v3563_v29 }
0x175e   : > { %3579 = vadd.xlane.f32.xlu0 %v3578_v35 }
0x17e3   : > { %v3565_v23 = vpop.xlane.xlu0 %3564 }
0x17e4   : > { %v3569_v43 = vsub.f32 %v3561_v31, %v3565_v23 }
0x17e6   : > { %v3571_v45 = vmul.f32 1.442695, %v3569_v43 }
0x17e7   : > { %v3580_v50 = vpop.xlane.xlu0 %3579 }
0x17e8   : > { %5358 = vpow2.f32 %v3571_v45 }
0x17e9   : > { %5360 = vrcp.f32 %v3580_v50 }
0x17f5   : > { %v5359_v46 = vpop.eup %5358 }
0x17f6   : > { %v3575_v47 = vsel %vm497_vm2, %v5359_v46, 0.0  ;;  %v5361_v52 = vpop.eup %5360 }
0x17f7   : > { %3576 = vadd.xlane.f32.xlu0 %v3575_v47  ;;  %v3584_v54 = vmul.f32 %v5361_v52, %v5357_v42  ;;  %v4240_v52 = vrot.slane %v5808_v3, %v2175_v37 }
0x180d   : > { %3661 = vrot.lane.b32.xlu0 %v5867_v56, %s5404_s24  ;;  %s6123_s24 = smov 40  }
0x1811   : > { %3820 = vrot.lane.b32.xlu0 %v5846_v38, %s6122_s17  ;;  %s351_s17 = scalar_lea.vmem %s6117_s9, %s4742_s14 }
0x1880   : > { %v3577_v51 = vpop.xlane.xlu0 %3576 }
0x1881   : > { %5362 = vrcp.f32 %v3577_v51 }
0x1884   : > { %v3662_v53 = vpop.permute.xlu0 %3661 }
0x1885   : > { %5204 = vmatpush3.msra.mxu1 %v3662_v53 }
0x1886   : > { %5206 = vmatmul.mubr.msk.f32.vlgmr.msra.gmra.mxu1 %vm497_vm2, %v3584_v54  ;;  %5213 = vmatprep.subr.mxu1 %v5395_v14 }
0x1887   : > { %5214 = vmatpush3.xpose.msk.msra.mxu1 %vm497_vm2, %v3823_v44  ;;  %5215 = vmatprep.mubr.msk.f32.mxu1 %vm5396_vm1, %v5395_v14 }
0x1888   : > { %v3821_v57 = vpop.permute.xlu0 %3820  ;;  %5223 = vmatprep.subr.mxu1 %v5395_v14 }
0x188a   : > { %5216 = vmatmul.mubr.msk.f32.vlgmr.msra.gmra.mxu1 %vm497_vm2, %v3821_v57 }
0x188b   : > { %5225 = vmatprep.mubr.msk.f32.mxu1 %vm5396_vm1, %v5395_v14 }
0x188e   : > { %v5363_v38 = vpop.eup %5362 }
0x188f   : > { %v3583_v58 = vmul.f32 %v5363_v38, %v5359_v46 }
0x1891   : > { %5201 = vmatmul.mubr.msk.f32.vlgmr.msra.gmra.mxu0 %vm497_vm2, %v3583_v58 }
0x1892   : > { %5209 = vmatpush3.msra.mxu0 %v4789_v59 }
0x1893   : > { %5218 = vmatprep.subr.mxu0 %v5395_v14 }
0x1946   : > { %v3733_v13 = vpop.f32.mrf.mxu1 }
0x1948   : > { %v5207_v12 = vpop.f32.mrf.mxu1 }
0x194a   : > { %v3894_v60 = vpop.f32.mrf.mxu1 }
0x194b   : > { %v3976_v61 = vmul.f32 0.35355338, %v3894_v60 }
0x194c   : > { %v5217_v62 = vpop.f32.mrf.mxu1 }
0x194d   : > { %v3978_v63 = vadd.f32 %v3976_v61, %v5554_v32 }
0x194f   : > { %v3980_v0 = vsel %vm497_vm2, %v3978_v63, -inf }
0x1950   : > { %3981 = vmax.xlane.f32.xlu0 %v3980_v0 }
0x1951   : > { %v3657_v8 = vpop.f32.mrf.mxu0 }
0x1952   : > { %5210 = vmatprep.mubr.msk.f32.mxu0 %vm497_vm2, %v3657_v8 }
0x1953   : > { %v5202_v9 = vpop.f32.mrf.mxu0  ;;  %5211 = vmatmul.mubr.msk.f32.vlgmr.msra.gmra.mxu0 %vm497_vm2, %v3733_v13 }
0x1954   : > { %5219 = vmatpush3.xpose.msk.msra.mxu0 %vm497_vm2, %v3901_v6  ;;  %5220 = vmatprep.mubr.msk.f32.mxu0 %vm5396_vm1, %v5395_v14 }
0x1955   : > { %5228 = vmatprep.subr.mxu0 %v5395_v14 }
0x1957   : > { %5221 = vmatmul.mubr.msk.f32.vlgmr.msra.gmra.mxu0 %vm497_vm2, %v3899_v10 }
0x1958   : > { %5230 = vmatprep.mubr.msk.f32.mxu0 %vm5396_vm1, %v5395_v14 }
0x19d9   : > { %v3982_v32 = vpop.xlane.xlu0 %3981 }
0x19da   : > { %v3986_v11 = vsub.f32 %v3978_v63, %v3982_v32  ;;  %v4793_v32 = vld [vmem:[%s6113_s5 + $0x30] sm:$0xff] }
0x19dc   : > { %v3988_v16 = vmul.f32 1.442695, %v3986_v11  ;;  %v4792_v11 = vld [vmem:[%s6113_s5 + $0x28] sm:$0xff] }
0x19de   : > { %5364 = vpow2.f32 %v3988_v16  ;;  %v4791_v16 = vld [vmem:[%s6113_s5 + $0x20] sm:$0xff] }
0x19eb   : > { %v5365_v26 = vpop.eup %5364 }
0x19ec   : > { %v3992_v2 = vsel %vm497_vm2, %v5365_v26, 0.0 }
0x19ed   : > { %3993 = vadd.xlane.f32.xlu0 %v3992_v2  ;;  %v4801_v2 = vld [vmem:[%s6114_s6 + $0x70] sm:$0xff] }
0x1a13   : > { %v5212_v7 = vpop.f32.mrf.mxu0 }
0x1a14   : > { %v3819_v27 = vadd.f32 %v5212_v7, %v3400_v22  ;;  %v4800_v22 = vld [vmem:[%s6114_s6 + $0x68] sm:$0xff]  ;;  %v4799_v7 = vld [vmem:[%s6114_s6 + $0x60] sm:$0xff] }
0x1a15   : > { %v3809_v17 = vpop.f32.mrf.mxu0 }
0x1a16   : > { %v3818_v5 = vadd.f32 %v3809_v17, %v3395_v19 }
0x1a17   : > { %v3972_v25 = vpop.f32.mrf.mxu0 }
0x1a18   : > { %v3977_v30 = vmul.f32 0.35355338, %v3972_v25 }
0x1a19   : > { %v5222_v49 = vpop.f32.mrf.mxu0 }
0x1a1a   : > { %v3979_v39 = vadd.f32 %v3977_v30, %v5557_v36 }
0x1a1c   : > { %v3983_v40 = vsel %vm497_vm2, %v3979_v39, -inf }
0x1a1d   : > { %3984 = vmax.xlane.f32.xlu1 %v3983_v40 }
0x1a2e   : > { %4002 = vrot.lane.b32.xlu1 %v5865_v55, %s6123_s24  ;;  %v4790_v55 = vld [vmem:[%s6112_s4 + $0x38] sm:$0xff] }
0x1a76   : > { %v3994_v31 = vpop.xlane.xlu0 %3993 }
0x1a77   : > { %5366 = vrcp.f32 %v3994_v31 }
0x1a84   : > { %v5367_v33 = vpop.eup %5366 }
0x1a85   : > { %v4000_v42 = vmul.f32 %v5367_v33, %v5365_v26  ;;  %v4802_v26 = vld [vmem:[%s6114_s6 + $0x78] sm:$0xff] }
0x1aa6   : > { %v3985_v15 = vpop.xlane.xlu1 %3984 }
0x1aa7   : > { %v3987_v29 = vsub.f32 %v3979_v39, %v3985_v15  ;;  %v4274_v39 = vrot.slane %v5808_v3, %v2210_v18  ;;  %v4798_v18 = vld [vmem:[%s6114_s6 + $0x58] sm:$0xff] }
0x1aa9   : > { %v3990_v1 = vmul.f32 1.442695, %v3987_v29  ;;  %v4280_v29 = vrot.slane %v5808_v3, %v2216_v21  ;;  %v4797_v21 = vld [vmem:[%s6114_s6 + $0x50] sm:$0xff] }
0x1aaa   : > { %v4003_v34 = vpop.permute.xlu1 %4002 }
0x1aab   : > { %5368 = vpow2.f32 %v3990_v1  ;;  %5224 = vmatpush3.msra.mxu1 %v4003_v34 }
0x1aac   : > { %5226 = vmatmul.mubr.msk.f32.vlgmr.msra.gmra.mxu1 %vm497_vm2, %v4000_v42  ;;  %5233 = vmatprep.subr.mxu1 %v4790_v55 }
0x1aad   : > { %5234 = vmatpush3.msra.mxu1 %v4790_v55  ;;  %v4840_v55 = vld [vmem:[%s6116_s8 + $0x1] ss:$0 sm:$0xff] }
0x1aae   : > { %5249 = vmatprep.subr.mxu1 %v4802_v26 }
0x1ab8   : > { %v5369_v35 = vpop.eup %5368 }
0x1ab9   : > { %v3995_v36 = vsel %vm497_vm2, %v5369_v35, 0.0 }
0x1aba   : > { %3996 = vadd.xlane.f32.xlu0 %v3995_v36  ;;  %v4795_v36 = vld [vmem:[%s6114_s6 + $0x40] sm:$0xff] }
0x1ad0   : > { %4078 = vrot.lane.b32.xlu0 %v5867_v56, %s6123_s24 }
0x1b43   : > { %v3997_v23 = vpop.xlane.xlu0 %3996 }
0x1b44   : > { %5370 = vrcp.f32 %v3997_v23 }
0x1b47   : > { %v4079_v43 = vpop.permute.xlu0 %4078 }
0x1b48   : > { %5229 = vmatpush3.msra.mxu0 %v4079_v43 }
0x1b51   : > { %v5371_v45 = vpop.eup %5370 }
0x1b52   : > { %v4001_v46 = vmul.f32 %v5371_v45, %v5369_v35  ;;  %v4796_v35 = vld [vmem:[%s6114_s6 + $0x48] sm:$0xff] }
0x1b54   : > { %5231 = vmatmul.mubr.msk.f32.vlgmr.msra.gmra.mxu0 %vm497_vm2, %v4001_v46 }
0x1b6c   : > { %v4074_v47 = vpop.f32.mrf.mxu1 }
0x1b6d   : > { %5235 = vmatprep.mubr.msk.f32.mxu1 %vm497_vm2, %v4074_v47 }
0x1b6e   : > { %v5227_v50 = vpop.f32.mrf.mxu1 }
0x1c14   : > { %v4150_v51 = vpop.f32.mrf.mxu0 }
0x1c15   : > { %5236 = vmatmul.mubr.msk.f32.vlgmr.msra.gmra.mxu1 %vm497_vm2, %v4150_v51  ;;  %v4375_v51 = vrot.slane %v5808_v3, %v2311_v41 }
0x1c16   : > { %v5232_v56 = vpop.f32.mrf.mxu0  ;;  %5250 = vmatpush3.msra.mxu1 %v4802_v26 }
0x1c17   : > { %5251 = vmatprep.subr.mxu1 %v4801_v2 }
0x1c18   : > { %5252 = vmatpush3.msra.mxu1 %v4801_v2 }
0x1c19   : > { %5253 = vmatprep.subr.mxu1 %v4800_v22 }
0x1c1a   : > { %5254 = vmatpush3.msra.mxu1 %v4800_v22  ;;  %v4488_v22 = vrot.slane %v5808_v3, %v2425_v24 }
0x1c1b   : > { %5255 = vmatprep.subr.mxu1 %v4799_v7 }
0x1c1c   : > { %5256 = vmatpush3.msra.mxu1 %v4799_v7 }
0x1c1d   : > { %5257 = vmatprep.subr.mxu1 %v4798_v18 }
0x1c1e   : > { %5258 = vmatpush3.msra.mxu1 %v4798_v18 }
0x1c1f   : > { %5259 = vmatprep.subr.mxu1 %v4797_v21 }
0x1c20   : > { %5260 = vmatpush3.msra.mxu1 %v4797_v21 }
0x1c21   : > { %5261 = vmatprep.subr.mxu1 %v4796_v35 }
0x1c22   : > { %5262 = vmatpush3.msra.mxu1 %v4796_v35 }
0x1c23   : > { %5263 = vmatprep.subr.mxu1 %v4795_v36 }
0x1c24   : > { %5264 = vmatpush3.msra.mxu1 %v4795_v36 }
0x1cd5   : > { %v5237_v53 = vpop.f32.mrf.mxu1 }
0x1cd6   : > { %v4236_v54 = vadd.f32 %v5237_v53, %v3819_v27 }
0x1cd7   : > { %v4226_v44 = vpop.f32.mrf.mxu1 }
0x1cd8   : > { %v4242_v57 = vadd.f32 %v4240_v52, %v4236_v54  ;;  %v4235_v38 = vadd.f32 %v4226_v44, %v3818_v5 }
0x1cda   : > { %v4241_v58 = vadd.f32 %v4240_v52, %v4235_v38  ;;  %v4244_v59 = vadd.f32 %v4242_v57, %v5823_v48 }
0x1cdc   : > { %v4248_v13 = vsel %vm386_vm0, %v4244_v59, 0.0  ;;  %v4243_v12 = vadd.f32 %v4241_v58, %v5821_v28  ;;  %v4794_v28 = vld [vmem:[%s6113_s5 + $0x38] sm:$0xff] }
0x1cdd   : > { %4249 = vadd.xlane.f32.xlu0 %v4248_v13  ;;  %5238 = vmatprep.subr.mxu0 %v4794_v28 }
0x1cde   : > { %v4245_v60 = vsel %vm386_vm0, %v4243_v12, 0.0  ;;  %5239 = vmatpush3.msra.mxu0 %v4794_v28 }
0x1cdf   : > { %4246 = vadd.xlane.f32.xlu1 %v4245_v60  ;;  %5240 = vmatprep.subr.mxu0 %v4793_v32 }
0x1ce0   : > { %5241 = vmatpush3.msra.mxu0 %v4793_v32 }
0x1ce1   : > { %5242 = vmatprep.subr.mxu0 %v4792_v11 }
0x1ce2   : > { %5243 = vmatpush3.msra.mxu0 %v4792_v11 }
0x1ce3   : > { %5244 = vmatprep.subr.mxu0 %v4791_v16 }
0x1ce4   : > { %5245 = vmatpush3.msra.mxu0 %v4791_v16 }
0x1ce5   : > { %5268 = vmatprep.subr.mxu0 %v5395_v14 }
0x1d66   : > { %v4250_v61 = vpop.xlane.xlu0 %4249 }
0x1d67   : > { %v4252_v62 = vmul.f32 0.03125, %v4250_v61 }
0x1d68   : > { %v4247_v63 = vpop.xlane.xlu1 %4246 }
0x1d69   : > { %v4254_v37 = vsub.f32 %v4244_v59, %v4252_v62  ;;  %v4251_v0 = vmul.f32 0.03125, %v4247_v63 }
0x1d6b   : > { %v4253_v6 = vsub.f32 %v4243_v12, %v4251_v0  ;;  %v4256_v8 = vmul.f32 %v4254_v37, %v4254_v37 }
0x1d6d   : > { %v4260_v9 = vsel %vm386_vm0, %v4256_v8, 0.0  ;;  %v4255_v10 = vmul.f32 %v4253_v6, %v4253_v6 }
0x1d6e   : > { %4261 = vadd.xlane.f32.xlu0 %v4260_v9  ;;  %v5385_v9 = vld [vmem:[%s5549_s13 + $0x1] sm:$0x1] }
0x1d6f   : > { %v4257_v48 = vsel %vm386_vm0, %v4255_v10, 0.0  ;;  %v4647_v10 = vsel %vm4643_vm4, %v5385_v9, 0.0 }
0x1d70   : > { %4258 = vadd.xlane.f32.xlu1 %v4257_v48 }
0x1df7   : > { %v4262_v19 = vpop.xlane.xlu0 %4261 }
0x1df8   : > { %v4264_v27 = vmul.f32 0.03125, %v4262_v19 }
0x1df9   : > { %v4259_v17 = vpop.xlane.xlu1 %4258 }
0x1dfa   : > { %v4266_v5 = vadd.f32 1e-05, %v4264_v27  ;;  %v4263_v25 = vmul.f32 0.03125, %v4259_v17 }
0x1dfc   : > { %5372 = vrsqrt.f32 %v4266_v5  ;;  %v4265_v30 = vadd.f32 1e-05, %v4263_v25  ;;  %v4845_v25 = vld [vmem:[%s6115_s7 + $0x18] ss:$0 sm:$0xff] }
0x1dfe   : > { %5374 = vrsqrt.f32 %v4265_v30 }
0x1e09   : > { %v5373_v49 = vpop.eup %5372 }
0x1e0a   : > { %v4270_v40 = vmul.f32 %v5373_v49, %v4254_v37 }
0x1e0b   : > { %v5375_v31 = vpop.eup %5374 }
0x1e0c   : > { %v4269_v15 = vmul.f32 %v5375_v31, %v4253_v6  ;;  %v4276_v33 = vmul.f32 %v4274_v39, %v4270_v40  ;;  %v5384_v6 = vld [vmem:[%s5549_s13] sm:$0x1] }
0x1e0d   : > { %v4644_v8 = vsel %vm4643_vm4, %v5384_v6, 0.0 }
0x1e0e   : > { %v4275_v1 = vmul.f32 %v4274_v39, %v4269_v15  ;;  %v4282_v42 = vadd.f32 %v4280_v29, %v4276_v33 }
0x1e10   : > { %v4281_v34 = vadd.f32 %v4280_v29, %v4275_v1 }
0x1e12   : > { %5246 = vmatprep.mubr.msk.f32.mxu0 %vm386_vm0, %v4281_v34 }
0x1e13   : > { %5247 = vmatmul.mubr.msk.f32.vlgmr.msra.gmra.mxu0 %vm386_vm0, %v4282_v42 }
0x1e14   : > { %5270 = vmatprep.mubr.msk.f32.mxu0 %vm5396_vm1, %v5395_v14 }
0x1ed3   : > { %v5248_v23 = vpop.f32.mrf.mxu0 }
0x1ed4   : > { %v4367_v43 = vadd.f32 %v5248_v23, %v4840_v55 }
0x1ed5   : > { %v4361_v45 = vpop.f32.mrf.mxu0 }
0x1ed6   : > { %v4362_v46 = vadd.f32 %v4840_v55, %v4361_v45  ;;  %v4371_v50 = vmax.f32 %v4367_v43, 0.0 }
0x1ed8   : > { %v4370_v47 = vmax.f32 %v4362_v46, 0.0 }
0x1eda   : > { %5265 = vmatprep.mubr.msk.f32.mxu1 %vm2313_vm3, %v4370_v47 }
0x1edb   : > { %5266 = vmatmul.mubr.msk.f32.vlgmr.msra.gmra.mxu1 %vm2313_vm3, %v4371_v50 }
0x1f9b   : > { %v5267_v56 = vpop.f32.mrf.mxu1 }
0x1f9c   : > { %v4454_v52 = vadd.f32 %v5267_v56, %v4375_v51 }
0x1f9d   : > { %v4448_v53 = vpop.f32.mrf.mxu1 }
0x1f9e   : > { %v4449_v54 = vadd.f32 %v4448_v53, %v4375_v51  ;;  %v4458_v44 = vadd.f32 %v4454_v52, %v4282_v42 }
0x1fa0   : > { %v4462_v57 = vsel %vm386_vm0, %v4458_v44, 0.0  ;;  %v4457_v38 = vadd.f32 %v4449_v54, %v4281_v34 }
0x1fa1   : > { %4463 = vadd.xlane.f32.xlu0 %v4462_v57 }
0x1fa2   : > { %v4459_v58 = vsel %vm386_vm0, %v4457_v38, 0.0 }
0x1fa3   : > { %4460 = vadd.xlane.f32.xlu1 %v4459_v58 }
0x202a   : > { %v4464_v59 = vpop.xlane.xlu0 %4463 }
0x202b   : > { %v4466_v13 = vmul.f32 0.03125, %v4464_v59 }
0x202c   : > { %v4461_v12 = vpop.xlane.xlu1 %4460 }
0x202d   : > { %v4468_v60 = vsub.f32 %v4458_v44, %v4466_v13  ;;  %v4465_v61 = vmul.f32 0.03125, %v4461_v12 }
0x202f   : > { %v4467_v41 = vsub.f32 %v4457_v38, %v4465_v61  ;;  %v4470_v62 = vmul.f32 %v4468_v60, %v4468_v60 }
0x2031   : > { %v4474_v63 = vsel %vm386_vm0, %v4470_v62, 0.0  ;;  %v4469_v37 = vmul.f32 %v4467_v41, %v4467_v41 }
0x2032   : > { %4475 = vadd.xlane.f32.xlu0 %v4474_v63 }
0x2033   : > { %v4471_v0 = vsel %vm386_vm0, %v4469_v37, 0.0 }
0x2034   : > { %4472 = vadd.xlane.f32.xlu1 %v4471_v0 }
0x2036   : > { %4645 = vadd.xlane.f32.xlu0 %v4644_v8 }
0x2038   : > { %4648 = vadd.xlane.f32.xlu1 %v4647_v10 }
0x20bb   : > { %v4476_v48 = vpop.xlane.xlu0 %4475 }
0x20bc   : > { %v4478_v28 = vmul.f32 0.03125, %v4476_v48 }
0x20bd   : > { %v4473_v32 = vpop.xlane.xlu1 %4472 }
0x20be   : > { %v4480_v11 = vadd.f32 1e-05, %v4478_v28  ;;  %v4477_v16 = vmul.f32 0.03125, %v4473_v32 }
0x20bf   : > { %v4646_v3 = vpop.xlane.xlu0 %4645 }
0x20c0   : > { %5376 = vrsqrt.f32 %v4480_v11  ;;  %v4479_v26 = vadd.f32 1e-05, %v4477_v16  ;;  %v4650_v39 = vmax.f32 %v4646_v3, 1.0 }
0x20c1   : > { %v4649_v4 = vpop.xlane.xlu1 %4648 }
0x20c2   : > { %5378 = vrsqrt.f32 %v4479_v26  ;;  %v4651_v24 = vmax.f32 %v4649_v4, 1.0 }
0x20c4   : > { %5380 = vrcp.f32 %v4651_v24 }
0x20c5   : > { %5382 = vrcp.f32 %v4650_v39 }
0x20cd   : > { %v5377_v2 = vpop.eup %5376 }
0x20ce   : > { %v4484_v7 = vmul.f32 %v5377_v2, %v4468_v60 }
0x20cf   : > { %v5379_v19 = vpop.eup %5378 }
0x20d0   : > { %v4483_v27 = vmul.f32 %v5379_v19, %v4467_v41  ;;  %v4490_v5 = vmul.f32 %v4488_v22, %v4484_v7 }
0x20d1   : > { %v5381_v40 = vpop.eup %5380 }
0x20d2   : > { %v4489_v17 = vmul.f32 %v4488_v22, %v4483_v27  ;;  %v4496_v49 = vadd.f32 %v4845_v25, %v4490_v5  ;;  %v5383_v31 = vpop.eup %5382  ;;  %v4661_v33 = vrot.slane %v5381_v40, %v5525_v20 }
0x20d3   : > { %v4657_v1 = vrot.slane %v5383_v31, %v5525_v20 }
0x20d4   : > { %v4495_v30 = vadd.f32 %v4845_v25, %v4489_v17 }
0x20d6   : > { %5269 = vmatpush3.msra.mxu0 %v4495_v30 }
0x20d7   : > { %5271 = vmatmul.mubr.msk.f32.vlgmr.msra.gmra.mxu0 %vm497_vm2, %v5384_v6  ;;  %5273 = vmatprep.subr.mxu0 %v5395_v14 }
0x20d8   : > { %5274 = vmatpush3.msra.mxu0 %v4496_v49  ;;  %5275 = vmatprep.mubr.msk.f32.mxu0 %vm5396_vm1, %v5395_v14 }
0x20db   : > { %5276 = vmatmul.mubr.msk.f32.vlgmr.msra.gmra.mxu0 %vm497_vm2, %v5385_v9 }
0x2197   : > { %v4566_v15 = vpop.f32.mrf.mxu0 }
0x2198   : > { %v4662_v18 = vmul.f32 %v4657_v1, %v4566_v15 }
0x2199   : > { %v5272_v29 = vpop.f32.mrf.mxu0 }
0x219b   : > { %v4639_v14 = vpop.f32.mrf.mxu0 }
0x219c   : > { %v4663_v34 = vmul.f32 %v4661_v33, %v4639_v14 }
0x219d   : > { %v5277_v42 = vpop.f32.mrf.mxu0 }
0x219e   : > { %v4666_v21 = vrot.slane %v4663_v34, 7 }
0x21a0   : > { %v4668_v35 = vsel %vm4667_vm5, %v4666_v21, %v4662_v18 }
0x21a1   : > { %4671 = vst.msk [vmem:[%s351_s17] sm:$0x3] %vm4670_vm6, %v4668_v35 }
0x21a2 PF: > { %s19_s30 = sadd.s32 1, %s5392_s30  }
0x21a3   : > { %p16_p5 = scmp.ge.s32.totalorder %s19_s30, 4  }
0x21a5   :  { %18 = sbr.rel (!%p16_p5) target bundleno = 1 (0x1), region = 95 }

</bundles_post_ra>
